<compile_context>
chip_gen: v7x
topology: tpu7x:2x2x1
jax: 0.10.0
libtpu: 0.0.40
codegen_flags: <defaults>
</compile_context>

<pallas_src>
import math

import jax
import jax.numpy as jnp
from jax.experimental import pallas as pl
from jax.experimental.pallas import tpu as pltpu

LEAKY_SLOPE = 0.01
BN_EPS = 1e-5

IN_DIM = 200     # trajectory feature dim
IN_PAD = 256     # padded to lane multiple
HID = 512
BD_PAD = 128     # bottleneck padded to lane multiple
OUT_DIM = 200
OUT_PAD = 256

# matmul shapes inside the fused kernel (padded), for the cost estimate
_MATMUL_DIMS = ((IN_PAD, HID), (HID, HID), (HID, HID), (HID, BD_PAD),
                (BD_PAD, HID), (HID, HID), (HID, HID), (HID, OUT_PAD))

# Row indices inside the packed (20, 512) vector array.
_B1, _G1, _BE1 = 0, 1, 2
_B2, _G2, _BE2 = 3, 4, 5
_B3, _G3, _BE3 = 6, 7, 8
_B4 = 9
_B5, _G5, _BE5 = 10, 11, 12
_B6, _G6, _BE6 = 13, 14, 15
_B7, _G7, _BE7 = 16, 17, 18
_B8 = 19
_NUM_VEC_ROWS = 20


# ----------------------------- Fused Pallas kernel -----------------------------

def _fused_ae_kernel(x_ref, w1_ref, vec_ref, whh_hbm, w4_hbm, w5_hbm, w8_hbm,
                     o_ref, whh_buf, w4_buf, w5_buf, w8_buf, sem):
    # ---- issue all later-layer weight DMAs up front (overlap with compute) ----
    copies = (
        pltpu.make_async_copy(whh_hbm.at[0], whh_buf.at[0], sem.at[0]),   # layer 2
        pltpu.make_async_copy(whh_hbm.at[1], whh_buf.at[1], sem.at[1]),   # layer 3
        pltpu.make_async_copy(w4_hbm, w4_buf, sem.at[2]),                 # layer 4
        pltpu.make_async_copy(w5_hbm, w5_buf, sem.at[3]),                 # layer 5
        pltpu.make_async_copy(whh_hbm.at[2], whh_buf.at[2], sem.at[4]),   # layer 6
        pltpu.make_async_copy(whh_hbm.at[3], whh_buf.at[3], sem.at[5]),   # layer 7
        pltpu.make_async_copy(w8_hbm, w8_buf, sem.at[6]),                 # layer 8
    )
    for cp in copies:
        cp.start()

    inv_n = 1.0 / x_ref.shape[0]

    def lin(h, w, bias_row):
        # bf16 x bf16 MXU matmul with f32 accumulation, f32 bias add.
        b = vec_ref[bias_row:bias_row + 1, :w.shape[1]]
        return jnp.dot(h.astype(jnp.bfloat16), w,
                       preferred_element_type=jnp.float32) + b

    def bn_lrelu(y, g_row, be_row):
        # BatchNorm1d training-mode stats (biased variance) + LeakyReLU, all f32.
        # One-pass stats: sum(y) and sum(y*y) are independent cross-sublane reductions;
        # normalization is folded into a single FMA over the (N, 512) tensor.
        g = vec_ref[g_row:g_row + 1, :]
        be = vec_ref[be_row:be_row + 1, :]
        s1 = jnp.sum(y, axis=0, keepdims=True)
        s2 = jnp.sum(y * y, axis=0, keepdims=True)
        mean = s1 * inv_n
        var = s2 * inv_n - mean * mean
        scale = g * jax.lax.rsqrt(var + BN_EPS)
        shift = be - mean * scale
        z = y * scale + shift
        return jnp.maximum(z, LEAKY_SLOPE * z)

    h = x_ref[...]
    # encoder --------------------------------------------------------------
    h = bn_lrelu(lin(h, w1_ref[...], _B1), _G1, _BE1)
    copies[0].wait()
    h = bn_lrelu(lin(h, whh_buf[0], _B2), _G2, _BE2)
    copies[1].wait()
    h = bn_lrelu(lin(h, whh_buf[1], _B3), _G3, _BE3)
    copies[2].wait()
    h = lin(h, w4_buf[...], _B4)               # bottleneck code (padded to 128 lanes)
    # decoder --------------------------------------------------------------
    copies[3].wait()
    h = bn_lrelu(lin(h, w5_buf[...], _B5), _G5, _BE5)
    copies[4].wait()
    h = bn_lrelu(lin(h, whh_buf[2], _B6), _G6, _BE6)
    copies[5].wait()
    h = bn_lrelu(lin(h, whh_buf[3], _B7), _G7, _BE7)
    copies[6].wait()
    o_ref[...] = jax.nn.sigmoid(lin(h, w8_buf[...], _B8))


def _vmem_spec():
    return pl.BlockSpec(memory_space=pltpu.MemorySpace.VMEM)


def _hbm_spec():
    return pl.BlockSpec(memory_space=pl.ANY)


# ----------------------------- Forward wrappers -----------------------------

@jax.jit
def trajectory_ae_forward(x, params):
    n = x.shape[0]
    x_pad = jnp.pad(x, ((0, 0), (0, IN_PAD - x.shape[1])))

    flops = int(2 * n * sum(fi * fo for fi, fo in _MATMUL_DIMS))
    transcendentals = int(6 * HID + n * OUT_PAD)          # BN rsqrt + sigmoid
    bytes_accessed = int(
        sum(p.size * p.dtype.itemsize for p in jax.tree_util.tree_leaves(params))
        + x_pad.size * 4 + n * OUT_PAD * 4)

    out_pad = pl.pallas_call(
        _fused_ae_kernel,
        out_shape=jax.ShapeDtypeStruct((n, OUT_PAD), jnp.float32),
        in_specs=[
            _vmem_spec(),   # x (needed immediately)
            _vmem_spec(),   # w1 (needed immediately)
            _vmem_spec(),   # packed bias/gamma/beta vectors (40 KB)
            _hbm_spec(),    # stacked hidden weights (layers 2,3,6,7) -> manual DMA
            _hbm_spec(),    # w4 -> manual DMA
            _hbm_spec(),    # w5 -> manual DMA
            _hbm_spec(),    # w8 -> manual DMA
        ],
        out_specs=_vmem_spec(),
        scratch_shapes=[
            pltpu.VMEM((4, HID, HID), jnp.bfloat16),    # hidden-weight buffer (2 MiB)
            pltpu.VMEM((HID, BD_PAD), jnp.bfloat16),    # w4 buffer
            pltpu.VMEM((BD_PAD, HID), jnp.bfloat16),    # w5 buffer
            pltpu.VMEM((HID, OUT_PAD), jnp.bfloat16),   # w8 buffer
            pltpu.SemaphoreType.DMA((7,)),              # one sem per layer DMA
        ],
        cost_estimate=pl.CostEstimate(flops=flops,
                                      transcendentals=transcendentals,
                                      bytes_accessed=bytes_accessed),
    )(x_pad, params["w1"], params["vecs"], params["w_hh"],
      params["w4"], params["w5"], params["w8"])
    return out_pad[:, :OUT_DIM]


def trajectory_ae_forward_ref(x, params):
    """Pure-JAX reference with identical (padded, bf16-weight, one-pass-BN) math."""
    vecs = params["vecs"]

    def v(row, width=HID):
        return vecs[row:row + 1, :width]

    def lin(h, w, b):
        return jnp.dot(h.astype(jnp.bfloat16), w,
                       preferred_element_type=jnp.float32) + b

    def bn_lrelu(y, g, be):
        n = y.shape[0]
        mean = jnp.sum(y, axis=0, keepdims=True) / n
        var = jnp.sum(y * y, axis=0, keepdims=True) / n - mean * mean
        scale = g * jax.lax.rsqrt(var + BN_EPS)
        shift = be - mean * scale
        z = y * scale + shift
        return jnp.maximum(z, LEAKY_SLOPE * z)

    w_hh = params["w_hh"]
    h = jnp.pad(x, ((0, 0), (0, IN_PAD - x.shape[1])))
    h = bn_lrelu(lin(h, params["w1"], v(_B1)), v(_G1), v(_BE1))
    h = bn_lrelu(lin(h, w_hh[0], v(_B2)), v(_G2), v(_BE2))
    h = bn_lrelu(lin(h, w_hh[1], v(_B3)), v(_G3), v(_BE3))
    h = lin(h, params["w4"], v(_B4, BD_PAD))
    h = bn_lrelu(lin(h, params["w5"], v(_B5)), v(_G5), v(_BE5))
    h = bn_lrelu(lin(h, w_hh[2], v(_B6)), v(_G6), v(_BE6))
    h = bn_lrelu(lin(h, w_hh[3], v(_B7)), v(_G7), v(_BE7))
    out = jax.nn.sigmoid(lin(h, params["w8"], v(_B8, OUT_PAD)))
    return out[:, :OUT_DIM]


# ----------------------------- Parameter setup -----------------------------

def _linear_init(key, f_in, f_out):
    kw, kb = jax.random.split(key)
    s = 1.0 / math.sqrt(f_in)
    w = jax.random.uniform(kw, (f_in, f_out), jnp.float32, -s, s)
    b = jax.random.uniform(kb, (f_out,), jnp.float32, -s, s)
    return w, b


def _bn_init(key, f):
    kg, kb = jax.random.split(key)
    g = 1.0 + 0.1 * jax.random.normal(kg, (f,), jnp.float32)
    be = 0.1 * jax.random.normal(kb, (f,), jnp.float32)
    return g, be


def _pad2(w, rows, cols):
    return jnp.pad(w, ((0, rows - w.shape[0]), (0, cols - w.shape[1])))


def _pad_vec(v, cols):
    return jnp.pad(v, (0, cols - v.shape[0]))


def init_params(key, b_dim):
    keys = jax.random.split(key, 14)
    w1, b1 = _linear_init(keys[0], IN_DIM, HID)
    g1, be1 = _bn_init(keys[1], HID)
    w2, b2 = _linear_init(keys[2], HID, HID)
    g2, be2 = _bn_init(keys[3], HID)
    w3, b3 = _linear_init(keys[4], HID, HID)
    g3, be3 = _bn_init(keys[5], HID)
    w4, b4 = _linear_init(keys[6], HID, b_dim)      # encoder out (bottleneck)
    w5, b5 = _linear_init(keys[7], b_dim, HID)      # decoder in
    g5, be5 = _bn_init(keys[8], HID)
    w6, b6 = _linear_init(keys[9], HID, HID)
    g6, be6 = _bn_init(keys[10], HID)
    w7, b7 = _linear_init(keys[11], HID, HID)
    g7, be7 = _bn_init(keys[12], HID)
    w8, b8 = _linear_init(keys[13], HID, OUT_DIM)   # decoder out

    # --- packed kernel-side layout ---
    # Weights: bf16 (MXU operands).  Lane-ragged dims zero-padded to 128-multiples
    # (padded rows/cols are zero so they contribute nothing downstream).
    w1_p = _pad2(w1, IN_PAD, HID).astype(jnp.bfloat16)           # (256, 512)
    w_hh = jnp.stack([w2, w3, w6, w7]).astype(jnp.bfloat16)      # (4, 512, 512)
    w4_p = _pad2(w4, HID, BD_PAD).astype(jnp.bfloat16)           # (512, 128)
    w5_p = _pad2(w5, BD_PAD, HID).astype(jnp.bfloat16)           # (128, 512)
    w8_p = _pad2(w8, HID, OUT_PAD).astype(jnp.bfloat16)          # (512, 256)

    # All 1-D per-feature params packed into one f32 array (one auto-DMA).
    vec_rows = [b1, g1, be1,
                b2, g2, be2,
                b3, g3, be3,
                _pad_vec(b4, HID),
                b5, g5, be5,
                b6, g6, be6,
                b7, g7, be7,
                _pad_vec(b8, HID)]
    assert len(vec_rows) == _NUM_VEC_ROWS
    vecs = jnp.stack(vec_rows).astype(jnp.float32)               # (20, 512)

    return {"w1": w1_p, "vecs": vecs, "w_hh": w_hh,
            "w4": w4_p, "w5": w5_p, "w8": w8_p}


# ----------------------------- Main -----------------------------

if __name__ == "__main__":
    key = jax.random.PRNGKey(0)
    k_params, k_x = jax.random.split(key)

    B_DIM = 32   # bottleneck dimension b_dim
    N = 8        # BatchNorm1d training stats need N > 1; 8 = one sublane tile.
                 # Larger N (multiple of 8) amortizes the weight HBM read — use it if the
                 # larger batch is the intended BN statistical unit.

    params = init_params(k_params, B_DIM)
    x = jax.random.uniform(k_x, (N, IN_DIM), jnp.float32)

    out = jax.block_until_ready(trajectory_ae_forward(x, params))
    ref = trajectory_ae_forward_ref(x, params)

    assert out.shape == (N, OUT_DIM), out.shape
    assert jnp.allclose(out, ref, rtol=2e-3, atol=2e-3), "mismatch vs JAX reference"

    print("KERNEL_OK")
</pallas_src>

<mosaic_0001>
module attributes {stable_mosaic.version = 11 : i64} {
  func.func @_fused_ae_kernel(%arg0: memref<8x256xf32, #tpu.memory_space<vmem>>, %arg1: memref<256x512xbf16, #tpu.memory_space<vmem>>, %arg2: memref<20x512xf32, #tpu.memory_space<vmem>>, %arg3: memref<4x512x512xbf16, #tpu.memory_space<any>>, %arg4: memref<512x128xbf16, #tpu.memory_space<any>>, %arg5: memref<128x512xbf16, #tpu.memory_space<any>>, %arg6: memref<512x256xbf16, #tpu.memory_space<any>>, %arg7: memref<8x256xf32, #tpu.memory_space<vmem>>, %arg8: memref<4x512x512xbf16, #tpu.memory_space<vmem>>, %arg9: memref<512x128xbf16, #tpu.memory_space<vmem>>, %arg10: memref<128x512xbf16, #tpu.memory_space<vmem>>, %arg11: memref<512x256xbf16, #tpu.memory_space<vmem>>, %arg12: memref<7x!tpu.dma_semaphore, #tpu.memory_space<semaphore_mem>>) attributes {dimension_semantics = [], scalar_prefetch = 0 : i64, scratch_operands = 5 : i64, tpu.core_type = #tpu.core_type<tc>} {
    %c0_i32 = arith.constant 0 : i32
    %c0_i32_0 = arith.constant 0 : i32
    %c0_i32_1 = arith.constant 0 : i32
    %c0_i32_2 = arith.constant 0 : i32
    %c0_i32_3 = arith.constant 0 : i32
    %0 = tpu.memref_slice %arg3[%c0_i32, %c0_i32_2, %c0_i32_3] : memref<4x512x512xbf16, #tpu.memory_space<any>> -> memref<1x512x512xbf16, #tpu.memory_space<any>>
    %1 = tpu.memref_squeeze %0 : memref<1x512x512xbf16, #tpu.memory_space<any>> -> memref<512x512xbf16, #tpu.memory_space<any>>
    %c0_i32_4 = arith.constant 0 : i32
    %c0_i32_5 = arith.constant 0 : i32
    %2 = tpu.memref_slice %arg8[%c0_i32_0, %c0_i32_4, %c0_i32_5] : memref<4x512x512xbf16, #tpu.memory_space<vmem>> -> memref<1x512x512xbf16, #tpu.memory_space<vmem>>
    %3 = tpu.memref_squeeze %2 : memref<1x512x512xbf16, #tpu.memory_space<vmem>> -> memref<512x512xbf16, #tpu.memory_space<vmem>>
    %4 = tpu.memref_slice %arg12[%c0_i32_1] : memref<7x!tpu.dma_semaphore, #tpu.memory_space<semaphore_mem>> -> memref<1x!tpu.dma_semaphore, #tpu.memory_space<semaphore_mem>>
    %5 = tpu.memref_squeeze %4 : memref<1x!tpu.dma_semaphore, #tpu.memory_space<semaphore_mem>> -> memref<!tpu.dma_semaphore, #tpu.memory_space<semaphore_mem>>
    tpu.enqueue_dma source(%1 : memref<512x512xbf16, #tpu.memory_space<any>>) target(%3 : memref<512x512xbf16, #tpu.memory_space<vmem>>) target_semaphore(%5 : memref<!tpu.dma_semaphore, #tpu.memory_space<semaphore_mem>>)
    %c1_i32 = arith.constant 1 : i32
    %c1_i32_6 = arith.constant 1 : i32
    %c1_i32_7 = arith.constant 1 : i32
    %c0_i32_8 = arith.constant 0 : i32
    %c0_i32_9 = arith.constant 0 : i32
    %6 = tpu.memref_slice %arg3[%c1_i32, %c0_i32_8, %c0_i32_9] : memref<4x512x512xbf16, #tpu.memory_space<any>> -> memref<1x512x512xbf16, #tpu.memory_space<any>>
    %7 = tpu.memref_squeeze %6 : memref<1x512x512xbf16, #tpu.memory_space<any>> -> memref<512x512xbf16, #tpu.memory_space<any>>
    %c0_i32_10 = arith.constant 0 : i32
    %c0_i32_11 = arith.constant 0 : i32
    %8 = tpu.memref_slice %arg8[%c1_i32_6, %c0_i32_10, %c0_i32_11] : memref<4x512x512xbf16, #tpu.memory_space<vmem>> -> memref<1x512x512xbf16, #tpu.memory_space<vmem>>
    %9 = tpu.memref_squeeze %8 : memref<1x512x512xbf16, #tpu.memory_space<vmem>> -> memref<512x512xbf16, #tpu.memory_space<vmem>>
    %10 = tpu.memref_slice %arg12[%c1_i32_7] : memref<7x!tpu.dma_semaphore, #tpu.memory_space<semaphore_mem>> -> memref<1x!tpu.dma_semaphore, #tpu.memory_space<semaphore_mem>>
    %11 = tpu.memref_squeeze %10 : memref<1x!tpu.dma_semaphore, #tpu.memory_space<semaphore_mem>> -> memref<!tpu.dma_semaphore, #tpu.memory_space<semaphore_mem>>
    tpu.enqueue_dma source(%7 : memref<512x512xbf16, #tpu.memory_space<any>>) target(%9 : memref<512x512xbf16, #tpu.memory_space<vmem>>) target_semaphore(%11 : memref<!tpu.dma_semaphore, #tpu.memory_space<semaphore_mem>>)
    %c2_i32 = arith.constant 2 : i32
    %12 = tpu.memref_slice %arg12[%c2_i32] : memref<7x!tpu.dma_semaphore, #tpu.memory_space<semaphore_mem>> -> memref<1x!tpu.dma_semaphore, #tpu.memory_space<semaphore_mem>>
    %13 = tpu.memref_squeeze %12 : memref<1x!tpu.dma_semaphore, #tpu.memory_space<semaphore_mem>> -> memref<!tpu.dma_semaphore, #tpu.memory_space<semaphore_mem>>
    tpu.enqueue_dma source(%arg4 : memref<512x128xbf16, #tpu.memory_space<any>>) target(%arg9 : memref<512x128xbf16, #tpu.memory_space<vmem>>) target_semaphore(%13 : memref<!tpu.dma_semaphore, #tpu.memory_space<semaphore_mem>>)
    %c3_i32 = arith.constant 3 : i32
    %14 = tpu.memref_slice %arg12[%c3_i32] : memref<7x!tpu.dma_semaphore, #tpu.memory_space<semaphore_mem>> -> memref<1x!tpu.dma_semaphore, #tpu.memory_space<semaphore_mem>>
    %15 = tpu.memref_squeeze %14 : memref<1x!tpu.dma_semaphore, #tpu.memory_space<semaphore_mem>> -> memref<!tpu.dma_semaphore, #tpu.memory_space<semaphore_mem>>
    tpu.enqueue_dma source(%arg5 : memref<128x512xbf16, #tpu.memory_space<any>>) target(%arg10 : memref<128x512xbf16, #tpu.memory_space<vmem>>) target_semaphore(%15 : memref<!tpu.dma_semaphore, #tpu.memory_space<semaphore_mem>>)
    %c2_i32_12 = arith.constant 2 : i32
    %c2_i32_13 = arith.constant 2 : i32
    %c4_i32 = arith.constant 4 : i32
    %c0_i32_14 = arith.constant 0 : i32
    %c0_i32_15 = arith.constant 0 : i32
    %16 = tpu.memref_slice %arg3[%c2_i32_12, %c0_i32_14, %c0_i32_15] : memref<4x512x512xbf16, #tpu.memory_space<any>> -> memref<1x512x512xbf16, #tpu.memory_space<any>>
    %17 = tpu.memref_squeeze %16 : memref<1x512x512xbf16, #tpu.memory_space<any>> -> memref<512x512xbf16, #tpu.memory_space<any>>
    %c0_i32_16 = arith.constant 0 : i32
    %c0_i32_17 = arith.constant 0 : i32
    %18 = tpu.memref_slice %arg8[%c2_i32_13, %c0_i32_16, %c0_i32_17] : memref<4x512x512xbf16, #tpu.memory_space<vmem>> -> memref<1x512x512xbf16, #tpu.memory_space<vmem>>
    %19 = tpu.memref_squeeze %18 : memref<1x512x512xbf16, #tpu.memory_space<vmem>> -> memref<512x512xbf16, #tpu.memory_space<vmem>>
    %20 = tpu.memref_slice %arg12[%c4_i32] : memref<7x!tpu.dma_semaphore, #tpu.memory_space<semaphore_mem>> -> memref<1x!tpu.dma_semaphore, #tpu.memory_space<semaphore_mem>>
    %21 = tpu.memref_squeeze %20 : memref<1x!tpu.dma_semaphore, #tpu.memory_space<semaphore_mem>> -> memref<!tpu.dma_semaphore, #tpu.memory_space<semaphore_mem>>
    tpu.enqueue_dma source(%17 : memref<512x512xbf16, #tpu.memory_space<any>>) target(%19 : memref<512x512xbf16, #tpu.memory_space<vmem>>) target_semaphore(%21 : memref<!tpu.dma_semaphore, #tpu.memory_space<semaphore_mem>>)
    %c3_i32_18 = arith.constant 3 : i32
    %c3_i32_19 = arith.constant 3 : i32
    %c5_i32 = arith.constant 5 : i32
    %c0_i32_20 = arith.constant 0 : i32
    %c0_i32_21 = arith.constant 0 : i32
    %22 = tpu.memref_slice %arg3[%c3_i32_18, %c0_i32_20, %c0_i32_21] : memref<4x512x512xbf16, #tpu.memory_space<any>> -> memref<1x512x512xbf16, #tpu.memory_space<any>>
    %23 = tpu.memref_squeeze %22 : memref<1x512x512xbf16, #tpu.memory_space<any>> -> memref<512x512xbf16, #tpu.memory_space<any>>
    %c0_i32_22 = arith.constant 0 : i32
    %c0_i32_23 = arith.constant 0 : i32
    %24 = tpu.memref_slice %arg8[%c3_i32_19, %c0_i32_22, %c0_i32_23] : memref<4x512x512xbf16, #tpu.memory_space<vmem>> -> memref<1x512x512xbf16, #tpu.memory_space<vmem>>
    %25 = tpu.memref_squeeze %24 : memref<1x512x512xbf16, #tpu.memory_space<vmem>> -> memref<512x512xbf16, #tpu.memory_space<vmem>>
    %26 = tpu.memref_slice %arg12[%c5_i32] : memref<7x!tpu.dma_semaphore, #tpu.memory_space<semaphore_mem>> -> memref<1x!tpu.dma_semaphore, #tpu.memory_space<semaphore_mem>>
    %27 = tpu.memref_squeeze %26 : memref<1x!tpu.dma_semaphore, #tpu.memory_space<semaphore_mem>> -> memref<!tpu.dma_semaphore, #tpu.memory_space<semaphore_mem>>
    tpu.enqueue_dma source(%23 : memref<512x512xbf16, #tpu.memory_space<any>>) target(%25 : memref<512x512xbf16, #tpu.memory_space<vmem>>) target_semaphore(%27 : memref<!tpu.dma_semaphore, #tpu.memory_space<semaphore_mem>>)
    %c6_i32 = arith.constant 6 : i32
    %28 = tpu.memref_slice %arg12[%c6_i32] : memref<7x!tpu.dma_semaphore, #tpu.memory_space<semaphore_mem>> -> memref<1x!tpu.dma_semaphore, #tpu.memory_space<semaphore_mem>>
    %29 = tpu.memref_squeeze %28 : memref<1x!tpu.dma_semaphore, #tpu.memory_space<semaphore_mem>> -> memref<!tpu.dma_semaphore, #tpu.memory_space<semaphore_mem>>
    tpu.enqueue_dma source(%arg6 : memref<512x256xbf16, #tpu.memory_space<any>>) target(%arg11 : memref<512x256xbf16, #tpu.memory_space<vmem>>) target_semaphore(%29 : memref<!tpu.dma_semaphore, #tpu.memory_space<semaphore_mem>>)
    %c0 = arith.constant 0 : index
    %c0_24 = arith.constant 0 : index
    %30 = vector.load %arg0[%c0, %c0_24] : memref<8x256xf32, #tpu.memory_space<vmem>>, vector<8x256xf32>
    %c0_25 = arith.constant 0 : index
    %c0_26 = arith.constant 0 : index
    %31 = vector.load %arg1[%c0_25, %c0_26] : memref<256x512xbf16, #tpu.memory_space<vmem>>, vector<256x512xbf16>
    %c0_27 = arith.constant 0 : index
    %c0_28 = arith.constant 0 : index
    %32 = vector.load %arg2[%c0_27, %c0_28] : memref<20x512xf32, #tpu.memory_space<vmem>>, vector<1x512xf32>
    %33 = arith.truncf %30 : vector<8x256xf32> to vector<8x256xbf16>
    %cst = arith.constant dense<0.000000e+00> : vector<8x512xf32>
    %34 = tpu.matmul %33, %31, %cst {dimension_numbers = #tpu.dot_dimension_numbers<[1], [0], [0], [1], [0, 0, 1, 1], [], []>} : vector<8x256xbf16>, vector<256x512xbf16>, vector<8x512xf32> -> vector<8x512xf32>
    %35 = vector.broadcast %32 : vector<1x512xf32> to vector<8x512xf32>
    %36 = arith.addf %34, %35 : vector<8x512xf32>
    %c1 = arith.constant 1 : index
    %c0_29 = arith.constant 0 : index
    %37 = vector.load %arg2[%c1, %c0_29] : memref<20x512xf32, #tpu.memory_space<vmem>>, vector<1x512xf32>
    %c2 = arith.constant 2 : index
    %c0_30 = arith.constant 0 : index
    %38 = vector.load %arg2[%c2, %c0_30] : memref<20x512xf32, #tpu.memory_space<vmem>>, vector<1x512xf32>
    %cst_31 = arith.constant dense<0.000000e+00> : vector<512xf32>
    %39 = vector.multi_reduction <add>, %36, %cst_31 [0] : vector<8x512xf32> to vector<512xf32>
    %40 = vector.shape_cast %39 : vector<512xf32> to vector<1x512xf32>
    %41 = arith.mulf %36, %36 : vector<8x512xf32>
    %cst_32 = arith.constant dense<0.000000e+00> : vector<512xf32>
    %42 = vector.multi_reduction <add>, %41, %cst_32 [0] : vector<8x512xf32> to vector<512xf32>
    %43 = vector.shape_cast %42 : vector<512xf32> to vector<1x512xf32>
    %cst_33 = arith.constant 1.250000e-01 : f32
    %44 = vector.broadcast %cst_33 : f32 to vector<1x512xf32>
    %45 = arith.mulf %40, %44 : vector<1x512xf32>
    %cst_34 = arith.constant 1.250000e-01 : f32
    %46 = vector.broadcast %cst_34 : f32 to vector<1x512xf32>
    %47 = arith.mulf %43, %46 : vector<1x512xf32>
    %48 = arith.mulf %45, %45 : vector<1x512xf32>
    %49 = arith.subf %47, %48 : vector<1x512xf32>
    %cst_35 = arith.constant 9.99999974E-6 : f32
    %50 = vector.broadcast %cst_35 : f32 to vector<1x512xf32>
    %51 = arith.addf %49, %50 : vector<1x512xf32>
    %52 = math.rsqrt %51 : vector<1x512xf32>
    %53 = arith.mulf %37, %52 : vector<1x512xf32>
    %54 = arith.mulf %45, %53 : vector<1x512xf32>
    %55 = arith.subf %38, %54 : vector<1x512xf32>
    %56 = vector.broadcast %53 : vector<1x512xf32> to vector<8x512xf32>
    %57 = arith.mulf %36, %56 : vector<8x512xf32>
    %58 = vector.broadcast %55 : vector<1x512xf32> to vector<8x512xf32>
    %59 = arith.addf %57, %58 : vector<8x512xf32>
    %cst_36 = arith.constant 0.00999999977 : f32
    %60 = vector.broadcast %cst_36 : f32 to vector<8x512xf32>
    %61 = arith.mulf %60, %59 : vector<8x512xf32>
    %62 = arith.maximumf %59, %61 : vector<8x512xf32>
    %c0_i32_37 = arith.constant 0 : i32
    %c0_i32_38 = arith.constant 0 : i32
    %c0_i32_39 = arith.constant 0 : i32
    %c0_i32_40 = arith.constant 0 : i32
    %c0_i32_41 = arith.constant 0 : i32
    %63 = tpu.memref_slice %arg3[%c0_i32_37, %c0_i32_40, %c0_i32_41] : memref<4x512x512xbf16, #tpu.memory_space<any>> -> memref<1x512x512xbf16, #tpu.memory_space<any>>
    %64 = tpu.memref_squeeze %63 : memref<1x512x512xbf16, #tpu.memory_space<any>> -> memref<512x512xbf16, #tpu.memory_space<any>>
    %c0_i32_42 = arith.constant 0 : i32
    %c0_i32_43 = arith.constant 0 : i32
    %65 = tpu.memref_slice %arg8[%c0_i32_38, %c0_i32_42, %c0_i32_43] : memref<4x512x512xbf16, #tpu.memory_space<vmem>> -> memref<1x512x512xbf16, #tpu.memory_space<vmem>>
    %66 = tpu.memref_squeeze %65 : memref<1x512x512xbf16, #tpu.memory_space<vmem>> -> memref<512x512xbf16, #tpu.memory_space<vmem>>
    %67 = tpu.memref_slice %arg12[%c0_i32_39] : memref<7x!tpu.dma_semaphore, #tpu.memory_space<semaphore_mem>> -> memref<1x!tpu.dma_semaphore, #tpu.memory_space<semaphore_mem>>
    %68 = tpu.memref_squeeze %67 : memref<1x!tpu.dma_semaphore, #tpu.memory_space<semaphore_mem>> -> memref<!tpu.dma_semaphore, #tpu.memory_space<semaphore_mem>>
    tpu.wait_dma2 semaphore(%68 : memref<!tpu.dma_semaphore, #tpu.memory_space<semaphore_mem>>) src(%64 : memref<512x512xbf16, #tpu.memory_space<any>>) dst(%66 : memref<512x512xbf16, #tpu.memory_space<vmem>>)
    %c0_44 = arith.constant 0 : index
    %c0_45 = arith.constant 0 : index
    %c0_46 = arith.constant 0 : index
    %69 = vector.load %arg8[%c0_44, %c0_45, %c0_46] : memref<4x512x512xbf16, #tpu.memory_space<vmem>>, vector<1x512x512xbf16>
    %70 = vector.shape_cast %69 : vector<1x512x512xbf16> to vector<512x512xbf16>
    %c3 = arith.constant 3 : index
    %c0_47 = arith.constant 0 : index
    %71 = vector.load %arg2[%c3, %c0_47] : memref<20x512xf32, #tpu.memory_space<vmem>>, vector<1x512xf32>
    %72 = arith.truncf %62 : vector<8x512xf32> to vector<8x512xbf16>
    %cst_48 = arith.constant dense<0.000000e+00> : vector<8x512xf32>
    %73 = tpu.matmul %72, %70, %cst_48 {dimension_numbers = #tpu.dot_dimension_numbers<[1], [0], [0], [1], [0, 0, 1, 1], [], []>} : vector<8x512xbf16>, vector<512x512xbf16>, vector<8x512xf32> -> vector<8x512xf32>
    %74 = vector.broadcast %71 : vector<1x512xf32> to vector<8x512xf32>
    %75 = arith.addf %73, %74 : vector<8x512xf32>
    %c4 = arith.constant 4 : index
    %c0_49 = arith.constant 0 : index
    %76 = vector.load %arg2[%c4, %c0_49] : memref<20x512xf32, #tpu.memory_space<vmem>>, vector<1x512xf32>
    %c5 = arith.constant 5 : index
    %c0_50 = arith.constant 0 : index
    %77 = vector.load %arg2[%c5, %c0_50] : memref<20x512xf32, #tpu.memory_space<vmem>>, vector<1x512xf32>
    %cst_51 = arith.constant dense<0.000000e+00> : vector<512xf32>
    %78 = vector.multi_reduction <add>, %75, %cst_51 [0] : vector<8x512xf32> to vector<512xf32>
    %79 = vector.shape_cast %78 : vector<512xf32> to vector<1x512xf32>
    %80 = arith.mulf %75, %75 : vector<8x512xf32>
    %cst_52 = arith.constant dense<0.000000e+00> : vector<512xf32>
    %81 = vector.multi_reduction <add>, %80, %cst_52 [0] : vector<8x512xf32> to vector<512xf32>
    %82 = vector.shape_cast %81 : vector<512xf32> to vector<1x512xf32>
    %cst_53 = arith.constant 1.250000e-01 : f32
    %83 = vector.broadcast %cst_53 : f32 to vector<1x512xf32>
    %84 = arith.mulf %79, %83 : vector<1x512xf32>
    %cst_54 = arith.constant 1.250000e-01 : f32
    %85 = vector.broadcast %cst_54 : f32 to vector<1x512xf32>
    %86 = arith.mulf %82, %85 : vector<1x512xf32>
    %87 = arith.mulf %84, %84 : vector<1x512xf32>
    %88 = arith.subf %86, %87 : vector<1x512xf32>
    %cst_55 = arith.constant 9.99999974E-6 : f32
    %89 = vector.broadcast %cst_55 : f32 to vector<1x512xf32>
    %90 = arith.addf %88, %89 : vector<1x512xf32>
    %91 = math.rsqrt %90 : vector<1x512xf32>
    %92 = arith.mulf %76, %91 : vector<1x512xf32>
    %93 = arith.mulf %84, %92 : vector<1x512xf32>
    %94 = arith.subf %77, %93 : vector<1x512xf32>
    %95 = vector.broadcast %92 : vector<1x512xf32> to vector<8x512xf32>
    %96 = arith.mulf %75, %95 : vector<8x512xf32>
    %97 = vector.broadcast %94 : vector<1x512xf32> to vector<8x512xf32>
    %98 = arith.addf %96, %97 : vector<8x512xf32>
    %cst_56 = arith.constant 0.00999999977 : f32
    %99 = vector.broadcast %cst_56 : f32 to vector<8x512xf32>
    %100 = arith.mulf %99, %98 : vector<8x512xf32>
    %101 = arith.maximumf %98, %100 : vector<8x512xf32>
    %c1_i32_57 = arith.constant 1 : i32
    %c1_i32_58 = arith.constant 1 : i32
    %c1_i32_59 = arith.constant 1 : i32
    %c0_i32_60 = arith.constant 0 : i32
    %c0_i32_61 = arith.constant 0 : i32
    %102 = tpu.memref_slice %arg3[%c1_i32_57, %c0_i32_60, %c0_i32_61] : memref<4x512x512xbf16, #tpu.memory_space<any>> -> memref<1x512x512xbf16, #tpu.memory_space<any>>
    %103 = tpu.memref_squeeze %102 : memref<1x512x512xbf16, #tpu.memory_space<any>> -> memref<512x512xbf16, #tpu.memory_space<any>>
    %c0_i32_62 = arith.constant 0 : i32
    %c0_i32_63 = arith.constant 0 : i32
    %104 = tpu.memref_slice %arg8[%c1_i32_58, %c0_i32_62, %c0_i32_63] : memref<4x512x512xbf16, #tpu.memory_space<vmem>> -> memref<1x512x512xbf16, #tpu.memory_space<vmem>>
    %105 = tpu.memref_squeeze %104 : memref<1x512x512xbf16, #tpu.memory_space<vmem>> -> memref<512x512xbf16, #tpu.memory_space<vmem>>
    %106 = tpu.memref_slice %arg12[%c1_i32_59] : memref<7x!tpu.dma_semaphore, #tpu.memory_space<semaphore_mem>> -> memref<1x!tpu.dma_semaphore, #tpu.memory_space<semaphore_mem>>
    %107 = tpu.memref_squeeze %106 : memref<1x!tpu.dma_semaphore, #tpu.memory_space<semaphore_mem>> -> memref<!tpu.dma_semaphore, #tpu.memory_space<semaphore_mem>>
    tpu.wait_dma2 semaphore(%107 : memref<!tpu.dma_semaphore, #tpu.memory_space<semaphore_mem>>) src(%103 : memref<512x512xbf16, #tpu.memory_space<any>>) dst(%105 : memref<512x512xbf16, #tpu.memory_space<vmem>>)
    %c1_64 = arith.constant 1 : index
    %c0_65 = arith.constant 0 : index
    %c0_66 = arith.constant 0 : index
    %108 = vector.load %arg8[%c1_64, %c0_65, %c0_66] : memref<4x512x512xbf16, #tpu.memory_space<vmem>>, vector<1x512x512xbf16>
    %109 = vector.shape_cast %108 : vector<1x512x512xbf16> to vector<512x512xbf16>
    %c6 = arith.constant 6 : index
    %c0_67 = arith.constant 0 : index
    %110 = vector.load %arg2[%c6, %c0_67] : memref<20x512xf32, #tpu.memory_space<vmem>>, vector<1x512xf32>
    %111 = arith.truncf %101 : vector<8x512xf32> to vector<8x512xbf16>
    %cst_68 = arith.constant dense<0.000000e+00> : vector<8x512xf32>
    %112 = tpu.matmul %111, %109, %cst_68 {dimension_numbers = #tpu.dot_dimension_numbers<[1], [0], [0], [1], [0, 0, 1, 1], [], []>} : vector<8x512xbf16>, vector<512x512xbf16>, vector<8x512xf32> -> vector<8x512xf32>
    %113 = vector.broadcast %110 : vector<1x512xf32> to vector<8x512xf32>
    %114 = arith.addf %112, %113 : vector<8x512xf32>
    %c7 = arith.constant 7 : index
    %c0_69 = arith.constant 0 : index
    %115 = vector.load %arg2[%c7, %c0_69] : memref<20x512xf32, #tpu.memory_space<vmem>>, vector<1x512xf32>
    %c8 = arith.constant 8 : index
    %c0_70 = arith.constant 0 : index
    %116 = vector.load %arg2[%c8, %c0_70] : memref<20x512xf32, #tpu.memory_space<vmem>>, vector<1x512xf32>
    %cst_71 = arith.constant dense<0.000000e+00> : vector<512xf32>
    %117 = vector.multi_reduction <add>, %114, %cst_71 [0] : vector<8x512xf32> to vector<512xf32>
    %118 = vector.shape_cast %117 : vector<512xf32> to vector<1x512xf32>
    %119 = arith.mulf %114, %114 : vector<8x512xf32>
    %cst_72 = arith.constant dense<0.000000e+00> : vector<512xf32>
    %120 = vector.multi_reduction <add>, %119, %cst_72 [0] : vector<8x512xf32> to vector<512xf32>
    %121 = vector.shape_cast %120 : vector<512xf32> to vector<1x512xf32>
    %cst_73 = arith.constant 1.250000e-01 : f32
    %122 = vector.broadcast %cst_73 : f32 to vector<1x512xf32>
    %123 = arith.mulf %118, %122 : vector<1x512xf32>
    %cst_74 = arith.constant 1.250000e-01 : f32
    %124 = vector.broadcast %cst_74 : f32 to vector<1x512xf32>
    %125 = arith.mulf %121, %124 : vector<1x512xf32>
    %126 = arith.mulf %123, %123 : vector<1x512xf32>
    %127 = arith.subf %125, %126 : vector<1x512xf32>
    %cst_75 = arith.constant 9.99999974E-6 : f32
    %128 = vector.broadcast %cst_75 : f32 to vector<1x512xf32>
    %129 = arith.addf %127, %128 : vector<1x512xf32>
    %130 = math.rsqrt %129 : vector<1x512xf32>
    %131 = arith.mulf %115, %130 : vector<1x512xf32>
    %132 = arith.mulf %123, %131 : vector<1x512xf32>
    %133 = arith.subf %116, %132 : vector<1x512xf32>
    %134 = vector.broadcast %131 : vector<1x512xf32> to vector<8x512xf32>
    %135 = arith.mulf %114, %134 : vector<8x512xf32>
    %136 = vector.broadcast %133 : vector<1x512xf32> to vector<8x512xf32>
    %137 = arith.addf %135, %136 : vector<8x512xf32>
    %cst_76 = arith.constant 0.00999999977 : f32
    %138 = vector.broadcast %cst_76 : f32 to vector<8x512xf32>
    %139 = arith.mulf %138, %137 : vector<8x512xf32>
    %140 = arith.maximumf %137, %139 : vector<8x512xf32>
    %c2_i32_77 = arith.constant 2 : i32
    %141 = tpu.memref_slice %arg12[%c2_i32_77] : memref<7x!tpu.dma_semaphore, #tpu.memory_space<semaphore_mem>> -> memref<1x!tpu.dma_semaphore, #tpu.memory_space<semaphore_mem>>
    %142 = tpu.memref_squeeze %141 : memref<1x!tpu.dma_semaphore, #tpu.memory_space<semaphore_mem>> -> memref<!tpu.dma_semaphore, #tpu.memory_space<semaphore_mem>>
    tpu.wait_dma2 semaphore(%142 : memref<!tpu.dma_semaphore, #tpu.memory_space<semaphore_mem>>) src(%arg4 : memref<512x128xbf16, #tpu.memory_space<any>>) dst(%arg9 : memref<512x128xbf16, #tpu.memory_space<vmem>>)
    %c0_78 = arith.constant 0 : index
    %c0_79 = arith.constant 0 : index
    %143 = vector.load %arg9[%c0_78, %c0_79] : memref<512x128xbf16, #tpu.memory_space<vmem>>, vector<512x128xbf16>
    %c9 = arith.constant 9 : index
    %c0_80 = arith.constant 0 : index
    %144 = vector.load %arg2[%c9, %c0_80] : memref<20x512xf32, #tpu.memory_space<vmem>>, vector<1x128xf32>
    %145 = arith.truncf %140 : vector<8x512xf32> to vector<8x512xbf16>
    %cst_81 = arith.constant dense<0.000000e+00> : vector<8x128xf32>
    %146 = tpu.matmul %145, %143, %cst_81 {dimension_numbers = #tpu.dot_dimension_numbers<[1], [0], [0], [1], [0, 0, 1, 1], [], []>} : vector<8x512xbf16>, vector<512x128xbf16>, vector<8x128xf32> -> vector<8x128xf32>
    %147 = vector.broadcast %144 : vector<1x128xf32> to vector<8x128xf32>
    %148 = arith.addf %146, %147 : vector<8x128xf32>
    %c3_i32_82 = arith.constant 3 : i32
    %149 = tpu.memref_slice %arg12[%c3_i32_82] : memref<7x!tpu.dma_semaphore, #tpu.memory_space<semaphore_mem>> -> memref<1x!tpu.dma_semaphore, #tpu.memory_space<semaphore_mem>>
    %150 = tpu.memref_squeeze %149 : memref<1x!tpu.dma_semaphore, #tpu.memory_space<semaphore_mem>> -> memref<!tpu.dma_semaphore, #tpu.memory_space<semaphore_mem>>
    tpu.wait_dma2 semaphore(%150 : memref<!tpu.dma_semaphore, #tpu.memory_space<semaphore_mem>>) src(%arg5 : memref<128x512xbf16, #tpu.memory_space<any>>) dst(%arg10 : memref<128x512xbf16, #tpu.memory_space<vmem>>)
    %c0_83 = arith.constant 0 : index
    %c0_84 = arith.constant 0 : index
    %151 = vector.load %arg10[%c0_83, %c0_84] : memref<128x512xbf16, #tpu.memory_space<vmem>>, vector<128x512xbf16>
    %c10 = arith.constant 10 : index
    %c0_85 = arith.constant 0 : index
    %152 = vector.load %arg2[%c10, %c0_85] : memref<20x512xf32, #tpu.memory_space<vmem>>, vector<1x512xf32>
    %153 = arith.truncf %148 : vector<8x128xf32> to vector<8x128xbf16>
    %cst_86 = arith.constant dense<0.000000e+00> : vector<8x512xf32>
    %154 = tpu.matmul %153, %151, %cst_86 {dimension_numbers = #tpu.dot_dimension_numbers<[1], [0], [0], [1], [0, 0, 1, 1], [], []>} : vector<8x128xbf16>, vector<128x512xbf16>, vector<8x512xf32> -> vector<8x512xf32>
    %155 = vector.broadcast %152 : vector<1x512xf32> to vector<8x512xf32>
    %156 = arith.addf %154, %155 : vector<8x512xf32>
    %c11 = arith.constant 11 : index
    %c0_87 = arith.constant 0 : index
    %157 = vector.load %arg2[%c11, %c0_87] : memref<20x512xf32, #tpu.memory_space<vmem>>, vector<1x512xf32>
    %c12 = arith.constant 12 : index
    %c0_88 = arith.constant 0 : index
    %158 = vector.load %arg2[%c12, %c0_88] : memref<20x512xf32, #tpu.memory_space<vmem>>, vector<1x512xf32>
    %cst_89 = arith.constant dense<0.000000e+00> : vector<512xf32>
    %159 = vector.multi_reduction <add>, %156, %cst_89 [0] : vector<8x512xf32> to vector<512xf32>
    %160 = vector.shape_cast %159 : vector<512xf32> to vector<1x512xf32>
    %161 = arith.mulf %156, %156 : vector<8x512xf32>
    %cst_90 = arith.constant dense<0.000000e+00> : vector<512xf32>
    %162 = vector.multi_reduction <add>, %161, %cst_90 [0] : vector<8x512xf32> to vector<512xf32>
    %163 = vector.shape_cast %162 : vector<512xf32> to vector<1x512xf32>
    %cst_91 = arith.constant 1.250000e-01 : f32
    %164 = vector.broadcast %cst_91 : f32 to vector<1x512xf32>
    %165 = arith.mulf %160, %164 : vector<1x512xf32>
    %cst_92 = arith.constant 1.250000e-01 : f32
    %166 = vector.broadcast %cst_92 : f32 to vector<1x512xf32>
    %167 = arith.mulf %163, %166 : vector<1x512xf32>
    %168 = arith.mulf %165, %165 : vector<1x512xf32>
    %169 = arith.subf %167, %168 : vector<1x512xf32>
    %cst_93 = arith.constant 9.99999974E-6 : f32
    %170 = vector.broadcast %cst_93 : f32 to vector<1x512xf32>
    %171 = arith.addf %169, %170 : vector<1x512xf32>
    %172 = math.rsqrt %171 : vector<1x512xf32>
    %173 = arith.mulf %157, %172 : vector<1x512xf32>
    %174 = arith.mulf %165, %173 : vector<1x512xf32>
    %175 = arith.subf %158, %174 : vector<1x512xf32>
    %176 = vector.broadcast %173 : vector<1x512xf32> to vector<8x512xf32>
    %177 = arith.mulf %156, %176 : vector<8x512xf32>
    %178 = vector.broadcast %175 : vector<1x512xf32> to vector<8x512xf32>
    %179 = arith.addf %177, %178 : vector<8x512xf32>
    %cst_94 = arith.constant 0.00999999977 : f32
    %180 = vector.broadcast %cst_94 : f32 to vector<8x512xf32>
    %181 = arith.mulf %180, %179 : vector<8x512xf32>
    %182 = arith.maximumf %179, %181 : vector<8x512xf32>
    %c2_i32_95 = arith.constant 2 : i32
    %c2_i32_96 = arith.constant 2 : i32
    %c4_i32_97 = arith.constant 4 : i32
    %c0_i32_98 = arith.constant 0 : i32
    %c0_i32_99 = arith.constant 0 : i32
    %183 = tpu.memref_slice %arg3[%c2_i32_95, %c0_i32_98, %c0_i32_99] : memref<4x512x512xbf16, #tpu.memory_space<any>> -> memref<1x512x512xbf16, #tpu.memory_space<any>>
    %184 = tpu.memref_squeeze %183 : memref<1x512x512xbf16, #tpu.memory_space<any>> -> memref<512x512xbf16, #tpu.memory_space<any>>
    %c0_i32_100 = arith.constant 0 : i32
    %c0_i32_101 = arith.constant 0 : i32
    %185 = tpu.memref_slice %arg8[%c2_i32_96, %c0_i32_100, %c0_i32_101] : memref<4x512x512xbf16, #tpu.memory_space<vmem>> -> memref<1x512x512xbf16, #tpu.memory_space<vmem>>
    %186 = tpu.memref_squeeze %185 : memref<1x512x512xbf16, #tpu.memory_space<vmem>> -> memref<512x512xbf16, #tpu.memory_space<vmem>>
    %187 = tpu.memref_slice %arg12[%c4_i32_97] : memref<7x!tpu.dma_semaphore, #tpu.memory_space<semaphore_mem>> -> memref<1x!tpu.dma_semaphore, #tpu.memory_space<semaphore_mem>>
    %188 = tpu.memref_squeeze %187 : memref<1x!tpu.dma_semaphore, #tpu.memory_space<semaphore_mem>> -> memref<!tpu.dma_semaphore, #tpu.memory_space<semaphore_mem>>
    tpu.wait_dma2 semaphore(%188 : memref<!tpu.dma_semaphore, #tpu.memory_space<semaphore_mem>>) src(%184 : memref<512x512xbf16, #tpu.memory_space<any>>) dst(%186 : memref<512x512xbf16, #tpu.memory_space<vmem>>)
    %c2_102 = arith.constant 2 : index
    %c0_103 = arith.constant 0 : index
    %c0_104 = arith.constant 0 : index
    %189 = vector.load %arg8[%c2_102, %c0_103, %c0_104] : memref<4x512x512xbf16, #tpu.memory_space<vmem>>, vector<1x512x512xbf16>
    %190 = vector.shape_cast %189 : vector<1x512x512xbf16> to vector<512x512xbf16>
    %c13 = arith.constant 13 : index
    %c0_105 = arith.constant 0 : index
    %191 = vector.load %arg2[%c13, %c0_105] : memref<20x512xf32, #tpu.memory_space<vmem>>, vector<1x512xf32>
    %192 = arith.truncf %182 : vector<8x512xf32> to vector<8x512xbf16>
    %cst_106 = arith.constant dense<0.000000e+00> : vector<8x512xf32>
    %193 = tpu.matmul %192, %190, %cst_106 {dimension_numbers = #tpu.dot_dimension_numbers<[1], [0], [0], [1], [0, 0, 1, 1], [], []>} : vector<8x512xbf16>, vector<512x512xbf16>, vector<8x512xf32> -> vector<8x512xf32>
    %194 = vector.broadcast %191 : vector<1x512xf32> to vector<8x512xf32>
    %195 = arith.addf %193, %194 : vector<8x512xf32>
    %c14 = arith.constant 14 : index
    %c0_107 = arith.constant 0 : index
    %196 = vector.load %arg2[%c14, %c0_107] : memref<20x512xf32, #tpu.memory_space<vmem>>, vector<1x512xf32>
    %c15 = arith.constant 15 : index
    %c0_108 = arith.constant 0 : index
    %197 = vector.load %arg2[%c15, %c0_108] : memref<20x512xf32, #tpu.memory_space<vmem>>, vector<1x512xf32>
    %cst_109 = arith.constant dense<0.000000e+00> : vector<512xf32>
    %198 = vector.multi_reduction <add>, %195, %cst_109 [0] : vector<8x512xf32> to vector<512xf32>
    %199 = vector.shape_cast %198 : vector<512xf32> to vector<1x512xf32>
    %200 = arith.mulf %195, %195 : vector<8x512xf32>
    %cst_110 = arith.constant dense<0.000000e+00> : vector<512xf32>
    %201 = vector.multi_reduction <add>, %200, %cst_110 [0] : vector<8x512xf32> to vector<512xf32>
    %202 = vector.shape_cast %201 : vector<512xf32> to vector<1x512xf32>
    %cst_111 = arith.constant 1.250000e-01 : f32
    %203 = vector.broadcast %cst_111 : f32 to vector<1x512xf32>
    %204 = arith.mulf %199, %203 : vector<1x512xf32>
    %cst_112 = arith.constant 1.250000e-01 : f32
    %205 = vector.broadcast %cst_112 : f32 to vector<1x512xf32>
    %206 = arith.mulf %202, %205 : vector<1x512xf32>
    %207 = arith.mulf %204, %204 : vector<1x512xf32>
    %208 = arith.subf %206, %207 : vector<1x512xf32>
    %cst_113 = arith.constant 9.99999974E-6 : f32
    %209 = vector.broadcast %cst_113 : f32 to vector<1x512xf32>
    %210 = arith.addf %208, %209 : vector<1x512xf32>
    %211 = math.rsqrt %210 : vector<1x512xf32>
    %212 = arith.mulf %196, %211 : vector<1x512xf32>
    %213 = arith.mulf %204, %212 : vector<1x512xf32>
    %214 = arith.subf %197, %213 : vector<1x512xf32>
    %215 = vector.broadcast %212 : vector<1x512xf32> to vector<8x512xf32>
    %216 = arith.mulf %195, %215 : vector<8x512xf32>
    %217 = vector.broadcast %214 : vector<1x512xf32> to vector<8x512xf32>
    %218 = arith.addf %216, %217 : vector<8x512xf32>
    %cst_114 = arith.constant 0.00999999977 : f32
    %219 = vector.broadcast %cst_114 : f32 to vector<8x512xf32>
    %220 = arith.mulf %219, %218 : vector<8x512xf32>
    %221 = arith.maximumf %218, %220 : vector<8x512xf32>
    %c3_i32_115 = arith.constant 3 : i32
    %c3_i32_116 = arith.constant 3 : i32
    %c5_i32_117 = arith.constant 5 : i32
    %c0_i32_118 = arith.constant 0 : i32
    %c0_i32_119 = arith.constant 0 : i32
    %222 = tpu.memref_slice %arg3[%c3_i32_115, %c0_i32_118, %c0_i32_119] : memref<4x512x512xbf16, #tpu.memory_space<any>> -> memref<1x512x512xbf16, #tpu.memory_space<any>>
    %223 = tpu.memref_squeeze %222 : memref<1x512x512xbf16, #tpu.memory_space<any>> -> memref<512x512xbf16, #tpu.memory_space<any>>
    %c0_i32_120 = arith.constant 0 : i32
    %c0_i32_121 = arith.constant 0 : i32
    %224 = tpu.memref_slice %arg8[%c3_i32_116, %c0_i32_120, %c0_i32_121] : memref<4x512x512xbf16, #tpu.memory_space<vmem>> -> memref<1x512x512xbf16, #tpu.memory_space<vmem>>
    %225 = tpu.memref_squeeze %224 : memref<1x512x512xbf16, #tpu.memory_space<vmem>> -> memref<512x512xbf16, #tpu.memory_space<vmem>>
    %226 = tpu.memref_slice %arg12[%c5_i32_117] : memref<7x!tpu.dma_semaphore, #tpu.memory_space<semaphore_mem>> -> memref<1x!tpu.dma_semaphore, #tpu.memory_space<semaphore_mem>>
    %227 = tpu.memref_squeeze %226 : memref<1x!tpu.dma_semaphore, #tpu.memory_space<semaphore_mem>> -> memref<!tpu.dma_semaphore, #tpu.memory_space<semaphore_mem>>
    tpu.wait_dma2 semaphore(%227 : memref<!tpu.dma_semaphore, #tpu.memory_space<semaphore_mem>>) src(%223 : memref<512x512xbf16, #tpu.memory_space<any>>) dst(%225 : memref<512x512xbf16, #tpu.memory_space<vmem>>)
    %c3_122 = arith.constant 3 : index
    %c0_123 = arith.constant 0 : index
    %c0_124 = arith.constant 0 : index
    %228 = vector.load %arg8[%c3_122, %c0_123, %c0_124] : memref<4x512x512xbf16, #tpu.memory_space<vmem>>, vector<1x512x512xbf16>
    %229 = vector.shape_cast %228 : vector<1x512x512xbf16> to vector<512x512xbf16>
    %c16 = arith.constant 16 : index
    %c0_125 = arith.constant 0 : index
    %230 = vector.load %arg2[%c16, %c0_125] : memref<20x512xf32, #tpu.memory_space<vmem>>, vector<1x512xf32>
    %231 = arith.truncf %221 : vector<8x512xf32> to vector<8x512xbf16>
    %cst_126 = arith.constant dense<0.000000e+00> : vector<8x512xf32>
    %232 = tpu.matmul %231, %229, %cst_126 {dimension_numbers = #tpu.dot_dimension_numbers<[1], [0], [0], [1], [0, 0, 1, 1], [], []>} : vector<8x512xbf16>, vector<512x512xbf16>, vector<8x512xf32> -> vector<8x512xf32>
    %233 = vector.broadcast %230 : vector<1x512xf32> to vector<8x512xf32>
    %234 = arith.addf %232, %233 : vector<8x512xf32>
    %c17 = arith.constant 17 : index
    %c0_127 = arith.constant 0 : index
    %235 = vector.load %arg2[%c17, %c0_127] : memref<20x512xf32, #tpu.memory_space<vmem>>, vector<1x512xf32>
    %c18 = arith.constant 18 : index
    %c0_128 = arith.constant 0 : index
    %236 = vector.load %arg2[%c18, %c0_128] : memref<20x512xf32, #tpu.memory_space<vmem>>, vector<1x512xf32>
    %cst_129 = arith.constant dense<0.000000e+00> : vector<512xf32>
    %237 = vector.multi_reduction <add>, %234, %cst_129 [0] : vector<8x512xf32> to vector<512xf32>
    %238 = vector.shape_cast %237 : vector<512xf32> to vector<1x512xf32>
    %239 = arith.mulf %234, %234 : vector<8x512xf32>
    %cst_130 = arith.constant dense<0.000000e+00> : vector<512xf32>
    %240 = vector.multi_reduction <add>, %239, %cst_130 [0] : vector<8x512xf32> to vector<512xf32>
    %241 = vector.shape_cast %240 : vector<512xf32> to vector<1x512xf32>
    %cst_131 = arith.constant 1.250000e-01 : f32
    %242 = vector.broadcast %cst_131 : f32 to vector<1x512xf32>
    %243 = arith.mulf %238, %242 : vector<1x512xf32>
    %cst_132 = arith.constant 1.250000e-01 : f32
    %244 = vector.broadcast %cst_132 : f32 to vector<1x512xf32>
    %245 = arith.mulf %241, %244 : vector<1x512xf32>
    %246 = arith.mulf %243, %243 : vector<1x512xf32>
    %247 = arith.subf %245, %246 : vector<1x512xf32>
    %cst_133 = arith.constant 9.99999974E-6 : f32
    %248 = vector.broadcast %cst_133 : f32 to vector<1x512xf32>
    %249 = arith.addf %247, %248 : vector<1x512xf32>
    %250 = math.rsqrt %249 : vector<1x512xf32>
    %251 = arith.mulf %235, %250 : vector<1x512xf32>
    %252 = arith.mulf %243, %251 : vector<1x512xf32>
    %253 = arith.subf %236, %252 : vector<1x512xf32>
    %254 = vector.broadcast %251 : vector<1x512xf32> to vector<8x512xf32>
    %255 = arith.mulf %234, %254 : vector<8x512xf32>
    %256 = vector.broadcast %253 : vector<1x512xf32> to vector<8x512xf32>
    %257 = arith.addf %255, %256 : vector<8x512xf32>
    %cst_134 = arith.constant 0.00999999977 : f32
    %258 = vector.broadcast %cst_134 : f32 to vector<8x512xf32>
    %259 = arith.mulf %258, %257 : vector<8x512xf32>
    %260 = arith.maximumf %257, %259 : vector<8x512xf32>
    %c6_i32_135 = arith.constant 6 : i32
    %261 = tpu.memref_slice %arg12[%c6_i32_135] : memref<7x!tpu.dma_semaphore, #tpu.memory_space<semaphore_mem>> -> memref<1x!tpu.dma_semaphore, #tpu.memory_space<semaphore_mem>>
    %262 = tpu.memref_squeeze %261 : memref<1x!tpu.dma_semaphore, #tpu.memory_space<semaphore_mem>> -> memref<!tpu.dma_semaphore, #tpu.memory_space<semaphore_mem>>
    tpu.wait_dma2 semaphore(%262 : memref<!tpu.dma_semaphore, #tpu.memory_space<semaphore_mem>>) src(%arg6 : memref<512x256xbf16, #tpu.memory_space<any>>) dst(%arg11 : memref<512x256xbf16, #tpu.memory_space<vmem>>)
    %c0_136 = arith.constant 0 : index
    %c0_137 = arith.constant 0 : index
    %263 = vector.load %arg11[%c0_136, %c0_137] : memref<512x256xbf16, #tpu.memory_space<vmem>>, vector<512x256xbf16>
    %c19 = arith.constant 19 : index
    %c0_138 = arith.constant 0 : index
    %264 = vector.load %arg2[%c19, %c0_138] : memref<20x512xf32, #tpu.memory_space<vmem>>, vector<1x256xf32>
    %265 = arith.truncf %260 : vector<8x512xf32> to vector<8x512xbf16>
    %cst_139 = arith.constant dense<0.000000e+00> : vector<8x256xf32>
    %266 = tpu.matmul %265, %263, %cst_139 {dimension_numbers = #tpu.dot_dimension_numbers<[1], [0], [0], [1], [0, 0, 1, 1], [], []>} : vector<8x512xbf16>, vector<512x256xbf16>, vector<8x256xf32> -> vector<8x256xf32>
    %267 = vector.broadcast %264 : vector<1x256xf32> to vector<8x256xf32>
    %268 = arith.addf %266, %267 : vector<8x256xf32>
    %269 = arith.negf %268 : vector<8x256xf32>
    %270 = math.exp %269 : vector<8x256xf32>
    %cst_140 = arith.constant 1.000000e+00 : f32
    %271 = vector.broadcast %cst_140 : f32 to vector<8x256xf32>
    %272 = arith.addf %271, %270 : vector<8x256xf32>
    %273 = arith.divf %271, %272 : vector<8x256xf32>
    %c0_141 = arith.constant 0 : index
    %c0_142 = arith.constant 0 : index
    %274 = vector.load %arg7[%c0_141, %c0_142] : memref<8x256xf32, #tpu.memory_space<vmem>>, vector<8x256xf32>
    tpu.vector_store %arg7[%c0_141, %c0_142], %273 {strides = array<i32>} : memref<8x256xf32, #tpu.memory_space<vmem>>, vector<8x256xf32>,
    return
  }
}

</mosaic_0001>

<bundles_post_ra>
// kernel: trajectory_ae_forward.1
= control target key start
LH: loop header
LB: loop body
LE: loop exit
PB: predicated region body
PF: predicated region fallthrough
CT: control target
= control target key end

     0   :  { %12 = vsyncpa [#allocation8], 0  ;;  %s4838_s0 = inlined_call_operand.vmem [shape: f32[8,256], index: 0, kind: input, shape index: {}]   ;;  %s4839_s1 = inlined_call_operand.hbm [shape: bf16[256,512], index: 1, kind: input, shape index: {}]   ;;  %s4840_s2 = inlined_call_operand.hbm [shape: f32[20,512], index: 2, kind: input, shape index: {}]   ;;  %s4841_s3 = inlined_call_operand.hbm [shape: bf16[4,512,512], index: 3, kind: input, shape index: {}]   ;;  %s4842_s4 = inlined_call_operand.hbm [shape: bf16[512,128], index: 4, kind: input, shape index: {}]   ;;  %s4843_s5 = inlined_call_operand.hbm [shape: bf16[128,512], index: 5, kind: input, shape index: {}]   ;;  %s4844_s6 = inlined_call_operand.hbm [shape: bf16[512,256], index: 6, kind: input, shape index: {}]   ;;  %s4845_s7 = inlined_call_operand.hbm [shape: f32[8,256], index: 7, kind: output, shape index: {}]  }
   0x1   :  { %13 = vsyncpa [#allocation11], 0 }
   0x2   :  { %14 = vsyncpa [#allocation9], 0  ;;  %s4247_s24 = smov [#allocation7]   ;;  %s4139_s28 = scalar_lea.hbm %s4839_s1, 8192 }
   0x3   :  { %s22_s25 = sshll.u32 %s4247_s24, 4  ;;  %p4140_p0 = scmp.ne.s32.totalorder %s4839_s1, %s4139_s28  ;;  %s23_s25 = int_to_ptr.vmem [resolvable:$true] %s22_s25 }
   0x4   :  { %p4143_p1 = scmp.lt.u32.totalorder %s4139_s28, %s4839_s1 }
   0x6   :  { %p4145_p2 = pnand %p4143_p1, %p4140_p0 }
   0x8   :  { %4148 = shalt.err (!%p4145_p2)
}
   0x9   :  { %s4149_s10 = scalar_lea.vmem %s23_s25, 8192  ;;  %p4154_p4 = scmp.lt.s32.totalorder %s23_s25, %s23_s25 }
   0xa   :  { %p4150_p3 = scmp.ne.s32.totalorder %s23_s25, %s4149_s10  ;;  %p4155_p5 = scmp.lt.s32.totalorder %s4149_s10, %s4149_s10 }
   0xc   :  { %p4156_p6 = por %p4155_p5, %p4154_p4 }
   0xe   :  { %p4157_p7 = pnand %p4156_p6, %p4150_p3 }
  0x10   :  { %4160 = shalt.err (!%p4157_p7)
}
  0x11   :  { %s4248_s11 = smov 256   ;;  %s4249_s12 = smov 16  }
  0x12   :  { %28 = dma.hbm_to_vmem [thread:$0]  %s4839_s1, 8192, %s23_s25, [#allocation8], %s4248_s11, %s4248_s11, %s4249_s12  }
  0x13   :  { %s4250_s15 = smov [#allocation10]   ;;  %s4161_s19 = scalar_lea.hbm %s4840_s2, 1536 }
  0x14   :  { %s34_s16 = sshll.u32 %s4250_s15, 4  ;;  %p4162_p8 = scmp.ne.s32.totalorder %s4840_s2, %s4161_s19  ;;  %s35_s16 = int_to_ptr.vmem [resolvable:$true] %s34_s16 }
  0x15   :  { %p4165_p9 = scmp.lt.u32.totalorder %s4161_s19, %s4840_s2 }
  0x17   :  { %p4167_p10 = pnand %p4165_p9, %p4162_p8 }
  0x19   :  { %4170 = shalt.err (!%p4167_p10)
}
  0x1a   :  { %s4171_s24 = scalar_lea.vmem %s35_s16, 1536  ;;  %p4176_p12 = scmp.lt.s32.totalorder %s35_s16, %s35_s16 }
  0x1b   :  { %p4172_p11 = scmp.ne.s32.totalorder %s35_s16, %s4171_s24  ;;  %p4177_p13 = scmp.lt.s32.totalorder %s4171_s24, %s4171_s24 }
  0x1d   :  { %p4178_p0 = por %p4177_p13, %p4176_p12 }
  0x1f   :  { %p4179_p1 = pnand %p4178_p0, %p4172_p11 }
  0x21   :  { %4182 = shalt.err (!%p4179_p1)
}
  0x22   :  { %s4251_s1 = smov 512   ;;  %s4252_s25 = smov 32  }
  0x23   :  { %40 = dma.hbm_to_vmem [thread:$0]  %s4840_s2, 1536, %s35_s16, [#allocation11], %s4251_s1, %s4251_s1, %s4252_s25  }
  0x24   :  { %4227 = dma.done.wait [#allocation8], 8192  }
  0x25   :  { %4228 = vsyncadd [#allocation8], 4294959104 }
  0x26   :  { %4229 = dma.done.wait [#allocation11], 1536  }
  0x27   :  { %4230 = vsyncadd [#allocation11], 4294965760  ;;  %s52_s28 = sld [smem:[#allocation0]]   ;;  %64 = sst [smem:[#allocation14]] %s4251_s1 }
  0x28   :  { %66 = sst [smem:[#allocation14 + $0x1]] %s4251_s1  ;;  %s4253_s29 = smov 4  }
  0x29   :  { %68 = sst [smem:[#allocation14 + $0x2]] %s4253_s29  ;;  %s4254_s30 = smov 64  }
  0x2a   :  { %70 = sst [smem:[#allocation14 + $0x3]] %s4254_s30  ;;  %s4255_s8 = smov 128  }
  0x2b   :  { %72 = sst [smem:[#allocation14 + $0x4]] %s4255_s8  ;;  %s4256_s9 = smov [#allocation2]  }
  0x2c   :  { %s60_s2 = sshll.u32 %s4256_s9, 4  ;;  %s4257_s10 = smov 2   ;;  %s61_s2 = int_to_ptr.vmem [resolvable:$true] %s60_s2 }
  0x2d   :  { %74 = sst [smem:[#allocation14 + $0x5]] %s4257_s10  ;;  %s3772_s12 = sshll.u32 %s52_s28, 26 }
  0x2e   :  { %76 = sst [smem:[#allocation14 + $0x6]] %s4248_s11  ;;  %s4354_s13 = sadd.s32 134217728, %s3772_s12 }
  0x2f   :  { %78 = sst [smem:[#allocation14 + $0x7]] %s4254_s30  ;;  %s4258_s14 = smov [#allocation6]  }
  0x30   :  { %80 = sst [smem:[#allocation14 + $0x8]] %s4253_s29  ;;  %s4259_s15 = smov [#allocation13]  }
  0x31   :  { %82 = dma.general %s4841_s3, 16384, %s61_s2, %s4258_s14, %s4259_s15, [#allocation14], %s4354_s13, 0  }
  0x32   :  { %101 = sst [smem:[#allocation16]] %s4251_s1  ;;  %s4260_s18 = smov [#allocation2 + $0x400]  }
  0x33   :  { %103 = sst [smem:[#allocation16 + $0x1]] %s4251_s1  ;;  %s97_s19 = sshll.u32 %s4260_s18, 4  ;;  %s98_s19 = int_to_ptr.vmem [resolvable:$true] %s97_s19 }
  0x34   :  { %105 = sst [smem:[#allocation16 + $0x2]] %s4253_s29  ;;  %s83_s22 = scalar_lea.hbm %s4841_s3, 16384 }
  0x35   :  { %107 = sst [smem:[#allocation16 + $0x3]] %s4254_s30  ;;  %s4261_s23 = smov [#allocation6 + $0x1]  }
  0x36   :  { %109 = sst [smem:[#allocation16 + $0x4]] %s4255_s8  ;;  %s4262_s24 = smov [#allocation15]  }
  0x37   :  { %111 = sst [smem:[#allocation16 + $0x5]] %s4257_s10  ;;  %s4263_s25 = smov [#allocation3]  }
  0x38   :  { %113 = sst [smem:[#allocation16 + $0x6]] %s4248_s11  ;;  %s128_s26 = sshll.u32 %s4263_s25, 4  ;;  %s129_s26 = int_to_ptr.vmem [resolvable:$true] %s128_s26 }
  0x39   :  { %115 = sst [smem:[#allocation16 + $0x7]] %s4254_s30  ;;  %s4264_s27 = smov [#allocation4]  }
  0x3a   :  { %117 = sst [smem:[#allocation16 + $0x8]] %s4253_s29  ;;  %s144_s28 = sshll.u32 %s4264_s27, 4  ;;  %s145_s28 = int_to_ptr.vmem [resolvable:$true] %s144_s28 }
  0x3b   :  { %119 = dma.general %s83_s22, 16384, %s98_s19, %s4261_s23, %s4262_s24, [#allocation16], %s4354_s13, 0  }
  0x3c   :  { %148 = sst [smem:[#allocation22]] %s4251_s1  ;;  %s4183_s12 = scalar_lea.hbm %s4842_s4, 4096 }
  0x3d   :  { %150 = sst [smem:[#allocation22 + $0x1]] %s4251_s1  ;;  %p4184_p2 = scmp.ne.s32.totalorder %s4842_s4, %s4183_s12 }
  0x3e   :  { %152 = sst [smem:[#allocation22 + $0x2]] %s4253_s29  ;;  %p4187_p3 = scmp.lt.u32.totalorder %s4183_s12, %s4842_s4 }
  0x3f   :  { %154 = sst [smem:[#allocation22 + $0x3]] %s4254_s30 }
  0x40   :  { %156 = sst [smem:[#allocation22 + $0x4]] %s4255_s8  ;;  %p4189_p4 = pnand %p4187_p3, %p4184_p2 }
  0x41   :  { %158 = sst [smem:[#allocation22 + $0x5]] %s4257_s10 }
  0x42   :  { %160 = sst [smem:[#allocation22 + $0x6]] %s4248_s11 }
  0x43   :  { %162 = sst [smem:[#allocation22 + $0x7]] %s4254_s30 }
  0x44   :  { %164 = sst [smem:[#allocation22 + $0x8]] %s4253_s29 }
  0x45   :  { %4192 = shalt.err (!%p4189_p4)  }
  0x46   :  { %s4193_s18 = scalar_lea.vmem %s129_s26, 4096  ;;  %p4198_p6 = scmp.lt.s32.totalorder %s129_s26, %s129_s26 }
  0x47   :  { %p4194_p5 = scmp.ne.s32.totalorder %s129_s26, %s4193_s18  ;;  %p4199_p7 = scmp.lt.s32.totalorder %s4193_s18, %s4193_s18 }
  0x49   :  { %p4200_p8 = por %p4199_p7, %p4198_p6 }
  0x4b   :  { %p4201_p9 = pnand %p4200_p8, %p4194_p5 }
  0x4d   :  { %4204 = shalt.err (!%p4201_p9)  }
  0x4e   :  { %131 = dma.hbm_to_vmem [thread:$0]  %s4842_s4, 4096, %s129_s26, [#allocation6 + $0x2] }
  0x4f   :  { %s4265_s21 = smov [#allocation6 + $0x3]   ;;  %s4266_s22 = smov [#allocation21]  }
  0x50   :  { %166 = dma.general %s4843_s5, 4096, %s145_s28, %s4265_s21, %s4266_s22, [#allocation22], %s4354_s13, 0  }
  0x51   :  { %185 = sst [smem:[#allocation24]] %s4251_s1  ;;  %s4267_s25 = smov [#allocation2 + $0x800]  }
  0x52   :  { %187 = sst [smem:[#allocation24 + $0x1]] %s4251_s1  ;;  %s181_s27 = sshll.u32 %s4267_s25, 4  ;;  %s182_s27 = int_to_ptr.vmem [resolvable:$true] %s181_s27 }
  0x53   :  { %189 = sst [smem:[#allocation24 + $0x2]] %s4253_s29  ;;  %s167_s4 = scalar_lea.hbm %s4841_s3, 32768 }
  0x54   :  { %191 = sst [smem:[#allocation24 + $0x3]] %s4254_s30  ;;  %s4268_s5 = smov [#allocation6 + $0x4]  }
  0x55   :  { %193 = sst [smem:[#allocation24 + $0x4]] %s4255_s8  ;;  %s4269_s26 = smov [#allocation23]  }
  0x56   :  { %195 = sst [smem:[#allocation24 + $0x5]] %s4257_s10  ;;  %s4270_s28 = smov [#allocation2 + $0xc00]  }
  0x57   :  { %197 = sst [smem:[#allocation24 + $0x6]] %s4248_s11  ;;  %s218_s12 = sshll.u32 %s4270_s28, 4  ;;  %s219_s12 = int_to_ptr.vmem [resolvable:$true] %s218_s12 }
  0x58   :  { %199 = sst [smem:[#allocation24 + $0x7]] %s4254_s30  ;;  %s204_s16 = scalar_lea.hbm %s4841_s3, 49152 }
  0x59   :  { %201 = sst [smem:[#allocation24 + $0x8]] %s4253_s29  ;;  %s4272_s17 = smov [#allocation25]  }
  0x5a   :  { %203 = dma.general %s167_s4, 16384, %s182_s27, %s4268_s5, %s4269_s26, [#allocation24], %s4354_s13, 0  }
  0x5b   :  { %222 = sst [smem:[#allocation26]] %s4251_s1  ;;  %s4273_s3 = smov [#allocation5]  }
  0x5c   :  { %224 = sst [smem:[#allocation26 + $0x1]] %s4251_s1  ;;  %s4271_s1 = smov [#allocation6 + $0x5]  }
  0x5d   :  { %226 = sst [smem:[#allocation26 + $0x2]] %s4253_s29  ;;  %s253_s18 = sshll.u32 %s4273_s3, 4  ;;  %s254_s18 = int_to_ptr.vmem [resolvable:$true] %s253_s18 }
  0x5e   :  { %228 = sst [smem:[#allocation26 + $0x3]] %s4254_s30  ;;  %s4274_s19 = smov [#allocation6 + $0x6]  }
  0x5f   :  { %230 = sst [smem:[#allocation26 + $0x4]] %s4255_s8  ;;  %s4275_s20 = smov [#allocation27]  }
  0x60   :  { %232 = sst [smem:[#allocation26 + $0x5]] %s4257_s10 }
  0x61   :  { %234 = sst [smem:[#allocation26 + $0x6]] %s4248_s11 }
  0x62   :  { %236 = sst [smem:[#allocation26 + $0x7]] %s4254_s30 }
  0x63   :  { %238 = sst [smem:[#allocation26 + $0x8]] %s4253_s29 }
  0x64   :  { %240 = dma.general %s204_s16, 16384, %s219_s12, %s4271_s1, %s4272_s17, [#allocation26], %s4354_s13, 0  }
  0x65   :  { %257 = sst [smem:[#allocation28]] %s4248_s11 }
  0x66   :  { %259 = sst [smem:[#allocation28 + $0x1]] %s4248_s11 }
  0x67   :  { %261 = sst [smem:[#allocation28 + $0x2]] %s4257_s10 }
  0x68   :  { %263 = sst [smem:[#allocation28 + $0x3]] %s4254_s30 }
  0x69   :  { %265 = sst [smem:[#allocation28 + $0x4]] %s4255_s8 }
  0x6a   :  { %267 = sst [smem:[#allocation28 + $0x5]] %s4257_s10 }
  0x6b   :  { %269 = sst [smem:[#allocation28 + $0x6]] %s4255_s8 }
  0x6c   :  { %271 = sst [smem:[#allocation28 + $0x7]] %s4254_s30 }
  0x6d   :  { %273 = sst [smem:[#allocation28 + $0x8]] %s4253_s29 }
  0x6e   :  { %275 = dma.general %s4844_s6, 8192, %s254_s18, %s4274_s19, %s4275_s20, [#allocation28], %s4354_s13, 0  }
  0x6f   :  { %v3987_v0 = vld [vmem:[#allocation7 + $0x4] ss:$16 sps:$4 sm:$0xff]   ;;  %v3989_v1 = vld [vmem:[#allocation7] ss:$16 sps:$4 sm:$0xff]   ;;  %v277_v13 = vld [vmem:[%s4838_s0 + $0x8] sm:$0xff] }
  0x70   :  { %686 = vmatprep.subr.bf16.mxu1 %v3987_v0  ;;  %v3990_v2 = vld [vmem:[#allocation7 + $0x24] ss:$16 sps:$4 sm:$0xff]   ;;  %v3992_v3 = vld [vmem:[#allocation7 + $0x20] ss:$16 sps:$4 sm:$0xff]   ;;  %v344_v14 = vpack.c.bf16 %v277_v13, %v277_v13  ;;  %v4037_v35 = vld [vmem:[#allocation7 + $0xc] ss:$16 sps:$4 sm:$0xff]  }
  0x71   :  { %687 = vmatpush1.bf16.msra.mxu1 %v3989_v1  ;;  %v3993_v4 = vld [vmem:[#allocation7 + $0x44] ss:$16 sps:$4 sm:$0xff]   ;;  %v3995_v5 = vld [vmem:[#allocation7 + $0x40] ss:$16 sps:$4 sm:$0xff]   ;;  %v4035_v37 = vld [vmem:[#allocation7 + $0x8] ss:$16 sps:$4 sm:$0xff]  }
  0x72   :  { %688 = vmatprep.subr.bf16.mxu1 %v3990_v2  ;;  %v3996_v6 = vld [vmem:[#allocation7 + $0x64] ss:$16 sps:$4 sm:$0xff]   ;;  %v3998_v7 = vld [vmem:[#allocation7 + $0x60] ss:$16 sps:$4 sm:$0xff]   ;;  %718 = vmatprep.mubr.bf16.mxu1 %v344_v14  ;;  %v4040_v38 = vld [vmem:[#allocation7 + $0x2c] ss:$16 sps:$4 sm:$0xff]  }
  0x73   :  { %v3999_v8 = vld [vmem:[#allocation7 + $0x84] ss:$16 sps:$4 sm:$0xff]   ;;  %v4001_v9 = vld [vmem:[#allocation7 + $0x80] ss:$16 sps:$4 sm:$0xff]   ;;  %v4038_v39 = vld [vmem:[#allocation7 + $0x28] ss:$16 sps:$4 sm:$0xff]  }
  0x74   :  { %v4002_v10 = vld [vmem:[#allocation7 + $0xa4] ss:$16 sps:$4 sm:$0xff]   ;;  %v4004_v11 = vld [vmem:[#allocation7 + $0xa0] ss:$16 sps:$4 sm:$0xff]   ;;  %v4043_v40 = vld [vmem:[#allocation7 + $0x4c] ss:$16 sps:$4 sm:$0xff]  }
  0x75   :  { %689 = vmatpush1.bf16.msra.mxu1 %v3992_v3  ;;  %v4005_v12 = vld [vmem:[#allocation7 + $0xc4] ss:$16 sps:$4 sm:$0xff]   ;;  %v4007_v15 = vld [vmem:[#allocation7 + $0xc0] ss:$16 sps:$4 sm:$0xff]   ;;  %v4041_v41 = vld [vmem:[#allocation7 + $0x48] ss:$16 sps:$4 sm:$0xff]  }
  0x76   :  { %690 = vmatprep.subr.bf16.mxu1 %v3993_v4  ;;  %v4008_v16 = vld [vmem:[#allocation7 + $0xe4] ss:$16 sps:$4 sm:$0xff]   ;;  %v4010_v17 = vld [vmem:[#allocation7 + $0xe0] ss:$16 sps:$4 sm:$0xff]   ;;  %v4046_v42 = vld [vmem:[#allocation7 + $0x6c] ss:$16 sps:$4 sm:$0xff]   ;;  %v346_v4 = vlaneseq }
  0x77   :  { %v4011_v18 = vld [vmem:[#allocation7 + $0x104] ss:$16 sps:$4 sm:$0xff]   ;;  %v4013_v19 = vld [vmem:[#allocation7 + $0x100] ss:$16 sps:$4 sm:$0xff]   ;;  %v4044_v43 = vld [vmem:[#allocation7 + $0x68] ss:$16 sps:$4 sm:$0xff]  }
  0x78   :  { %v4014_v20 = vld [vmem:[#allocation7 + $0x124] ss:$16 sps:$4 sm:$0xff]   ;;  %v4016_v21 = vld [vmem:[#allocation7 + $0x120] ss:$16 sps:$4 sm:$0xff]   ;;  %v4049_v44 = vld [vmem:[#allocation7 + $0x8c] ss:$16 sps:$4 sm:$0xff]  }
  0x79   :  { %691 = vmatpush1.bf16.msra.mxu1 %v3995_v5  ;;  %v4017_v22 = vld [vmem:[#allocation7 + $0x144] ss:$16 sps:$4 sm:$0xff]   ;;  %v4019_v23 = vld [vmem:[#allocation7 + $0x140] ss:$16 sps:$4 sm:$0xff]   ;;  %v4047_v45 = vld [vmem:[#allocation7 + $0x88] ss:$16 sps:$4 sm:$0xff]  }
  0x7a   :  { %692 = vmatprep.subr.bf16.mxu1 %v3996_v6  ;;  %v4020_v24 = vld [vmem:[#allocation7 + $0x164] ss:$16 sps:$4 sm:$0xff]   ;;  %v4022_v25 = vld [vmem:[#allocation7 + $0x160] ss:$16 sps:$4 sm:$0xff]   ;;  %v4052_v46 = vld [vmem:[#allocation7 + $0xac] ss:$16 sps:$4 sm:$0xff]  }
  0x7b   :  { %v4023_v26 = vld [vmem:[#allocation7 + $0x184] ss:$16 sps:$4 sm:$0xff]   ;;  %v4025_v27 = vld [vmem:[#allocation7 + $0x180] ss:$16 sps:$4 sm:$0xff]   ;;  %v4050_v47 = vld [vmem:[#allocation7 + $0xa8] ss:$16 sps:$4 sm:$0xff]  }
  0x7c   :  { %v4026_v28 = vld [vmem:[#allocation7 + $0x1a4] ss:$16 sps:$4 sm:$0xff]   ;;  %v4028_v29 = vld [vmem:[#allocation7 + $0x1a0] ss:$16 sps:$4 sm:$0xff]   ;;  %v4055_v48 = vld [vmem:[#allocation7 + $0xcc] ss:$16 sps:$4 sm:$0xff]  }
  0x7d   :  { %693 = vmatpush1.bf16.msra.mxu1 %v3998_v7  ;;  %v4029_v30 = vld [vmem:[#allocation7 + $0x1c4] ss:$16 sps:$4 sm:$0xff]   ;;  %v4031_v31 = vld [vmem:[#allocation7 + $0x1c0] ss:$16 sps:$4 sm:$0xff]   ;;  %v4053_v49 = vld [vmem:[#allocation7 + $0xc8] ss:$16 sps:$4 sm:$0xff]  }
  0x7e   :  { %694 = vmatprep.subr.bf16.mxu1 %v3999_v8  ;;  %v4032_v32 = vld [vmem:[#allocation7 + $0x1e4] ss:$16 sps:$4 sm:$0xff]   ;;  %v4034_v33 = vld [vmem:[#allocation7 + $0x1e0] ss:$16 sps:$4 sm:$0xff]   ;;  %v4058_v50 = vld [vmem:[#allocation7 + $0xec] ss:$16 sps:$4 sm:$0xff]  }
  0x7f   :  { %v276_v34 = vld [vmem:[%s4838_s0] sm:$0xff]  ;;  %v4056_v51 = vld [vmem:[#allocation7 + $0xe8] ss:$16 sps:$4 sm:$0xff]   ;;  %v4061_v52 = vld [vmem:[#allocation7 + $0x10c] ss:$16 sps:$4 sm:$0xff]   ;;  %v4449_v5 = vshrl.u32 %v346_v4, 7 }
  0x80   :  { %v4445_v36 = vpack.c.bf16 %v276_v34, %v276_v34  ;;  %v4059_v53 = vld [vmem:[#allocation7 + $0x108] ss:$16 sps:$4 sm:$0xff]   ;;  %v4064_v54 = vld [vmem:[#allocation7 + $0x12c] ss:$16 sps:$4 sm:$0xff]  }
  0x81   :  { %695 = vmatpush1.bf16.msra.mxu1 %v4001_v9  ;;  %v4062_v55 = vld [vmem:[#allocation7 + $0x128] ss:$16 sps:$4 sm:$0xff]   ;;  %v4067_v56 = vld [vmem:[#allocation7 + $0x14c] ss:$16 sps:$4 sm:$0xff]   ;;  %v4452_v6 = vsub.s32 0, %v4449_v5  ;;  %v4455_v8 = vsub.s32 1, %v4449_v5 }
  0x82   :  { %696 = vmatprep.subr.bf16.mxu1 %v4002_v10  ;;  %v4065_v57 = vld [vmem:[#allocation7 + $0x148] ss:$16 sps:$4 sm:$0xff]   ;;  %v4070_v58 = vld [vmem:[#allocation7 + $0x16c] ss:$16 sps:$4 sm:$0xff]  }
  0x83   :  { %v4068_v59 = vld [vmem:[#allocation7 + $0x168] ss:$16 sps:$4 sm:$0xff]   ;;  %v4073_v60 = vld [vmem:[#allocation7 + $0x18c] ss:$16 sps:$4 sm:$0xff]  }
  0x84   :  { %v4071_v61 = vld [vmem:[#allocation7 + $0x188] ss:$16 sps:$4 sm:$0xff]   ;;  %v4076_v62 = vld [vmem:[#allocation7 + $0x1ac] ss:$16 sps:$4 sm:$0xff]  }
  0x85   :  { %697 = vmatpush1.bf16.msra.mxu1 %v4004_v11  ;;  %v4074_v63 = vld [vmem:[#allocation7 + $0x1a8] ss:$16 sps:$4 sm:$0xff]   ;;  %v4079_v0 = vld [vmem:[#allocation7 + $0x1cc] ss:$16 sps:$4 sm:$0xff]  }
  0x86   :  { %698 = vmatprep.subr.bf16.mxu1 %v4005_v12  ;;  %v4077_v1 = vld [vmem:[#allocation7 + $0x1c8] ss:$16 sps:$4 sm:$0xff]   ;;  %v4082_v2 = vld [vmem:[#allocation7 + $0x1ec] ss:$16 sps:$4 sm:$0xff]  }
  0x87   :  { %v4080_v3 = vld [vmem:[#allocation7 + $0x1e8] ss:$16 sps:$4 sm:$0xff]  }
  0x88   :  { %v342_v7 = vld [vmem:[#allocation10] ss:$8 sm:$0xf] }
  0x89   :  { %699 = vmatpush1.bf16.msra.mxu1 %v4007_v15  ;;  %v349_v9 = vrot.slane %v342_v7, %v4452_v6  ;;  %v353_v10 = vrot.slane %v342_v7, %v4455_v8 }
  0x8a   :  { %700 = vmatprep.subr.bf16.mxu1 %v4008_v16 }
  0x8d   :  { %701 = vmatpush1.bf16.msra.mxu1 %v4010_v17 }
  0x8e   :  { %702 = vmatprep.subr.bf16.mxu1 %v4011_v18 }
  0x91   :  { %703 = vmatpush1.bf16.msra.mxu1 %v4013_v19 }
  0x92   :  { %704 = vmatprep.subr.bf16.mxu1 %v4014_v20 }
  0x95   :  { %705 = vmatpush1.bf16.msra.mxu1 %v4016_v21 }
  0x96   :  { %706 = vmatprep.subr.bf16.mxu1 %v4017_v22 }
  0x99   :  { %707 = vmatpush1.bf16.msra.mxu1 %v4019_v23 }
  0x9a   :  { %708 = vmatprep.subr.bf16.mxu1 %v4020_v24 }
  0x9d   :  { %709 = vmatpush1.bf16.msra.mxu1 %v4022_v25 }
  0x9e   :  { %710 = vmatprep.subr.bf16.mxu1 %v4023_v26 }
  0xa1   :  { %711 = vmatpush1.bf16.msra.mxu1 %v4025_v27 }
  0xa2   :  { %712 = vmatprep.subr.bf16.mxu1 %v4026_v28 }
  0xa5   :  { %713 = vmatpush1.bf16.msra.mxu1 %v4028_v29 }
  0xa6   :  { %714 = vmatprep.subr.bf16.mxu1 %v4029_v30 }
  0xa9   :  { %715 = vmatpush1.bf16.msra.mxu1 %v4031_v31 }
  0xaa   :  { %716 = vmatprep.subr.bf16.mxu1 %v4032_v32 }
  0xad   :  { %717 = vmatpush1.bf16.msra.mxu1 %v4034_v33 }
  0xae   :  { %727 = vmatprep.subr.bf16.mxu1 %v4037_v35 }
  0xb0   :  { %719 = vmatmul.mubr.bf16.vlgmr.msra.gmra.mrb[0].mxu1 %v4445_v36 }
  0xb1   :  { %728 = vmatpush1.bf16.msra.mxu1 %v4035_v37  ;;  %759 = vmatprep.mubr.bf16.mxu1 %v344_v14 }
  0xb2   :  { %729 = vmatprep.subr.bf16.mxu1 %v4040_v38 }
  0xb5   :  { %730 = vmatpush1.bf16.msra.mxu1 %v4038_v39 }
  0xb6   :  { %731 = vmatprep.subr.bf16.mxu1 %v4043_v40 }
  0xb9   :  { %732 = vmatpush1.bf16.msra.mxu1 %v4041_v41 }
  0xba   :  { %733 = vmatprep.subr.bf16.mxu1 %v4046_v42 }
  0xbd   :  { %734 = vmatpush1.bf16.msra.mxu1 %v4044_v43 }
  0xbe   :  { %735 = vmatprep.subr.bf16.mxu1 %v4049_v44 }
  0xc1   :  { %736 = vmatpush1.bf16.msra.mxu1 %v4047_v45 }
  0xc2   :  { %737 = vmatprep.subr.bf16.mxu1 %v4052_v46 }
  0xc5   :  { %738 = vmatpush1.bf16.msra.mxu1 %v4050_v47 }
  0xc6   :  { %739 = vmatprep.subr.bf16.mxu1 %v4055_v48 }
  0xc9   :  { %740 = vmatpush1.bf16.msra.mxu1 %v4053_v49 }
  0xca   :  { %741 = vmatprep.subr.bf16.mxu1 %v4058_v50 }
  0xcd   :  { %742 = vmatpush1.bf16.msra.mxu1 %v4056_v51 }
  0xce   :  { %743 = vmatprep.subr.bf16.mxu1 %v4061_v52 }
  0xd1   :  { %744 = vmatpush1.bf16.msra.mxu1 %v4059_v53 }
  0xd2   :  { %745 = vmatprep.subr.bf16.mxu1 %v4064_v54 }
  0xd5   :  { %746 = vmatpush1.bf16.msra.mxu1 %v4062_v55 }
  0xd6   :  { %747 = vmatprep.subr.bf16.mxu1 %v4067_v56  ;;  %v4480_v56 = vsub.s32 2, %v4449_v5 }
  0xd9   :  { %748 = vmatpush1.bf16.msra.mxu1 %v4065_v57  ;;  %v4483_v57 = vsub.s32 3, %v4449_v5 }
  0xda   :  { %749 = vmatprep.subr.bf16.mxu1 %v4070_v58  ;;  %v357_v58 = vrot.slane %v342_v7, %v4480_v56 }
  0xdd   :  { %750 = vmatpush1.bf16.msra.mxu1 %v4068_v59  ;;  %v361_v59 = vrot.slane %v342_v7, %v4483_v57 }
  0xde   :  { %751 = vmatprep.subr.bf16.mxu1 %v4073_v60 }
  0xe1   :  { %752 = vmatpush1.bf16.msra.mxu1 %v4071_v61 }
  0xe2   :  { %753 = vmatprep.subr.bf16.mxu1 %v4076_v62 }
  0xe5   :  { %754 = vmatpush1.bf16.msra.mxu1 %v4074_v63 }
  0xe6   :  { %755 = vmatprep.subr.bf16.mxu1 %v4079_v0 }
  0xe9   :  { %756 = vmatpush1.bf16.msra.mxu1 %v4077_v1 }
  0xea   :  { %757 = vmatprep.subr.bf16.mxu1 %v4082_v2 }
  0xed   :  { %758 = vmatpush1.bf16.msra.mxu1 %v4080_v3 }
  0xf0   :  { %760 = vmatmul.mubr.bf16.vlgmr.msra.gmra.mrb[4].mxu1 %v4445_v36 }
 0x183   :  { %v720_v11 = vpop.f32.mrb[0].mxu1 }
 0x184   :  { %v4459_v12 = vadd.f32 %v720_v11, %v349_v9  ;;  %v722_v13 = vpop.f32.mrb[1].mxu1 }
 0x185   :  { %v4461_v14 = vadd.f32 %v722_v13, %v353_v10  ;;  %v724_v15 = vpop.f32.mrb[2].mxu1 }
 0x186   :  { %v772_v16 = vrot.slane %v4459_v12, 4  ;;  %v796_v17 = vmul.f32 %v4459_v12, %v4459_v12  ;;  %v725_v18 = vpop.f32.mrb[3].mxu1 }
 0x187   :  { %v778_v19 = vrot.slane %v4461_v14, 4  ;;  %v797_v20 = vmul.f32 %v4461_v14, %v4461_v14 }
 0x188   :  { %v773_v21 = vadd.f32 %v772_v16, %v4459_v12  ;;  %v800_v22 = vrot.slane %v796_v17, 4 }
 0x189   :  { %v779_v23 = vadd.f32 %v778_v19, %v4461_v14  ;;  %v806_v24 = vrot.slane %v797_v20, 4 }
 0x18a   :  { %v774_v25 = vrot.slane %v773_v21, 2  ;;  %v801_v26 = vadd.f32 %v800_v22, %v796_v17 }
 0x18b   :  { %v780_v27 = vrot.slane %v779_v23, 2  ;;  %v807_v28 = vadd.f32 %v806_v24, %v797_v20 }
 0x18c   :  { %v775_v29 = vadd.f32 %v774_v25, %v773_v21  ;;  %v802_v30 = vrot.slane %v801_v26, 2 }
 0x18d   :  { %v781_v31 = vadd.f32 %v780_v27, %v779_v23  ;;  %v808_v32 = vrot.slane %v807_v28, 2 }
 0x18e   :  { %v776_v33 = vrot.slane %v775_v29, 1  ;;  %v803_v34 = vadd.f32 %v802_v30, %v801_v26 }
 0x18f   :  { %v782_v35 = vrot.slane %v781_v31, 1  ;;  %v809_v36 = vadd.f32 %v808_v32, %v807_v28 }
 0x190   :  { %v777_v37 = vadd.f32 %v776_v33, %v775_v29  ;;  %v804_v38 = vrot.slane %v803_v34, 1 }
 0x191   :  { %v783_v39 = vadd.f32 %v782_v35, %v781_v31  ;;  %v810_v40 = vrot.slane %v809_v36, 1 }
 0x192   :  { %v805_v41 = vadd.f32 %v804_v38, %v803_v34  ;;  %v4471_v42 = vmul.f32 0.125, %v777_v37 }
 0x193   :  { %v811_v43 = vadd.f32 %v810_v40, %v809_v36  ;;  %v4473_v44 = vmul.f32 0.125, %v783_v39 }
 0x194   :  { %v828_v45 = vmul.f32 0.125, %v805_v41  ;;  %v832_v46 = vmul.f32 %v4471_v42, %v4471_v42 }
 0x195   :  { %v829_v47 = vmul.f32 0.125, %v811_v43  ;;  %v833_v48 = vmul.f32 %v4473_v44, %v4473_v44 }
 0x196   :  { %v836_v49 = vsub.f32 %v828_v45, %v832_v46  ;;  %v4276_v45 = vmov 1966171168  }
 0x197   :  { %v837_v50 = vsub.f32 %v829_v47, %v833_v48  ;;  %v855_v46 = vunpack.c.l.s4 %v4276_v45 }
 0x198   :  { %v840_v51 = vadd.f32 1e-05, %v836_v49 }
 0x199   :  { %v841_v52 = vadd.f32 1e-05, %v837_v50  ;;  %v856_v47 = vunpack.c.0.s8 %v855_v46 }
 0x19a   :  { %4083 = vrsqrt.f32 %v840_v51 }
 0x19b   :  { %4085 = vrsqrt.f32 %v841_v52  ;;  %v4500_v49 = vsub.s32 %v856_v47, %v4449_v5 }
 0x1a4   :  { %v4084_v53 = vpop.eup %4083 }
 0x1a5   :  { %v4086_v54 = vpop.eup %4085 }
 0x1a6   :  { %v852_v55 = vcombine.low %v4084_v53, %v4086_v54 }
 0x1a8   :  { %v860_v52 = vrot.slane %v852_v55, %v4500_v49 }
 0x1c3   :  { %v761_v60 = vpop.f32.mrb[4].mxu1 }
 0x1c4   :  { %v4487_v61 = vadd.f32 %v761_v60, %v357_v58  ;;  %v763_v62 = vpop.f32.mrb[5].mxu1  ;;  %v769_v58 = vld [vmem:[#allocation10 + $0x1] ss:$8 sm:$0xf] }
 0x1c5   :  { %v4489_v63 = vadd.f32 %v763_v62, %v361_v59  ;;  %v765_v0 = vpop.f32.mrb[6].mxu1 }
 0x1c6   :  { %v784_v1 = vrot.slane %v4487_v61, 4  ;;  %v798_v2 = vmul.f32 %v4487_v61, %v4487_v61  ;;  %v766_v3 = vpop.f32.mrb[7].mxu1 }
 0x1c7   :  { %v790_v4 = vrot.slane %v4489_v63, 4  ;;  %v799_v9 = vmul.f32 %v4489_v63, %v4489_v63 }
 0x1c8   :  { %v785_v7 = vadd.f32 %v784_v1, %v4487_v61  ;;  %v812_v10 = vrot.slane %v798_v2, 4 }
 0x1c9   :  { %v791_v11 = vadd.f32 %v790_v4, %v4489_v63  ;;  %v818_v13 = vrot.slane %v799_v9, 4 }
 0x1ca   :  { %v786_v15 = vrot.slane %v785_v7, 2  ;;  %v813_v16 = vadd.f32 %v812_v10, %v798_v2 }
 0x1cb   :  { %v792_v17 = vrot.slane %v791_v11, 2  ;;  %v819_v18 = vadd.f32 %v818_v13, %v799_v9 }
 0x1cc   :  { %v787_v19 = vadd.f32 %v786_v15, %v785_v7  ;;  %v814_v20 = vrot.slane %v813_v16, 2 }
 0x1cd   :  { %v793_v21 = vadd.f32 %v792_v17, %v791_v11  ;;  %v820_v22 = vrot.slane %v819_v18, 2 }
 0x1ce   :  { %v788_v23 = vrot.slane %v787_v19, 1  ;;  %v815_v24 = vadd.f32 %v814_v20, %v813_v16 }
 0x1cf   :  { %v794_v25 = vrot.slane %v793_v21, 1  ;;  %v821_v26 = vadd.f32 %v820_v22, %v819_v18 }
 0x1d0   :  { %v789_v27 = vadd.f32 %v788_v23, %v787_v19  ;;  %v816_v28 = vrot.slane %v815_v24, 1 }
 0x1d1   :  { %v795_v29 = vadd.f32 %v794_v25, %v793_v21  ;;  %v822_v30 = vrot.slane %v821_v26, 1 }
 0x1d2   :  { %v817_v31 = vadd.f32 %v816_v28, %v815_v24  ;;  %v826_v32 = vmul.f32 0.125, %v789_v27 }
 0x1d3   :  { %v823_v33 = vadd.f32 %v822_v30, %v821_v26  ;;  %v827_v34 = vmul.f32 0.125, %v795_v29 }
 0x1d4   :  { %v830_v35 = vmul.f32 0.125, %v817_v31  ;;  %v834_v36 = vmul.f32 %v826_v32, %v826_v32 }
 0x1d5   :  { %v831_v37 = vmul.f32 0.125, %v823_v33  ;;  %v835_v38 = vmul.f32 %v827_v34, %v827_v34 }
 0x1d6   :  { %v838_v39 = vsub.f32 %v830_v35, %v834_v36 }
 0x1d7   :  { %v839_v40 = vsub.f32 %v831_v37, %v835_v38 }
 0x1d8   :  { %v842_v41 = vadd.f32 1e-05, %v838_v39 }
 0x1d9   :  { %v843_v43 = vadd.f32 1e-05, %v839_v40 }
 0x1da   :  { %4087 = vrsqrt.f32 %v842_v41 }
 0x1db   :  { %4089 = vrsqrt.f32 %v843_v43 }
 0x1e4   :  { %v4088_v48 = vpop.eup %4087 }
 0x1e5   :  { %v4090_v50 = vpop.eup %4089 }
 0x1e6   :  { %v853_v51 = vcombine.low %v4088_v48, %v4090_v50 }
 0x1e8   :  { %v867_v53 = vrot.slane %v853_v51, %v4500_v49 }
 0x1ea   :  { %v868_v54 = vcombine.low %v860_v52, %v867_v53 }
 0x1ec   :  { %v875_v59 = vrot.slane %v868_v54, %v4500_v49 }
 0x1ee   :  { %v877_v60 = vmul.f32 %v875_v59, %v769_v58 }
 0x1f0   :  { %v882_v62 = vrot.slane %v877_v60, %v4452_v6  ;;  %v886_v0 = vrot.slane %v877_v60, %v4455_v8  ;;  %v890_v1 = vrot.slane %v877_v60, %v4480_v56  ;;  %v894_v5 = vrot.slane %v877_v60, %v4483_v57 }
 0x1f2   :  { %v899_v2 = vmul.f32 %v882_v62, %v4471_v42  ;;  %v900_v3 = vmul.f32 %v886_v0, %v4473_v44  ;;  %v901_v55 = vmul.f32 %v890_v1, %v826_v32  ;;  %v902_v4 = vmul.f32 %v894_v5, %v827_v34  ;;  %v771_v42 = vld [vmem:[#allocation10 + $0x2] ss:$8 sm:$0xf] }
 0x1f3   :  { %v933_v9 = vmul.f32 %v882_v62, %v4459_v12  ;;  %v934_v7 = vmul.f32 %v886_v0, %v4461_v14  ;;  %v935_v10 = vmul.f32 %v890_v1, %v4487_v61  ;;  %v936_v11 = vmul.f32 %v894_v5, %v4489_v63 }
 0x1f4   :  { %v907_v13 = vcombine.low %v899_v2, %v900_v3  ;;  %v908_v15 = vcombine.low %v901_v55, %v902_v4 }
 0x1f6   :  { %v915_v16 = vrot.slane %v907_v13, %v4500_v49  ;;  %v922_v17 = vrot.slane %v908_v15, %v4500_v49 }
 0x1f8   :  { %v923_v18 = vcombine.low %v915_v16, %v922_v17 }
 0x1fa   :  { %v930_v44 = vrot.slane %v923_v18, %v4500_v49 }
 0x1fc   :  { %v932_v19 = vsub.f32 %v771_v42, %v930_v44 }
 0x1fe   :  { %v941_v20 = vrot.slane %v932_v19, %v4452_v6  ;;  %v945_v12 = vrot.slane %v932_v19, %v4455_v8  ;;  %v949_v14 = vrot.slane %v932_v19, %v4480_v56  ;;  %v953_v61 = vrot.slane %v932_v19, %v4483_v57 }
 0x200   :  { %v958_v63 = vadd.f32 %v941_v20, %v933_v9  ;;  %v959_v21 = vadd.f32 %v945_v12, %v934_v7  ;;  %v960_v22 = vadd.f32 %v949_v14, %v935_v10  ;;  %v961_v23 = vadd.f32 %v953_v61, %v936_v11 }
 0x202   :  { %v962_v24 = vmul.f32 0.01, %v958_v63  ;;  %v963_v25 = vmul.f32 0.01, %v959_v21  ;;  %v964_v26 = vmul.f32 0.01, %v960_v22 }
 0x203   :  { %v965_v27 = vmul.f32 0.01, %v961_v23 }
 0x204   :  { %v4522_v28 = vmax.f32 %v958_v63, %v962_v24  ;;  %v967_v29 = vmax.f32 %v959_v21, %v963_v25  ;;  %v4524_v30 = vmax.f32 %v960_v22, %v964_v26 }
 0x205   :  { %v4526_v31 = vmax.f32 %v961_v23, %v965_v27 }
 0x206   :  { %4231 = dma.done.wait [#allocation6], 16384 }
 0x207   :  { %4232 = vsyncadd [#allocation6], 4294950912  ;;  %v1105_v32 = vpack.c.bf16 %v967_v29, %v967_v29  ;;  %v975_v33 = vld [vmem:[#allocation2 + $0x8] sm:$0xff]  ;;  %v977_v34 = vld [vmem:[#allocation2 + $0x18] sm:$0xff] }
 0x208   :  { %v974_v35 = vld [vmem:[#allocation2] sm:$0xff]  ;;  %1129 = vmatprep.subr.bf16.mxu0 %v975_v33  ;;  %1211 = vmatprep.subr.bf16.mxu1 %v977_v34  ;;  %v976_v36 = vld [vmem:[#allocation2 + $0x10] sm:$0xff]  ;;  %v979_v37 = vld [vmem:[#allocation2 + $0x28] sm:$0xff] }
 0x209   :  { %1161 = vmatprep.mubr.bf16.mxu0 %v1105_v32  ;;  %1243 = vmatprep.mubr.bf16.mxu1 %v1105_v32  ;;  %v981_v38 = vld [vmem:[#allocation2 + $0x38] sm:$0xff]  ;;  %v978_v39 = vld [vmem:[#allocation2 + $0x20] sm:$0xff]  ;;  %v980_v40 = vld [vmem:[#allocation2 + $0x30] sm:$0xff] }
 0x20a   :  { %1130 = vmatpush1.bf16.msra.mxu0 %v974_v35  ;;  %1212 = vmatpush1.bf16.msra.mxu1 %v976_v36  ;;  %v983_v41 = vld [vmem:[#allocation2 + $0x48] sm:$0xff]  ;;  %v985_v43 = vld [vmem:[#allocation2 + $0x58] sm:$0xff]  ;;  %v982_v45 = vld [vmem:[#allocation2 + $0x40] sm:$0xff] }
 0x20b   :  { %1131 = vmatprep.subr.bf16.mxu0 %v979_v37  ;;  %1213 = vmatprep.subr.bf16.mxu1 %v981_v38  ;;  %v984_v46 = vld [vmem:[#allocation2 + $0x50] sm:$0xff]  ;;  %v987_v47 = vld [vmem:[#allocation2 + $0x68] sm:$0xff]  ;;  %v989_v48 = vld [vmem:[#allocation2 + $0x78] sm:$0xff] }
 0x20c   :  { %v986_v50 = vld [vmem:[#allocation2 + $0x60] sm:$0xff]  ;;  %v988_v51 = vld [vmem:[#allocation2 + $0x70] sm:$0xff]  ;;  %v991_v52 = vld [vmem:[#allocation2 + $0x88] sm:$0xff] }
 0x20d   :  { %v993_v53 = vld [vmem:[#allocation2 + $0x98] sm:$0xff]  ;;  %v990_v54 = vld [vmem:[#allocation2 + $0x80] sm:$0xff]  ;;  %v992_v58 = vld [vmem:[#allocation2 + $0x90] sm:$0xff] }
 0x20e   :  { %1132 = vmatpush1.bf16.msra.mxu0 %v978_v39  ;;  %1214 = vmatpush1.bf16.msra.mxu1 %v980_v40  ;;  %v995_v59 = vld [vmem:[#allocation2 + $0xa8] sm:$0xff]  ;;  %v997_v60 = vld [vmem:[#allocation2 + $0xb8] sm:$0xff]  ;;  %v994_v62 = vld [vmem:[#allocation2 + $0xa0] sm:$0xff] }
 0x20f   :  { %1133 = vmatprep.subr.bf16.mxu0 %v983_v41  ;;  %1215 = vmatprep.subr.bf16.mxu1 %v985_v43  ;;  %v996_v0 = vld [vmem:[#allocation2 + $0xb0] sm:$0xff]  ;;  %v999_v1 = vld [vmem:[#allocation2 + $0xc8] sm:$0xff]  ;;  %v1001_v5 = vld [vmem:[#allocation2 + $0xd8] sm:$0xff] }
 0x210   :  { %v998_v2 = vld [vmem:[#allocation2 + $0xc0] sm:$0xff]  ;;  %v1000_v3 = vld [vmem:[#allocation2 + $0xd0] sm:$0xff]  ;;  %v1003_v55 = vld [vmem:[#allocation2 + $0xe8] sm:$0xff] }
 0x211   :  { %v1005_v4 = vld [vmem:[#allocation2 + $0xf8] sm:$0xff]  ;;  %v1002_v9 = vld [vmem:[#allocation2 + $0xe0] sm:$0xff]  ;;  %v1004_v7 = vld [vmem:[#allocation2 + $0xf0] sm:$0xff] }
 0x212   :  { %1134 = vmatpush1.bf16.msra.mxu0 %v982_v45  ;;  %1216 = vmatpush1.bf16.msra.mxu1 %v984_v46  ;;  %v1007_v10 = vld [vmem:[#allocation2 + $0x108] sm:$0xff]  ;;  %v1009_v11 = vld [vmem:[#allocation2 + $0x118] sm:$0xff]  ;;  %v1006_v13 = vld [vmem:[#allocation2 + $0x100] sm:$0xff]  ;;  %v1104_v45 = vpack.c.bf16 %v4522_v28, %v4522_v28 }
 0x213   :  { %1135 = vmatprep.subr.bf16.mxu0 %v987_v47  ;;  %1217 = vmatprep.subr.bf16.mxu1 %v989_v48  ;;  %v1008_v15 = vld [vmem:[#allocation2 + $0x110] sm:$0xff]  ;;  %v1011_v16 = vld [vmem:[#allocation2 + $0x128] sm:$0xff]  ;;  %v1013_v17 = vld [vmem:[#allocation2 + $0x138] sm:$0xff] }
 0x214   :  { %v1010_v18 = vld [vmem:[#allocation2 + $0x120] sm:$0xff]  ;;  %v1012_v42 = vld [vmem:[#allocation2 + $0x130] sm:$0xff]  ;;  %v1015_v44 = vld [vmem:[#allocation2 + $0x148] sm:$0xff] }
 0x215   :  { %v1017_v19 = vld [vmem:[#allocation2 + $0x158] sm:$0xff]  ;;  %v1014_v20 = vld [vmem:[#allocation2 + $0x140] sm:$0xff]  ;;  %v1016_v12 = vld [vmem:[#allocation2 + $0x150] sm:$0xff] }
 0x216   :  { %1136 = vmatpush1.bf16.msra.mxu0 %v986_v50  ;;  %1218 = vmatpush1.bf16.msra.mxu1 %v988_v51  ;;  %v1019_v14 = vld [vmem:[#allocation2 + $0x168] sm:$0xff]  ;;  %v1021_v61 = vld [vmem:[#allocation2 + $0x178] sm:$0xff]  ;;  %v1018_v63 = vld [vmem:[#allocation2 + $0x160] sm:$0xff]  ;;  %v1107_v51 = vpack.c.bf16 %v4526_v31, %v4526_v31 }
 0x217   :  { %1137 = vmatprep.subr.bf16.mxu0 %v991_v52  ;;  %1219 = vmatprep.subr.bf16.mxu1 %v993_v53  ;;  %v1020_v21 = vld [vmem:[#allocation2 + $0x170] sm:$0xff]  ;;  %v1023_v22 = vld [vmem:[#allocation2 + $0x188] sm:$0xff]  ;;  %v1025_v23 = vld [vmem:[#allocation2 + $0x198] sm:$0xff] }
 0x218   :  { %v1022_v24 = vld [vmem:[#allocation2 + $0x180] sm:$0xff]  ;;  %v1024_v25 = vld [vmem:[#allocation2 + $0x190] sm:$0xff]  ;;  %v1027_v26 = vld [vmem:[#allocation2 + $0x1a8] sm:$0xff] }
 0x219   :  { %v1029_v27 = vld [vmem:[#allocation2 + $0x1b8] sm:$0xff]  ;;  %v1026_v29 = vld [vmem:[#allocation2 + $0x1a0] sm:$0xff]  ;;  %v1028_v32 = vld [vmem:[#allocation2 + $0x1b0] sm:$0xff] }
 0x21a   :  { %1138 = vmatpush1.bf16.msra.mxu0 %v990_v54  ;;  %1220 = vmatpush1.bf16.msra.mxu1 %v992_v58  ;;  %v1031_v33 = vld [vmem:[#allocation2 + $0x1c8] sm:$0xff]  ;;  %v1033_v34 = vld [vmem:[#allocation2 + $0x1d8] sm:$0xff]  ;;  %v1030_v35 = vld [vmem:[#allocation2 + $0x1c0] sm:$0xff] }
 0x21b   :  { %1139 = vmatprep.subr.bf16.mxu0 %v995_v59  ;;  %1221 = vmatprep.subr.bf16.mxu1 %v997_v60  ;;  %v1032_v36 = vld [vmem:[#allocation2 + $0x1d0] sm:$0xff]  ;;  %v1035_v37 = vld [vmem:[#allocation2 + $0x1e8] sm:$0xff]  ;;  %v1037_v38 = vld [vmem:[#allocation2 + $0x1f8] sm:$0xff] }
 0x21c   :  { %v1034_v39 = vld [vmem:[#allocation2 + $0x1e0] sm:$0xff]  ;;  %v1036_v40 = vld [vmem:[#allocation2 + $0x1f0] sm:$0xff]  ;;  %v1039_v41 = vld [vmem:[#allocation2 + $0x208] sm:$0xff] }
 0x21d   :  { %v1041_v43 = vld [vmem:[#allocation2 + $0x218] sm:$0xff]  ;;  %v1038_v46 = vld [vmem:[#allocation2 + $0x200] sm:$0xff]  ;;  %v1040_v47 = vld [vmem:[#allocation2 + $0x210] sm:$0xff] }
 0x21e   :  { %1140 = vmatpush1.bf16.msra.mxu0 %v994_v62  ;;  %1222 = vmatpush1.bf16.msra.mxu1 %v996_v0  ;;  %v1043_v48 = vld [vmem:[#allocation2 + $0x228] sm:$0xff]  ;;  %v1045_v50 = vld [vmem:[#allocation2 + $0x238] sm:$0xff]  ;;  %v1042_v52 = vld [vmem:[#allocation2 + $0x220] sm:$0xff] }
 0x21f   :  { %1141 = vmatprep.subr.bf16.mxu0 %v999_v1  ;;  %1223 = vmatprep.subr.bf16.mxu1 %v1001_v5  ;;  %v1044_v53 = vld [vmem:[#allocation2 + $0x230] sm:$0xff]  ;;  %v1047_v28 = vld [vmem:[#allocation2 + $0x248] sm:$0xff]  ;;  %v1049_v54 = vld [vmem:[#allocation2 + $0x258] sm:$0xff] }
 0x220   :  { %v1046_v58 = vld [vmem:[#allocation2 + $0x240] sm:$0xff]  ;;  %v1048_v59 = vld [vmem:[#allocation2 + $0x250] sm:$0xff]  ;;  %v1051_v60 = vld [vmem:[#allocation2 + $0x268] sm:$0xff] }
 0x221   :  { %v1053_v31 = vld [vmem:[#allocation2 + $0x278] sm:$0xff]  ;;  %v1050_v62 = vld [vmem:[#allocation2 + $0x260] sm:$0xff]  ;;  %v1052_v0 = vld [vmem:[#allocation2 + $0x270] sm:$0xff] }
 0x222   :  { %1142 = vmatpush1.bf16.msra.mxu0 %v998_v2  ;;  %1224 = vmatpush1.bf16.msra.mxu1 %v1000_v3  ;;  %v1055_v1 = vld [vmem:[#allocation2 + $0x288] sm:$0xff]  ;;  %v1057_v5 = vld [vmem:[#allocation2 + $0x298] sm:$0xff]  ;;  %v1054_v2 = vld [vmem:[#allocation2 + $0x280] sm:$0xff] }
 0x223   :  { %1143 = vmatprep.subr.bf16.mxu0 %v1003_v55  ;;  %1225 = vmatprep.subr.bf16.mxu1 %v1005_v4  ;;  %v1056_v3 = vld [vmem:[#allocation2 + $0x290] sm:$0xff]  ;;  %v1059_v55 = vld [vmem:[#allocation2 + $0x2a8] sm:$0xff]  ;;  %v1061_v4 = vld [vmem:[#allocation2 + $0x2b8] sm:$0xff] }
 0x226   :  { %1144 = vmatpush1.bf16.msra.mxu0 %v1002_v9  ;;  %1226 = vmatpush1.bf16.msra.mxu1 %v1004_v7  ;;  %v1058_v9 = vld [vmem:[#allocation2 + $0x2a0] sm:$0xff]  ;;  %v1060_v7 = vld [vmem:[#allocation2 + $0x2b0] sm:$0xff] }
 0x227   :  { %1145 = vmatprep.subr.bf16.mxu0 %v1007_v10  ;;  %1227 = vmatprep.subr.bf16.mxu1 %v1009_v11  ;;  %v1063_v10 = vld [vmem:[#allocation2 + $0x2c8] sm:$0xff]  ;;  %v1065_v11 = vld [vmem:[#allocation2 + $0x2d8] sm:$0xff] }
 0x22a   :  { %1146 = vmatpush1.bf16.msra.mxu0 %v1006_v13  ;;  %1228 = vmatpush1.bf16.msra.mxu1 %v1008_v15  ;;  %v1062_v13 = vld [vmem:[#allocation2 + $0x2c0] sm:$0xff]  ;;  %v1064_v15 = vld [vmem:[#allocation2 + $0x2d0] sm:$0xff] }
 0x22b   :  { %1147 = vmatprep.subr.bf16.mxu0 %v1011_v16  ;;  %1229 = vmatprep.subr.bf16.mxu1 %v1013_v17  ;;  %v1067_v16 = vld [vmem:[#allocation2 + $0x2e8] sm:$0xff]  ;;  %v1069_v17 = vld [vmem:[#allocation2 + $0x2f8] sm:$0xff] }
 0x22e   :  { %1148 = vmatpush1.bf16.msra.mxu0 %v1010_v18  ;;  %1230 = vmatpush1.bf16.msra.mxu1 %v1012_v42  ;;  %v1066_v18 = vld [vmem:[#allocation2 + $0x2e0] sm:$0xff]  ;;  %v1068_v42 = vld [vmem:[#allocation2 + $0x2f0] sm:$0xff] }
 0x22f   :  { %1149 = vmatprep.subr.bf16.mxu0 %v1015_v44  ;;  %1231 = vmatprep.subr.bf16.mxu1 %v1017_v19  ;;  %v1071_v44 = vld [vmem:[#allocation2 + $0x308] sm:$0xff]  ;;  %v1073_v19 = vld [vmem:[#allocation2 + $0x318] sm:$0xff] }
 0x232   :  { %1150 = vmatpush1.bf16.msra.mxu0 %v1014_v20  ;;  %1232 = vmatpush1.bf16.msra.mxu1 %v1016_v12  ;;  %v1070_v20 = vld [vmem:[#allocation2 + $0x300] sm:$0xff]  ;;  %v1072_v12 = vld [vmem:[#allocation2 + $0x310] sm:$0xff] }
 0x233   :  { %1151 = vmatprep.subr.bf16.mxu0 %v1019_v14  ;;  %1233 = vmatprep.subr.bf16.mxu1 %v1021_v61  ;;  %v1075_v14 = vld [vmem:[#allocation2 + $0x328] sm:$0xff]  ;;  %v1077_v61 = vld [vmem:[#allocation2 + $0x338] sm:$0xff] }
 0x236   :  { %1152 = vmatpush1.bf16.msra.mxu0 %v1018_v63  ;;  %1234 = vmatpush1.bf16.msra.mxu1 %v1020_v21  ;;  %v1074_v63 = vld [vmem:[#allocation2 + $0x320] sm:$0xff]  ;;  %v1076_v21 = vld [vmem:[#allocation2 + $0x330] sm:$0xff] }
 0x237   :  { %1153 = vmatprep.subr.bf16.mxu0 %v1023_v22  ;;  %1235 = vmatprep.subr.bf16.mxu1 %v1025_v23  ;;  %v1079_v22 = vld [vmem:[#allocation2 + $0x348] sm:$0xff]  ;;  %v1081_v23 = vld [vmem:[#allocation2 + $0x358] sm:$0xff] }
 0x23a   :  { %1154 = vmatpush1.bf16.msra.mxu0 %v1022_v24  ;;  %1236 = vmatpush1.bf16.msra.mxu1 %v1024_v25  ;;  %v1078_v24 = vld [vmem:[#allocation2 + $0x340] sm:$0xff]  ;;  %v1080_v25 = vld [vmem:[#allocation2 + $0x350] sm:$0xff] }
 0x23b   :  { %1155 = vmatprep.subr.bf16.mxu0 %v1027_v26  ;;  %1237 = vmatprep.subr.bf16.mxu1 %v1029_v27  ;;  %v1083_v26 = vld [vmem:[#allocation2 + $0x368] sm:$0xff]  ;;  %v1085_v27 = vld [vmem:[#allocation2 + $0x378] sm:$0xff] }
 0x23e   :  { %1156 = vmatpush1.bf16.msra.mxu0 %v1026_v29  ;;  %1238 = vmatpush1.bf16.msra.mxu1 %v1028_v32  ;;  %v1082_v29 = vld [vmem:[#allocation2 + $0x360] sm:$0xff]  ;;  %v1084_v32 = vld [vmem:[#allocation2 + $0x370] sm:$0xff] }
 0x23f   :  { %1157 = vmatprep.subr.bf16.mxu0 %v1031_v33  ;;  %1239 = vmatprep.subr.bf16.mxu1 %v1033_v34  ;;  %v1087_v33 = vld [vmem:[#allocation2 + $0x388] sm:$0xff]  ;;  %v1089_v34 = vld [vmem:[#allocation2 + $0x398] sm:$0xff] }
 0x242   :  { %1158 = vmatpush1.bf16.msra.mxu0 %v1030_v35  ;;  %1240 = vmatpush1.bf16.msra.mxu1 %v1032_v36  ;;  %v1086_v35 = vld [vmem:[#allocation2 + $0x380] sm:$0xff]  ;;  %v1088_v36 = vld [vmem:[#allocation2 + $0x390] sm:$0xff] }
 0x243   :  { %1159 = vmatprep.subr.bf16.mxu0 %v1035_v37  ;;  %1241 = vmatprep.subr.bf16.mxu1 %v1037_v38  ;;  %v1091_v37 = vld [vmem:[#allocation2 + $0x3a8] sm:$0xff]  ;;  %v1093_v38 = vld [vmem:[#allocation2 + $0x3b8] sm:$0xff] }
 0x246   :  { %1160 = vmatpush1.bf16.msra.mxu0 %v1034_v39  ;;  %1242 = vmatpush1.bf16.msra.mxu1 %v1036_v40  ;;  %v1090_v39 = vld [vmem:[#allocation2 + $0x3a0] sm:$0xff]  ;;  %v1092_v40 = vld [vmem:[#allocation2 + $0x3b0] sm:$0xff] }
 0x247   :  { %1170 = vmatprep.subr.bf16.mxu0 %v1039_v41  ;;  %1252 = vmatprep.subr.bf16.mxu1 %v1041_v43  ;;  %v1095_v41 = vld [vmem:[#allocation2 + $0x3c8] sm:$0xff]  ;;  %v1097_v43 = vld [vmem:[#allocation2 + $0x3d8] sm:$0xff] }
 0x249   :  { %1162 = vmatmul.mubr.bf16.vlgmr.msra.gmra.mrb[0].mxu0 %v1104_v45  ;;  %1244 = vmatmul.mubr.bf16.vlgmr.msra.gmra.mrb[8].mxu1 %v1104_v45  ;;  %v1094_v45 = vld [vmem:[#allocation2 + $0x3c0] sm:$0xff] }
 0x24a   :  { %1171 = vmatpush1.bf16.msra.mxu0 %v1038_v46  ;;  %1253 = vmatpush1.bf16.msra.mxu1 %v1040_v47  ;;  %v1096_v46 = vld [vmem:[#allocation2 + $0x3d0] sm:$0xff]  ;;  %v1099_v47 = vld [vmem:[#allocation2 + $0x3e8] sm:$0xff] }
 0x24b   :  { %1172 = vmatprep.subr.bf16.mxu0 %v1043_v48  ;;  %1254 = vmatprep.subr.bf16.mxu1 %v1045_v50  ;;  %v1101_v48 = vld [vmem:[#allocation2 + $0x3f8] sm:$0xff]  ;;  %v1098_v50 = vld [vmem:[#allocation2 + $0x3e0] sm:$0xff] }
 0x24c   :  { %1202 = vmatprep.mubr.bf16.mxu0 %v1107_v51  ;;  %1284 = vmatprep.mubr.bf16.mxu1 %v1107_v51  ;;  %v1100_v51 = vld [vmem:[#allocation2 + $0x3f0] sm:$0xff] }
 0x24e   :  { %1173 = vmatpush1.bf16.msra.mxu0 %v1042_v52  ;;  %1255 = vmatpush1.bf16.msra.mxu1 %v1044_v53  ;;  %v1106_v52 = vpack.c.bf16 %v4524_v30, %v4524_v30  ;;  %v1103_v53 = vld [vmem:[#allocation10 + $0x3] ss:$8 sm:$0xf] }
 0x24f   :  { %1174 = vmatprep.subr.bf16.mxu0 %v1047_v28  ;;  %1256 = vmatprep.subr.bf16.mxu1 %v1049_v54  ;;  %v1112_v28 = vrot.slane %v1103_v53, %v4452_v6  ;;  %v1120_v54 = vrot.slane %v1103_v53, %v4480_v56 }
 0x252   :  { %1175 = vmatpush1.bf16.msra.mxu0 %v1046_v58  ;;  %1257 = vmatpush1.bf16.msra.mxu1 %v1048_v59  ;;  %v1116_v58 = vrot.slane %v1103_v53, %v4455_v8  ;;  %v1124_v59 = vrot.slane %v1103_v53, %v4483_v57 }
 0x253   :  { %1176 = vmatprep.subr.bf16.mxu0 %v1051_v60  ;;  %1258 = vmatprep.subr.bf16.mxu1 %v1053_v31 }
 0x256   :  { %1177 = vmatpush1.bf16.msra.mxu0 %v1050_v62  ;;  %1259 = vmatpush1.bf16.msra.mxu1 %v1052_v0 }
 0x257   :  { %1178 = vmatprep.subr.bf16.mxu0 %v1055_v1  ;;  %1260 = vmatprep.subr.bf16.mxu1 %v1057_v5 }
 0x25a   :  { %1179 = vmatpush1.bf16.msra.mxu0 %v1054_v2  ;;  %1261 = vmatpush1.bf16.msra.mxu1 %v1056_v3 }
 0x25b   :  { %1180 = vmatprep.subr.bf16.mxu0 %v1059_v55  ;;  %1262 = vmatprep.subr.bf16.mxu1 %v1061_v4 }
 0x25e   :  { %1181 = vmatpush1.bf16.msra.mxu0 %v1058_v9  ;;  %1263 = vmatpush1.bf16.msra.mxu1 %v1060_v7 }
 0x25f   :  { %1182 = vmatprep.subr.bf16.mxu0 %v1063_v10  ;;  %1264 = vmatprep.subr.bf16.mxu1 %v1065_v11 }
 0x262   :  { %1183 = vmatpush1.bf16.msra.mxu0 %v1062_v13  ;;  %1265 = vmatpush1.bf16.msra.mxu1 %v1064_v15 }
 0x263   :  { %1184 = vmatprep.subr.bf16.mxu0 %v1067_v16  ;;  %1266 = vmatprep.subr.bf16.mxu1 %v1069_v17 }
 0x266   :  { %1185 = vmatpush1.bf16.msra.mxu0 %v1066_v18  ;;  %1267 = vmatpush1.bf16.msra.mxu1 %v1068_v42 }
 0x267   :  { %1186 = vmatprep.subr.bf16.mxu0 %v1071_v44  ;;  %1268 = vmatprep.subr.bf16.mxu1 %v1073_v19 }
 0x26a   :  { %1187 = vmatpush1.bf16.msra.mxu0 %v1070_v20  ;;  %1269 = vmatpush1.bf16.msra.mxu1 %v1072_v12 }
 0x26b   :  { %1188 = vmatprep.subr.bf16.mxu0 %v1075_v14  ;;  %1270 = vmatprep.subr.bf16.mxu1 %v1077_v61 }
 0x26e   :  { %1189 = vmatpush1.bf16.msra.mxu0 %v1074_v63  ;;  %1271 = vmatpush1.bf16.msra.mxu1 %v1076_v21 }
 0x26f   :  { %1190 = vmatprep.subr.bf16.mxu0 %v1079_v22  ;;  %1272 = vmatprep.subr.bf16.mxu1 %v1081_v23 }
 0x272   :  { %1191 = vmatpush1.bf16.msra.mxu0 %v1078_v24  ;;  %1273 = vmatpush1.bf16.msra.mxu1 %v1080_v25 }
 0x273   :  { %1192 = vmatprep.subr.bf16.mxu0 %v1083_v26  ;;  %1274 = vmatprep.subr.bf16.mxu1 %v1085_v27 }
 0x276   :  { %1193 = vmatpush1.bf16.msra.mxu0 %v1082_v29  ;;  %1275 = vmatpush1.bf16.msra.mxu1 %v1084_v32 }
 0x277   :  { %1194 = vmatprep.subr.bf16.mxu0 %v1087_v33  ;;  %1276 = vmatprep.subr.bf16.mxu1 %v1089_v34 }
 0x27a   :  { %1195 = vmatpush1.bf16.msra.mxu0 %v1086_v35  ;;  %1277 = vmatpush1.bf16.msra.mxu1 %v1088_v36 }
 0x27b   :  { %1196 = vmatprep.subr.bf16.mxu0 %v1091_v37  ;;  %1278 = vmatprep.subr.bf16.mxu1 %v1093_v38 }
 0x27e   :  { %1197 = vmatpush1.bf16.msra.mxu0 %v1090_v39  ;;  %1279 = vmatpush1.bf16.msra.mxu1 %v1092_v40 }
 0x27f   :  { %1198 = vmatprep.subr.bf16.mxu0 %v1095_v41  ;;  %1280 = vmatprep.subr.bf16.mxu1 %v1097_v43 }
 0x282   :  { %1199 = vmatpush1.bf16.msra.mxu0 %v1094_v45  ;;  %1281 = vmatpush1.bf16.msra.mxu1 %v1096_v46 }
 0x283   :  { %1200 = vmatprep.subr.bf16.mxu0 %v1099_v47  ;;  %1282 = vmatprep.subr.bf16.mxu1 %v1101_v48 }
 0x286   :  { %1201 = vmatpush1.bf16.msra.mxu0 %v1098_v50  ;;  %1283 = vmatpush1.bf16.msra.mxu1 %v1100_v51 }
 0x289   :  { %1203 = vmatmul.mubr.bf16.vlgmr.msra.gmra.mrb[0].mxu0 %v1106_v52  ;;  %1285 = vmatmul.mubr.bf16.vlgmr.msra.gmra.mrb[8].mxu1 %v1106_v52 }
 0x35c   :  { %v1204_v60 = vpop.f32.mrb[0].mxu0  ;;  %v1286_v31 = vpop.f32.mrb[8].mxu1 }
 0x35d   :  { %v4538_v62 = vadd.f32 %v1204_v60, %v1112_v28  ;;  %v4540_v0 = vadd.f32 %v1286_v31, %v1120_v54  ;;  %v1206_v30 = vpop.f32.mrb[1].mxu0  ;;  %v1288_v1 = vpop.f32.mrb[9].mxu1 }
 0x35e   :  { %v4542_v5 = vadd.f32 %v1206_v30, %v1116_v58  ;;  %v4544_v2 = vadd.f32 %v1288_v1, %v1124_v59  ;;  %v1208_v3 = vpop.f32.mrb[2].mxu0  ;;  %v1290_v55 = vpop.f32.mrb[10].mxu1 }
 0x35f   :  { %v1297_v4 = vrot.slane %v4538_v62, 4  ;;  %v1321_v9 = vmul.f32 %v4538_v62, %v4538_v62  ;;  %v1309_v7 = vrot.slane %v4540_v0, 4  ;;  %v1323_v10 = vmul.f32 %v4540_v0, %v4540_v0  ;;  %v1209_v11 = vpop.f32.mrb[3].mxu0  ;;  %v1291_v13 = vpop.f32.mrb[11].mxu1 }
 0x360   :  { %v1303_v15 = vrot.slane %v4542_v5, 4  ;;  %v1322_v16 = vmul.f32 %v4542_v5, %v4542_v5  ;;  %v1315_v17 = vrot.slane %v4544_v2, 4  ;;  %v1324_v18 = vmul.f32 %v4544_v2, %v4544_v2 }
 0x361   :  { %v1298_v42 = vadd.f32 %v4538_v62, %v1297_v4  ;;  %v1325_v44 = vrot.slane %v1321_v9, 4  ;;  %v1310_v19 = vadd.f32 %v4540_v0, %v1309_v7  ;;  %v1337_v20 = vrot.slane %v1323_v10, 4 }
 0x362   :  { %v1304_v12 = vadd.f32 %v4542_v5, %v1303_v15  ;;  %v1331_v14 = vrot.slane %v1322_v16, 4  ;;  %v1316_v61 = vadd.f32 %v4544_v2, %v1315_v17  ;;  %v1343_v63 = vrot.slane %v1324_v18, 4 }
 0x363   :  { %v1299_v21 = vrot.slane %v1298_v42, 2  ;;  %v1326_v22 = vadd.f32 %v1325_v44, %v1321_v9  ;;  %v1311_v23 = vrot.slane %v1310_v19, 2  ;;  %v1338_v24 = vadd.f32 %v1337_v20, %v1323_v10 }
 0x364   :  { %v1305_v25 = vrot.slane %v1304_v12, 2  ;;  %v1332_v26 = vadd.f32 %v1331_v14, %v1322_v16  ;;  %v1317_v27 = vrot.slane %v1316_v61, 2  ;;  %v1344_v29 = vadd.f32 %v1343_v63, %v1324_v18 }
 0x365   :  { %v1300_v32 = vadd.f32 %v1299_v21, %v1298_v42  ;;  %v1327_v33 = vrot.slane %v1326_v22, 2  ;;  %v1312_v34 = vadd.f32 %v1311_v23, %v1310_v19  ;;  %v1339_v35 = vrot.slane %v1338_v24, 2 }
 0x366   :  { %v1306_v36 = vadd.f32 %v1305_v25, %v1304_v12  ;;  %v1333_v37 = vrot.slane %v1332_v26, 2  ;;  %v1318_v38 = vadd.f32 %v1317_v27, %v1316_v61  ;;  %v1345_v39 = vrot.slane %v1344_v29, 2 }
 0x367   :  { %v1301_v40 = vrot.slane %v1300_v32, 1  ;;  %v1328_v41 = vadd.f32 %v1327_v33, %v1326_v22  ;;  %v1313_v43 = vrot.slane %v1312_v34, 1  ;;  %v1340_v45 = vadd.f32 %v1339_v35, %v1338_v24 }
 0x368   :  { %v1307_v46 = vrot.slane %v1306_v36, 1  ;;  %v1334_v47 = vadd.f32 %v1333_v37, %v1332_v26  ;;  %v1319_v48 = vrot.slane %v1318_v38, 1  ;;  %v1346_v50 = vadd.f32 %v1345_v39, %v1344_v29 }
 0x369   :  { %v1302_v51 = vadd.f32 %v1301_v40, %v1300_v32  ;;  %v1329_v52 = vrot.slane %v1328_v41, 1  ;;  %v1314_v53 = vadd.f32 %v1313_v43, %v1312_v34  ;;  %v1341_v28 = vrot.slane %v1340_v45, 1  ;;  %v1294_v34 = vld [vmem:[#allocation10 + $0x4] ss:$8 sm:$0xf] }
 0x36a   :  { %v1308_v54 = vadd.f32 %v1307_v46, %v1306_v36  ;;  %v1335_v58 = vrot.slane %v1334_v47, 1  ;;  %v1320_v59 = vadd.f32 %v1319_v48, %v1318_v38  ;;  %v1347_v60 = vrot.slane %v1346_v50, 1 }
 0x36b   :  { %v1330_v31 = vadd.f32 %v1329_v52, %v1328_v41  ;;  %v1349_v30 = vmul.f32 0.125, %v1302_v51  ;;  %v1342_v1 = vadd.f32 %v1341_v28, %v1340_v45  ;;  %v1351_v3 = vmul.f32 0.125, %v1314_v53 }
 0x36c   :  { %v1336_v55 = vadd.f32 %v1335_v58, %v1334_v47  ;;  %v1350_v4 = vmul.f32 0.125, %v1308_v54  ;;  %v1348_v9 = vadd.f32 %v1347_v60, %v1346_v50  ;;  %v1352_v7 = vmul.f32 0.125, %v1320_v59  ;;  %v1296_v59 = vld [vmem:[#allocation10 + $0x5] ss:$8 sm:$0xf] }
 0x36d   :  { %v1353_v10 = vmul.f32 0.125, %v1330_v31  ;;  %v1357_v11 = vmul.f32 %v1349_v30, %v1349_v30  ;;  %v1355_v13 = vmul.f32 0.125, %v1342_v1  ;;  %v1359_v15 = vmul.f32 %v1351_v3, %v1351_v3 }
 0x36e   :  { %v1354_v16 = vmul.f32 0.125, %v1336_v55  ;;  %v1358_v17 = vmul.f32 %v1350_v4, %v1350_v4  ;;  %v1356_v18 = vmul.f32 0.125, %v1348_v9  ;;  %v1360_v42 = vmul.f32 %v1352_v7, %v1352_v7 }
 0x36f   :  { %v1361_v44 = vsub.f32 %v1353_v10, %v1357_v11  ;;  %v1363_v19 = vsub.f32 %v1355_v13, %v1359_v15 }
 0x370   :  { %v1362_v20 = vsub.f32 %v1354_v16, %v1358_v17  ;;  %v1364_v12 = vsub.f32 %v1356_v18, %v1360_v42 }
 0x371   :  { %v1365_v14 = vadd.f32 1e-05, %v1361_v44  ;;  %v1367_v61 = vadd.f32 1e-05, %v1363_v19 }
 0x372   :  { %v1366_v63 = vadd.f32 1e-05, %v1362_v20  ;;  %v1368_v21 = vadd.f32 1e-05, %v1364_v12 }
 0x373   :  { %4091 = vrsqrt.f32 %v1365_v14 }
 0x374   :  { %4093 = vrsqrt.f32 %v1367_v61 }
 0x375   :  { %4095 = vrsqrt.f32 %v1366_v63 }
 0x376   :  { %4097 = vrsqrt.f32 %v1368_v21 }
 0x37d   :  { %v4092_v22 = vpop.eup %4091 }
 0x37e   :  { %v4094_v23 = vpop.eup %4093 }
 0x37f   :  { %v4096_v24 = vpop.eup %4095 }
 0x380   :  { %v4098_v25 = vpop.eup %4097  ;;  %v1377_v26 = vcombine.low %v4092_v22, %v4096_v24 }
 0x381   :  { %v1378_v27 = vcombine.low %v4094_v23, %v4098_v25 }
 0x382   :  { %v1385_v29 = vrot.slane %v1377_v26, %v4500_v49 }
 0x383   :  { %v1392_v32 = vrot.slane %v1378_v27, %v4500_v49 }
 0x385   :  { %v1393_v33 = vcombine.low %v1385_v29, %v1392_v32 }
 0x387   :  { %v1400_v35 = vrot.slane %v1393_v33, %v4500_v49 }
 0x389   :  { %v1402_v36 = vmul.f32 %v1400_v35, %v1294_v34 }
 0x38b   :  { %v1407_v37 = vrot.slane %v1402_v36, %v4452_v6  ;;  %v1411_v38 = vrot.slane %v1402_v36, %v4455_v8  ;;  %v1415_v39 = vrot.slane %v1402_v36, %v4480_v56  ;;  %v1419_v40 = vrot.slane %v1402_v36, %v4483_v57 }
 0x38d   :  { %v1424_v41 = vmul.f32 %v1407_v37, %v1349_v30  ;;  %v1425_v43 = vmul.f32 %v1411_v38, %v1350_v4  ;;  %v1426_v45 = vmul.f32 %v1415_v39, %v1351_v3  ;;  %v1427_v46 = vmul.f32 %v1419_v40, %v1352_v7 }
 0x38e   :  { %v1458_v47 = vmul.f32 %v4538_v62, %v1407_v37  ;;  %v1459_v48 = vmul.f32 %v4542_v5, %v1411_v38  ;;  %v1460_v50 = vmul.f32 %v4540_v0, %v1415_v39  ;;  %v1461_v51 = vmul.f32 %v4544_v2, %v1419_v40 }
 0x38f   :  { %v1432_v52 = vcombine.low %v1424_v41, %v1425_v43  ;;  %v1433_v53 = vcombine.low %v1426_v45, %v1427_v46 }
 0x391   :  { %v1440_v28 = vrot.slane %v1432_v52, %v4500_v49  ;;  %v1447_v54 = vrot.slane %v1433_v53, %v4500_v49 }
 0x393   :  { %v1448_v58 = vcombine.low %v1440_v28, %v1447_v54 }
 0x395   :  { %v1455_v60 = vrot.slane %v1448_v58, %v4500_v49 }
 0x397   :  { %v1457_v31 = vsub.f32 %v1296_v59, %v1455_v60 }
 0x399   :  { %v1466_v30 = vrot.slane %v1457_v31, %v4452_v6  ;;  %v1470_v62 = vrot.slane %v1457_v31, %v4455_v8  ;;  %v1474_v5 = vrot.slane %v1457_v31, %v4480_v56  ;;  %v1478_v0 = vrot.slane %v1457_v31, %v4483_v57 }
 0x39b   :  { %v1483_v2 = vadd.f32 %v1466_v30, %v1458_v47  ;;  %v1484_v1 = vadd.f32 %v1470_v62, %v1459_v48  ;;  %v1485_v3 = vadd.f32 %v1474_v5, %v1460_v50  ;;  %v1486_v55 = vadd.f32 %v1478_v0, %v1461_v51 }
 0x39d   :  { %v1487_v4 = vmul.f32 0.01, %v1483_v2  ;;  %v1488_v9 = vmul.f32 0.01, %v1484_v1  ;;  %v1489_v7 = vmul.f32 0.01, %v1485_v3 }
 0x39e   :  { %v1490_v10 = vmul.f32 0.01, %v1486_v55 }
 0x39f   :  { %v4580_v11 = vmax.f32 %v1483_v2, %v1487_v4  ;;  %v1492_v13 = vmax.f32 %v1484_v1, %v1488_v9  ;;  %v4582_v15 = vmax.f32 %v1485_v3, %v1489_v7 }
 0x3a0   :  { %v4584_v16 = vmax.f32 %v1486_v55, %v1490_v10 }
 0x3a1   :  { %4233 = dma.done.wait [#allocation6 + $0x1], 16384 }
 0x3a2   :  { %4234 = vsyncadd [#allocation6 + $0x1], 4294950912  ;;  %v1628_v17 = vpack.c.bf16 %v1492_v13, %v1492_v13  ;;  %v1498_v18 = vld [vmem:[#allocation2 + $0x408] sm:$0xff]  ;;  %v1500_v42 = vld [vmem:[#allocation2 + $0x418] sm:$0xff] }
 0x3a3   :  { %v1497_v44 = vld [vmem:[#allocation2 + $0x400] sm:$0xff]  ;;  %1652 = vmatprep.subr.bf16.mxu0 %v1498_v18  ;;  %1734 = vmatprep.subr.bf16.mxu1 %v1500_v42  ;;  %v1499_v19 = vld [vmem:[#allocation2 + $0x410] sm:$0xff]  ;;  %v1502_v20 = vld [vmem:[#allocation2 + $0x428] sm:$0xff] }
 0x3a4   :  { %1684 = vmatprep.mubr.bf16.mxu0 %v1628_v17  ;;  %1766 = vmatprep.mubr.bf16.mxu1 %v1628_v17  ;;  %v1504_v12 = vld [vmem:[#allocation2 + $0x438] sm:$0xff]  ;;  %v1501_v14 = vld [vmem:[#allocation2 + $0x420] sm:$0xff]  ;;  %v1503_v61 = vld [vmem:[#allocation2 + $0x430] sm:$0xff] }
 0x3a5   :  { %1653 = vmatpush1.bf16.msra.mxu0 %v1497_v44  ;;  %1735 = vmatpush1.bf16.msra.mxu1 %v1499_v19  ;;  %v1506_v63 = vld [vmem:[#allocation2 + $0x448] sm:$0xff]  ;;  %v1508_v21 = vld [vmem:[#allocation2 + $0x458] sm:$0xff]  ;;  %v1505_v22 = vld [vmem:[#allocation2 + $0x440] sm:$0xff] }
 0x3a6   :  { %1654 = vmatprep.subr.bf16.mxu0 %v1502_v20  ;;  %1736 = vmatprep.subr.bf16.mxu1 %v1504_v12  ;;  %v1507_v23 = vld [vmem:[#allocation2 + $0x450] sm:$0xff]  ;;  %v1510_v24 = vld [vmem:[#allocation2 + $0x468] sm:$0xff]  ;;  %v1512_v25 = vld [vmem:[#allocation2 + $0x478] sm:$0xff] }
 0x3a7   :  { %v1509_v26 = vld [vmem:[#allocation2 + $0x460] sm:$0xff]  ;;  %v1511_v27 = vld [vmem:[#allocation2 + $0x470] sm:$0xff]  ;;  %v1514_v29 = vld [vmem:[#allocation2 + $0x488] sm:$0xff] }
 0x3a8   :  { %v1516_v32 = vld [vmem:[#allocation2 + $0x498] sm:$0xff]  ;;  %v1513_v33 = vld [vmem:[#allocation2 + $0x480] sm:$0xff]  ;;  %v1515_v34 = vld [vmem:[#allocation2 + $0x490] sm:$0xff] }
 0x3a9   :  { %1655 = vmatpush1.bf16.msra.mxu0 %v1501_v14  ;;  %1737 = vmatpush1.bf16.msra.mxu1 %v1503_v61  ;;  %v1518_v35 = vld [vmem:[#allocation2 + $0x4a8] sm:$0xff]  ;;  %v1520_v36 = vld [vmem:[#allocation2 + $0x4b8] sm:$0xff]  ;;  %v1517_v37 = vld [vmem:[#allocation2 + $0x4a0] sm:$0xff] }
 0x3aa   :  { %1656 = vmatprep.subr.bf16.mxu0 %v1506_v63  ;;  %1738 = vmatprep.subr.bf16.mxu1 %v1508_v21  ;;  %v1519_v38 = vld [vmem:[#allocation2 + $0x4b0] sm:$0xff]  ;;  %v1522_v39 = vld [vmem:[#allocation2 + $0x4c8] sm:$0xff]  ;;  %v1524_v40 = vld [vmem:[#allocation2 + $0x4d8] sm:$0xff] }
 0x3ab   :  { %v1521_v41 = vld [vmem:[#allocation2 + $0x4c0] sm:$0xff]  ;;  %v1523_v43 = vld [vmem:[#allocation2 + $0x4d0] sm:$0xff]  ;;  %v1526_v45 = vld [vmem:[#allocation2 + $0x4e8] sm:$0xff] }
 0x3ac   :  { %v1528_v46 = vld [vmem:[#allocation2 + $0x4f8] sm:$0xff]  ;;  %v1525_v47 = vld [vmem:[#allocation2 + $0x4e0] sm:$0xff]  ;;  %v1527_v48 = vld [vmem:[#allocation2 + $0x4f0] sm:$0xff] }
 0x3ad   :  { %1657 = vmatpush1.bf16.msra.mxu0 %v1505_v22  ;;  %1739 = vmatpush1.bf16.msra.mxu1 %v1507_v23  ;;  %v1530_v50 = vld [vmem:[#allocation2 + $0x508] sm:$0xff]  ;;  %v1532_v51 = vld [vmem:[#allocation2 + $0x518] sm:$0xff]  ;;  %v1529_v52 = vld [vmem:[#allocation2 + $0x500] sm:$0xff]  ;;  %v1627_v22 = vpack.c.bf16 %v4580_v11, %v4580_v11 }
 0x3ae   :  { %1658 = vmatprep.subr.bf16.mxu0 %v1510_v24  ;;  %1740 = vmatprep.subr.bf16.mxu1 %v1512_v25  ;;  %v1531_v53 = vld [vmem:[#allocation2 + $0x510] sm:$0xff]  ;;  %v1534_v28 = vld [vmem:[#allocation2 + $0x528] sm:$0xff]  ;;  %v1536_v54 = vld [vmem:[#allocation2 + $0x538] sm:$0xff] }
 0x3af   :  { %v1533_v58 = vld [vmem:[#allocation2 + $0x520] sm:$0xff]  ;;  %v1535_v59 = vld [vmem:[#allocation2 + $0x530] sm:$0xff]  ;;  %v1538_v60 = vld [vmem:[#allocation2 + $0x548] sm:$0xff] }
 0x3b0   :  { %v1540_v31 = vld [vmem:[#allocation2 + $0x558] sm:$0xff]  ;;  %v1537_v30 = vld [vmem:[#allocation2 + $0x540] sm:$0xff]  ;;  %v1539_v62 = vld [vmem:[#allocation2 + $0x550] sm:$0xff] }
 0x3b1   :  { %1659 = vmatpush1.bf16.msra.mxu0 %v1509_v26  ;;  %1741 = vmatpush1.bf16.msra.mxu1 %v1511_v27  ;;  %v1542_v5 = vld [vmem:[#allocation2 + $0x568] sm:$0xff]  ;;  %v1544_v0 = vld [vmem:[#allocation2 + $0x578] sm:$0xff]  ;;  %v1541_v2 = vld [vmem:[#allocation2 + $0x560] sm:$0xff]  ;;  %v1630_v27 = vpack.c.bf16 %v4584_v16, %v4584_v16 }
 0x3b2   :  { %1660 = vmatprep.subr.bf16.mxu0 %v1514_v29  ;;  %1742 = vmatprep.subr.bf16.mxu1 %v1516_v32  ;;  %v1543_v1 = vld [vmem:[#allocation2 + $0x570] sm:$0xff]  ;;  %v1546_v3 = vld [vmem:[#allocation2 + $0x588] sm:$0xff]  ;;  %v1548_v55 = vld [vmem:[#allocation2 + $0x598] sm:$0xff] }
 0x3b3   :  { %v1545_v4 = vld [vmem:[#allocation2 + $0x580] sm:$0xff]  ;;  %v1547_v9 = vld [vmem:[#allocation2 + $0x590] sm:$0xff]  ;;  %v1550_v7 = vld [vmem:[#allocation2 + $0x5a8] sm:$0xff] }
 0x3b4   :  { %v1552_v10 = vld [vmem:[#allocation2 + $0x5b8] sm:$0xff]  ;;  %v1549_v13 = vld [vmem:[#allocation2 + $0x5a0] sm:$0xff]  ;;  %v1551_v17 = vld [vmem:[#allocation2 + $0x5b0] sm:$0xff] }
 0x3b5   :  { %1661 = vmatpush1.bf16.msra.mxu0 %v1513_v33  ;;  %1743 = vmatpush1.bf16.msra.mxu1 %v1515_v34  ;;  %v1554_v18 = vld [vmem:[#allocation2 + $0x5c8] sm:$0xff]  ;;  %v1556_v42 = vld [vmem:[#allocation2 + $0x5d8] sm:$0xff]  ;;  %v1553_v44 = vld [vmem:[#allocation2 + $0x5c0] sm:$0xff] }
 0x3b6   :  { %1662 = vmatprep.subr.bf16.mxu0 %v1518_v35  ;;  %1744 = vmatprep.subr.bf16.mxu1 %v1520_v36  ;;  %v1555_v19 = vld [vmem:[#allocation2 + $0x5d0] sm:$0xff]  ;;  %v1558_v20 = vld [vmem:[#allocation2 + $0x5e8] sm:$0xff]  ;;  %v1560_v12 = vld [vmem:[#allocation2 + $0x5f8] sm:$0xff] }
 0x3b7   :  { %v1557_v14 = vld [vmem:[#allocation2 + $0x5e0] sm:$0xff]  ;;  %v1559_v61 = vld [vmem:[#allocation2 + $0x5f0] sm:$0xff]  ;;  %v1562_v63 = vld [vmem:[#allocation2 + $0x608] sm:$0xff] }
 0x3b8   :  { %v1564_v21 = vld [vmem:[#allocation2 + $0x618] sm:$0xff]  ;;  %v1561_v23 = vld [vmem:[#allocation2 + $0x600] sm:$0xff]  ;;  %v1563_v24 = vld [vmem:[#allocation2 + $0x610] sm:$0xff] }
 0x3b9   :  { %1663 = vmatpush1.bf16.msra.mxu0 %v1517_v37  ;;  %1745 = vmatpush1.bf16.msra.mxu1 %v1519_v38  ;;  %v1566_v25 = vld [vmem:[#allocation2 + $0x628] sm:$0xff]  ;;  %v1568_v26 = vld [vmem:[#allocation2 + $0x638] sm:$0xff]  ;;  %v1565_v29 = vld [vmem:[#allocation2 + $0x620] sm:$0xff] }
 0x3ba   :  { %1664 = vmatprep.subr.bf16.mxu0 %v1522_v39  ;;  %1746 = vmatprep.subr.bf16.mxu1 %v1524_v40  ;;  %v1567_v32 = vld [vmem:[#allocation2 + $0x630] sm:$0xff]  ;;  %v1570_v11 = vld [vmem:[#allocation2 + $0x648] sm:$0xff]  ;;  %v1572_v33 = vld [vmem:[#allocation2 + $0x658] sm:$0xff] }
 0x3bb   :  { %v1569_v34 = vld [vmem:[#allocation2 + $0x640] sm:$0xff]  ;;  %v1571_v35 = vld [vmem:[#allocation2 + $0x650] sm:$0xff]  ;;  %v1574_v36 = vld [vmem:[#allocation2 + $0x668] sm:$0xff] }
 0x3bc   :  { %v1576_v16 = vld [vmem:[#allocation2 + $0x678] sm:$0xff]  ;;  %v1573_v37 = vld [vmem:[#allocation2 + $0x660] sm:$0xff]  ;;  %v1575_v38 = vld [vmem:[#allocation2 + $0x670] sm:$0xff] }
 0x3bd   :  { %1665 = vmatpush1.bf16.msra.mxu0 %v1521_v41  ;;  %1747 = vmatpush1.bf16.msra.mxu1 %v1523_v43  ;;  %v1578_v39 = vld [vmem:[#allocation2 + $0x688] sm:$0xff]  ;;  %v1580_v40 = vld [vmem:[#allocation2 + $0x698] sm:$0xff]  ;;  %v1577_v41 = vld [vmem:[#allocation2 + $0x680] sm:$0xff] }
 0x3be   :  { %1666 = vmatprep.subr.bf16.mxu0 %v1526_v45  ;;  %1748 = vmatprep.subr.bf16.mxu1 %v1528_v46  ;;  %v1579_v43 = vld [vmem:[#allocation2 + $0x690] sm:$0xff]  ;;  %v1582_v45 = vld [vmem:[#allocation2 + $0x6a8] sm:$0xff]  ;;  %v1584_v46 = vld [vmem:[#allocation2 + $0x6b8] sm:$0xff] }
 0x3c1   :  { %1667 = vmatpush1.bf16.msra.mxu0 %v1525_v47  ;;  %1749 = vmatpush1.bf16.msra.mxu1 %v1527_v48  ;;  %v1581_v47 = vld [vmem:[#allocation2 + $0x6a0] sm:$0xff]  ;;  %v1583_v48 = vld [vmem:[#allocation2 + $0x6b0] sm:$0xff] }
 0x3c2   :  { %1668 = vmatprep.subr.bf16.mxu0 %v1530_v50  ;;  %1750 = vmatprep.subr.bf16.mxu1 %v1532_v51  ;;  %v1586_v50 = vld [vmem:[#allocation2 + $0x6c8] sm:$0xff]  ;;  %v1588_v51 = vld [vmem:[#allocation2 + $0x6d8] sm:$0xff] }
 0x3c5   :  { %1669 = vmatpush1.bf16.msra.mxu0 %v1529_v52  ;;  %1751 = vmatpush1.bf16.msra.mxu1 %v1531_v53  ;;  %v1585_v52 = vld [vmem:[#allocation2 + $0x6c0] sm:$0xff]  ;;  %v1587_v53 = vld [vmem:[#allocation2 + $0x6d0] sm:$0xff] }
 0x3c6   :  { %1670 = vmatprep.subr.bf16.mxu0 %v1534_v28  ;;  %1752 = vmatprep.subr.bf16.mxu1 %v1536_v54  ;;  %v1590_v28 = vld [vmem:[#allocation2 + $0x6e8] sm:$0xff]  ;;  %v1592_v54 = vld [vmem:[#allocation2 + $0x6f8] sm:$0xff] }
 0x3c9   :  { %1671 = vmatpush1.bf16.msra.mxu0 %v1533_v58  ;;  %1753 = vmatpush1.bf16.msra.mxu1 %v1535_v59  ;;  %v1589_v58 = vld [vmem:[#allocation2 + $0x6e0] sm:$0xff]  ;;  %v1591_v59 = vld [vmem:[#allocation2 + $0x6f0] sm:$0xff] }
 0x3ca   :  { %1672 = vmatprep.subr.bf16.mxu0 %v1538_v60  ;;  %1754 = vmatprep.subr.bf16.mxu1 %v1540_v31  ;;  %v1594_v60 = vld [vmem:[#allocation2 + $0x708] sm:$0xff]  ;;  %v1596_v31 = vld [vmem:[#allocation2 + $0x718] sm:$0xff] }
 0x3cd   :  { %1673 = vmatpush1.bf16.msra.mxu0 %v1537_v30  ;;  %1755 = vmatpush1.bf16.msra.mxu1 %v1539_v62  ;;  %v1593_v30 = vld [vmem:[#allocation2 + $0x700] sm:$0xff]  ;;  %v1595_v62 = vld [vmem:[#allocation2 + $0x710] sm:$0xff] }
 0x3ce   :  { %1674 = vmatprep.subr.bf16.mxu0 %v1542_v5  ;;  %1756 = vmatprep.subr.bf16.mxu1 %v1544_v0  ;;  %v1598_v5 = vld [vmem:[#allocation2 + $0x728] sm:$0xff]  ;;  %v1600_v0 = vld [vmem:[#allocation2 + $0x738] sm:$0xff] }
 0x3d1   :  { %1675 = vmatpush1.bf16.msra.mxu0 %v1541_v2  ;;  %1757 = vmatpush1.bf16.msra.mxu1 %v1543_v1  ;;  %v1597_v2 = vld [vmem:[#allocation2 + $0x720] sm:$0xff]  ;;  %v1599_v1 = vld [vmem:[#allocation2 + $0x730] sm:$0xff] }
 0x3d2   :  { %1676 = vmatprep.subr.bf16.mxu0 %v1546_v3  ;;  %1758 = vmatprep.subr.bf16.mxu1 %v1548_v55  ;;  %v1602_v3 = vld [vmem:[#allocation2 + $0x748] sm:$0xff]  ;;  %v1604_v55 = vld [vmem:[#allocation2 + $0x758] sm:$0xff] }
 0x3d5   :  { %1677 = vmatpush1.bf16.msra.mxu0 %v1545_v4  ;;  %1759 = vmatpush1.bf16.msra.mxu1 %v1547_v9  ;;  %v1601_v4 = vld [vmem:[#allocation2 + $0x740] sm:$0xff]  ;;  %v1603_v9 = vld [vmem:[#allocation2 + $0x750] sm:$0xff] }
 0x3d6   :  { %1678 = vmatprep.subr.bf16.mxu0 %v1550_v7  ;;  %1760 = vmatprep.subr.bf16.mxu1 %v1552_v10  ;;  %v1606_v7 = vld [vmem:[#allocation2 + $0x768] sm:$0xff]  ;;  %v1608_v10 = vld [vmem:[#allocation2 + $0x778] sm:$0xff] }
 0x3d9   :  { %1679 = vmatpush1.bf16.msra.mxu0 %v1549_v13  ;;  %1761 = vmatpush1.bf16.msra.mxu1 %v1551_v17  ;;  %v1605_v13 = vld [vmem:[#allocation2 + $0x760] sm:$0xff]  ;;  %v1607_v17 = vld [vmem:[#allocation2 + $0x770] sm:$0xff] }
 0x3da   :  { %1680 = vmatprep.subr.bf16.mxu0 %v1554_v18  ;;  %1762 = vmatprep.subr.bf16.mxu1 %v1556_v42  ;;  %v1610_v18 = vld [vmem:[#allocation2 + $0x788] sm:$0xff]  ;;  %v1612_v42 = vld [vmem:[#allocation2 + $0x798] sm:$0xff] }
 0x3dd   :  { %1681 = vmatpush1.bf16.msra.mxu0 %v1553_v44  ;;  %1763 = vmatpush1.bf16.msra.mxu1 %v1555_v19  ;;  %v1609_v44 = vld [vmem:[#allocation2 + $0x780] sm:$0xff]  ;;  %v1611_v19 = vld [vmem:[#allocation2 + $0x790] sm:$0xff] }
 0x3de   :  { %1682 = vmatprep.subr.bf16.mxu0 %v1558_v20  ;;  %1764 = vmatprep.subr.bf16.mxu1 %v1560_v12  ;;  %v1614_v20 = vld [vmem:[#allocation2 + $0x7a8] sm:$0xff]  ;;  %v1616_v12 = vld [vmem:[#allocation2 + $0x7b8] sm:$0xff] }
 0x3e1   :  { %1683 = vmatpush1.bf16.msra.mxu0 %v1557_v14  ;;  %1765 = vmatpush1.bf16.msra.mxu1 %v1559_v61  ;;  %v1613_v14 = vld [vmem:[#allocation2 + $0x7a0] sm:$0xff]  ;;  %v1615_v61 = vld [vmem:[#allocation2 + $0x7b0] sm:$0xff] }
 0x3e2   :  { %1693 = vmatprep.subr.bf16.mxu0 %v1562_v63  ;;  %1775 = vmatprep.subr.bf16.mxu1 %v1564_v21  ;;  %v1618_v63 = vld [vmem:[#allocation2 + $0x7c8] sm:$0xff]  ;;  %v1620_v21 = vld [vmem:[#allocation2 + $0x7d8] sm:$0xff] }
 0x3e4   :  { %1685 = vmatmul.mubr.bf16.vlgmr.msra.gmra.mrb[4].mxu0 %v1627_v22  ;;  %1767 = vmatmul.mubr.bf16.vlgmr.msra.gmra.mrb[12].mxu1 %v1627_v22  ;;  %v1617_v22 = vld [vmem:[#allocation2 + $0x7c0] sm:$0xff] }
 0x3e5   :  { %1694 = vmatpush1.bf16.msra.mxu0 %v1561_v23  ;;  %1776 = vmatpush1.bf16.msra.mxu1 %v1563_v24  ;;  %v1619_v23 = vld [vmem:[#allocation2 + $0x7d0] sm:$0xff]  ;;  %v1622_v24 = vld [vmem:[#allocation2 + $0x7e8] sm:$0xff] }
 0x3e6   :  { %1695 = vmatprep.subr.bf16.mxu0 %v1566_v25  ;;  %1777 = vmatprep.subr.bf16.mxu1 %v1568_v26  ;;  %v1624_v25 = vld [vmem:[#allocation2 + $0x7f8] sm:$0xff]  ;;  %v1621_v26 = vld [vmem:[#allocation2 + $0x7e0] sm:$0xff] }
 0x3e7   :  { %1725 = vmatprep.mubr.bf16.mxu0 %v1630_v27  ;;  %1807 = vmatprep.mubr.bf16.mxu1 %v1630_v27  ;;  %v1623_v27 = vld [vmem:[#allocation2 + $0x7f0] sm:$0xff] }
 0x3e9   :  { %1696 = vmatpush1.bf16.msra.mxu0 %v1565_v29  ;;  %1778 = vmatpush1.bf16.msra.mxu1 %v1567_v32  ;;  %v1629_v29 = vpack.c.bf16 %v4582_v15, %v4582_v15  ;;  %v1626_v32 = vld [vmem:[#allocation10 + $0x6] ss:$8 sm:$0xf] }
 0x3ea   :  { %1697 = vmatprep.subr.bf16.mxu0 %v1570_v11  ;;  %1779 = vmatprep.subr.bf16.mxu1 %v1572_v33  ;;  %v1635_v11 = vrot.slane %v1626_v32, %v4452_v6  ;;  %v1643_v33 = vrot.slane %v1626_v32, %v4480_v56 }
 0x3ed   :  { %1698 = vmatpush1.bf16.msra.mxu0 %v1569_v34  ;;  %1780 = vmatpush1.bf16.msra.mxu1 %v1571_v35  ;;  %v1639_v34 = vrot.slane %v1626_v32, %v4455_v8  ;;  %v1647_v35 = vrot.slane %v1626_v32, %v4483_v57 }
 0x3ee   :  { %1699 = vmatprep.subr.bf16.mxu0 %v1574_v36  ;;  %1781 = vmatprep.subr.bf16.mxu1 %v1576_v16 }
 0x3f1   :  { %1700 = vmatpush1.bf16.msra.mxu0 %v1573_v37  ;;  %1782 = vmatpush1.bf16.msra.mxu1 %v1575_v38 }
 0x3f2   :  { %1701 = vmatprep.subr.bf16.mxu0 %v1578_v39  ;;  %1783 = vmatprep.subr.bf16.mxu1 %v1580_v40 }
 0x3f5   :  { %1702 = vmatpush1.bf16.msra.mxu0 %v1577_v41  ;;  %1784 = vmatpush1.bf16.msra.mxu1 %v1579_v43 }
 0x3f6   :  { %1703 = vmatprep.subr.bf16.mxu0 %v1582_v45  ;;  %1785 = vmatprep.subr.bf16.mxu1 %v1584_v46 }
 0x3f9   :  { %1704 = vmatpush1.bf16.msra.mxu0 %v1581_v47  ;;  %1786 = vmatpush1.bf16.msra.mxu1 %v1583_v48 }
 0x3fa   :  { %1705 = vmatprep.subr.bf16.mxu0 %v1586_v50  ;;  %1787 = vmatprep.subr.bf16.mxu1 %v1588_v51 }
 0x3fd   :  { %1706 = vmatpush1.bf16.msra.mxu0 %v1585_v52  ;;  %1788 = vmatpush1.bf16.msra.mxu1 %v1587_v53 }
 0x3fe   :  { %1707 = vmatprep.subr.bf16.mxu0 %v1590_v28  ;;  %1789 = vmatprep.subr.bf16.mxu1 %v1592_v54 }
 0x401   :  { %1708 = vmatpush1.bf16.msra.mxu0 %v1589_v58  ;;  %1790 = vmatpush1.bf16.msra.mxu1 %v1591_v59 }
 0x402   :  { %1709 = vmatprep.subr.bf16.mxu0 %v1594_v60  ;;  %1791 = vmatprep.subr.bf16.mxu1 %v1596_v31 }
 0x405   :  { %1710 = vmatpush1.bf16.msra.mxu0 %v1593_v30  ;;  %1792 = vmatpush1.bf16.msra.mxu1 %v1595_v62 }
 0x406   :  { %1711 = vmatprep.subr.bf16.mxu0 %v1598_v5  ;;  %1793 = vmatprep.subr.bf16.mxu1 %v1600_v0 }
 0x409   :  { %1712 = vmatpush1.bf16.msra.mxu0 %v1597_v2  ;;  %1794 = vmatpush1.bf16.msra.mxu1 %v1599_v1 }
 0x40a   :  { %1713 = vmatprep.subr.bf16.mxu0 %v1602_v3  ;;  %1795 = vmatprep.subr.bf16.mxu1 %v1604_v55 }
 0x40d   :  { %1714 = vmatpush1.bf16.msra.mxu0 %v1601_v4  ;;  %1796 = vmatpush1.bf16.msra.mxu1 %v1603_v9 }
 0x40e   :  { %1715 = vmatprep.subr.bf16.mxu0 %v1606_v7  ;;  %1797 = vmatprep.subr.bf16.mxu1 %v1608_v10 }
 0x411   :  { %1716 = vmatpush1.bf16.msra.mxu0 %v1605_v13  ;;  %1798 = vmatpush1.bf16.msra.mxu1 %v1607_v17 }
 0x412   :  { %1717 = vmatprep.subr.bf16.mxu0 %v1610_v18  ;;  %1799 = vmatprep.subr.bf16.mxu1 %v1612_v42 }
 0x415   :  { %1718 = vmatpush1.bf16.msra.mxu0 %v1609_v44  ;;  %1800 = vmatpush1.bf16.msra.mxu1 %v1611_v19 }
 0x416   :  { %1719 = vmatprep.subr.bf16.mxu0 %v1614_v20  ;;  %1801 = vmatprep.subr.bf16.mxu1 %v1616_v12 }
 0x419   :  { %1720 = vmatpush1.bf16.msra.mxu0 %v1613_v14  ;;  %1802 = vmatpush1.bf16.msra.mxu1 %v1615_v61 }
 0x41a   :  { %1721 = vmatprep.subr.bf16.mxu0 %v1618_v63  ;;  %1803 = vmatprep.subr.bf16.mxu1 %v1620_v21 }
 0x41d   :  { %1722 = vmatpush1.bf16.msra.mxu0 %v1617_v22  ;;  %1804 = vmatpush1.bf16.msra.mxu1 %v1619_v23 }
 0x41e   :  { %1723 = vmatprep.subr.bf16.mxu0 %v1622_v24  ;;  %1805 = vmatprep.subr.bf16.mxu1 %v1624_v25 }
 0x421   :  { %1724 = vmatpush1.bf16.msra.mxu0 %v1621_v26  ;;  %1806 = vmatpush1.bf16.msra.mxu1 %v1623_v27 }
 0x424   :  { %1726 = vmatmul.mubr.bf16.vlgmr.msra.gmra.mrb[4].mxu0 %v1629_v29  ;;  %1808 = vmatmul.mubr.bf16.vlgmr.msra.gmra.mrb[12].mxu1 %v1629_v29 }
 0x4f7   :  { %v1727_v36 = vpop.f32.mrb[4].mxu0  ;;  %v1809_v16 = vpop.f32.mrb[12].mxu1 }
 0x4f8   :  { %v4596_v37 = vadd.f32 %v1727_v36, %v1635_v11  ;;  %v4598_v38 = vadd.f32 %v1809_v16, %v1643_v33  ;;  %v1729_v15 = vpop.f32.mrb[5].mxu0  ;;  %v1811_v39 = vpop.f32.mrb[13].mxu1 }
 0x4f9   :  { %v4600_v40 = vadd.f32 %v1729_v15, %v1639_v34  ;;  %v4602_v41 = vadd.f32 %v1811_v39, %v1647_v35  ;;  %v1731_v43 = vpop.f32.mrb[6].mxu0  ;;  %v1813_v45 = vpop.f32.mrb[14].mxu1 }
 0x4fa   :  { %v1820_v46 = vrot.slane %v4596_v37, 4  ;;  %v1844_v47 = vmul.f32 %v4596_v37, %v4596_v37  ;;  %v1832_v48 = vrot.slane %v4598_v38, 4  ;;  %v1846_v50 = vmul.f32 %v4598_v38, %v4598_v38  ;;  %v1732_v51 = vpop.f32.mrb[7].mxu0  ;;  %v1814_v52 = vpop.f32.mrb[15].mxu1 }
 0x4fb   :  { %v1826_v53 = vrot.slane %v4600_v40, 4  ;;  %v1845_v28 = vmul.f32 %v4600_v40, %v4600_v40  ;;  %v1838_v54 = vrot.slane %v4602_v41, 4  ;;  %v1847_v58 = vmul.f32 %v4602_v41, %v4602_v41 }
 0x4fc   :  { %v1821_v59 = vadd.f32 %v4596_v37, %v1820_v46  ;;  %v1848_v60 = vrot.slane %v1844_v47, 4  ;;  %v1833_v31 = vadd.f32 %v4598_v38, %v1832_v48  ;;  %v1860_v30 = vrot.slane %v1846_v50, 4 }
 0x4fd   :  { %v1827_v62 = vadd.f32 %v4600_v40, %v1826_v53  ;;  %v1854_v5 = vrot.slane %v1845_v28, 4  ;;  %v1839_v0 = vadd.f32 %v4602_v41, %v1838_v54  ;;  %v1866_v2 = vrot.slane %v1847_v58, 4 }
 0x4fe   :  { %v1822_v1 = vrot.slane %v1821_v59, 2  ;;  %v1849_v3 = vadd.f32 %v1848_v60, %v1844_v47  ;;  %v1834_v55 = vrot.slane %v1833_v31, 2  ;;  %v1861_v4 = vadd.f32 %v1860_v30, %v1846_v50 }
 0x4ff   :  { %v1828_v9 = vrot.slane %v1827_v62, 2  ;;  %v1855_v7 = vadd.f32 %v1854_v5, %v1845_v28  ;;  %v1840_v10 = vrot.slane %v1839_v0, 2  ;;  %v1867_v13 = vadd.f32 %v1866_v2, %v1847_v58 }
 0x500   :  { %v1823_v17 = vadd.f32 %v1822_v1, %v1821_v59  ;;  %v1850_v18 = vrot.slane %v1849_v3, 2  ;;  %v1835_v42 = vadd.f32 %v1834_v55, %v1833_v31  ;;  %v1862_v44 = vrot.slane %v1861_v4, 2 }
 0x501   :  { %v1829_v19 = vadd.f32 %v1828_v9, %v1827_v62  ;;  %v1856_v20 = vrot.slane %v1855_v7, 2  ;;  %v1841_v12 = vadd.f32 %v1840_v10, %v1839_v0  ;;  %v1868_v14 = vrot.slane %v1867_v13, 2 }
 0x502   :  { %v1824_v61 = vrot.slane %v1823_v17, 1  ;;  %v1851_v63 = vadd.f32 %v1850_v18, %v1849_v3  ;;  %v1836_v21 = vrot.slane %v1835_v42, 1  ;;  %v1863_v22 = vadd.f32 %v1862_v44, %v1861_v4 }
 0x503   :  { %v1830_v23 = vrot.slane %v1829_v19, 1  ;;  %v1857_v24 = vadd.f32 %v1856_v20, %v1855_v7  ;;  %v1842_v25 = vrot.slane %v1841_v12, 1  ;;  %v1869_v26 = vadd.f32 %v1868_v14, %v1867_v13 }
 0x504   :  { %v1825_v27 = vadd.f32 %v1824_v61, %v1823_v17  ;;  %v1852_v29 = vrot.slane %v1851_v63, 1  ;;  %v1837_v32 = vadd.f32 %v1836_v21, %v1835_v42  ;;  %v1864_v11 = vrot.slane %v1863_v22, 1  ;;  %v1817_v42 = vld [vmem:[#allocation10 + $0x7] ss:$8 sm:$0xf] }
 0x505   :  { %v1831_v33 = vadd.f32 %v1830_v23, %v1829_v19  ;;  %v1858_v34 = vrot.slane %v1857_v24, 1  ;;  %v1843_v35 = vadd.f32 %v1842_v25, %v1841_v12  ;;  %v1870_v36 = vrot.slane %v1869_v26, 1 }
 0x506   :  { %v1853_v16 = vadd.f32 %v1852_v29, %v1851_v63  ;;  %v1872_v15 = vmul.f32 0.125, %v1825_v27  ;;  %v1865_v39 = vadd.f32 %v1864_v11, %v1863_v22  ;;  %v1874_v43 = vmul.f32 0.125, %v1837_v32 }
 0x507   :  { %v1859_v45 = vadd.f32 %v1858_v34, %v1857_v24  ;;  %v1873_v46 = vmul.f32 0.125, %v1831_v33  ;;  %v1871_v47 = vadd.f32 %v1870_v36, %v1869_v26  ;;  %v1875_v48 = vmul.f32 0.125, %v1843_v35  ;;  %v1819_v35 = vld [vmem:[#allocation10 + $0x20] ss:$8 sm:$0xf] }
 0x508   :  { %v1876_v50 = vmul.f32 0.125, %v1853_v16  ;;  %v1880_v51 = vmul.f32 %v1872_v15, %v1872_v15  ;;  %v1878_v52 = vmul.f32 0.125, %v1865_v39  ;;  %v1882_v53 = vmul.f32 %v1874_v43, %v1874_v43 }
 0x509   :  { %v1877_v28 = vmul.f32 0.125, %v1859_v45  ;;  %v1881_v54 = vmul.f32 %v1873_v46, %v1873_v46  ;;  %v1879_v58 = vmul.f32 0.125, %v1871_v47  ;;  %v1883_v59 = vmul.f32 %v1875_v48, %v1875_v48 }
 0x50a   :  { %v1884_v60 = vsub.f32 %v1876_v50, %v1880_v51  ;;  %v1886_v31 = vsub.f32 %v1878_v52, %v1882_v53 }
 0x50b   :  { %v1885_v30 = vsub.f32 %v1877_v28, %v1881_v54  ;;  %v1887_v62 = vsub.f32 %v1879_v58, %v1883_v59 }
 0x50c   :  { %v1888_v5 = vadd.f32 1e-05, %v1884_v60  ;;  %v1890_v0 = vadd.f32 1e-05, %v1886_v31 }
 0x50d   :  { %v1889_v2 = vadd.f32 1e-05, %v1885_v30  ;;  %v1891_v1 = vadd.f32 1e-05, %v1887_v62 }
 0x50e   :  { %4099 = vrsqrt.f32 %v1888_v5 }
 0x50f   :  { %4101 = vrsqrt.f32 %v1890_v0 }
 0x510   :  { %4103 = vrsqrt.f32 %v1889_v2 }
 0x511   :  { %4105 = vrsqrt.f32 %v1891_v1 }
 0x518   :  { %v4100_v3 = vpop.eup %4099 }
 0x519   :  { %v4102_v55 = vpop.eup %4101 }
 0x51a   :  { %v4104_v4 = vpop.eup %4103 }
 0x51b   :  { %v4106_v9 = vpop.eup %4105  ;;  %v1900_v7 = vcombine.low %v4100_v3, %v4104_v4 }
 0x51c   :  { %v1901_v10 = vcombine.low %v4102_v55, %v4106_v9 }
 0x51d   :  { %v1908_v13 = vrot.slane %v1900_v7, %v4500_v49 }
 0x51e   :  { %v1915_v17 = vrot.slane %v1901_v10, %v4500_v49 }
 0x520   :  { %v1916_v18 = vcombine.low %v1908_v13, %v1915_v17 }
 0x522   :  { %v1923_v44 = vrot.slane %v1916_v18, %v4500_v49 }
 0x524   :  { %v1925_v19 = vmul.f32 %v1923_v44, %v1817_v42 }
 0x526   :  { %v1930_v20 = vrot.slane %v1925_v19, %v4452_v6  ;;  %v1934_v12 = vrot.slane %v1925_v19, %v4455_v8  ;;  %v1938_v14 = vrot.slane %v1925_v19, %v4480_v56  ;;  %v1942_v61 = vrot.slane %v1925_v19, %v4483_v57 }
 0x528   :  { %v1947_v63 = vmul.f32 %v1930_v20, %v1872_v15  ;;  %v1948_v21 = vmul.f32 %v1934_v12, %v1873_v46  ;;  %v1949_v22 = vmul.f32 %v1938_v14, %v1874_v43  ;;  %v1950_v23 = vmul.f32 %v1942_v61, %v1875_v48 }
 0x529   :  { %v1981_v24 = vmul.f32 %v4596_v37, %v1930_v20  ;;  %v1982_v25 = vmul.f32 %v4600_v40, %v1934_v12  ;;  %v1983_v26 = vmul.f32 %v4598_v38, %v1938_v14  ;;  %v1984_v27 = vmul.f32 %v4602_v41, %v1942_v61 }
 0x52a   :  { %v1955_v29 = vcombine.low %v1947_v63, %v1948_v21  ;;  %v1956_v32 = vcombine.low %v1949_v22, %v1950_v23 }
 0x52c   :  { %v1963_v11 = vrot.slane %v1955_v29, %v4500_v49  ;;  %v1970_v33 = vrot.slane %v1956_v32, %v4500_v49 }
 0x52e   :  { %v1971_v34 = vcombine.low %v1963_v11, %v1970_v33 }
 0x530   :  { %v1978_v36 = vrot.slane %v1971_v34, %v4500_v49 }
 0x532   :  { %v1980_v16 = vsub.f32 %v1819_v35, %v1978_v36 }
 0x534   :  { %v1989_v15 = vrot.slane %v1980_v16, %v4452_v6  ;;  %v1993_v37 = vrot.slane %v1980_v16, %v4455_v8  ;;  %v1997_v40 = vrot.slane %v1980_v16, %v4480_v56  ;;  %v2001_v38 = vrot.slane %v1980_v16, %v4483_v57 }
 0x536   :  { %v2006_v41 = vadd.f32 %v1989_v15, %v1981_v24  ;;  %v2007_v39 = vadd.f32 %v1993_v37, %v1982_v25  ;;  %v2008_v43 = vadd.f32 %v1997_v40, %v1983_v26  ;;  %v2009_v45 = vadd.f32 %v2001_v38, %v1984_v27 }
 0x538   :  { %v2010_v46 = vmul.f32 0.01, %v2006_v41  ;;  %v2011_v47 = vmul.f32 0.01, %v2007_v39  ;;  %v2012_v48 = vmul.f32 0.01, %v2008_v43 }
 0x539   :  { %v2013_v50 = vmul.f32 0.01, %v2009_v45 }
 0x53a   :  { %v4638_v51 = vmax.f32 %v2006_v41, %v2010_v46  ;;  %v2015_v52 = vmax.f32 %v2007_v39, %v2011_v47  ;;  %v4640_v53 = vmax.f32 %v2008_v43, %v2012_v48 }
 0x53b   :  { %v2017_v28 = vmax.f32 %v2009_v45, %v2013_v50 }
 0x53c   :  { %4235 = dma.done.wait [#allocation6 + $0x2], 4096 }
 0x53d   :  { %4236 = vsyncadd [#allocation6 + $0x2], 4294963200  ;;  %v2055_v54 = vpack.c.bf16 %v2015_v52, %v2015_v52  ;;  %v2057_v58 = vpack.c.bf16 %v2017_v28, %v2017_v28  ;;  %v2029_v59 = vld [vmem:[#allocation3 + $0x40] sm:$0xff]  ;;  %v2030_v62 = vld [vmem:[#allocation3 + $0x48] sm:$0xff]  ;;  %v2054_v27 = vpack.c.bf16 %v4638_v51, %v4638_v51  ;;  %v2056_v29 = vpack.c.bf16 %v4640_v53, %v4640_v53 }
 0x53e   :  { %v2045_v60 = vld [vmem:[#allocation3 + $0xc0] sm:$0xff]  ;;  %3857 = vmatprep.subr.bf16.mxu0 %v2029_v59  ;;  %v2046_v5 = vld [vmem:[#allocation3 + $0xc8] sm:$0xff]  ;;  %v2031_v1 = vld [vmem:[#allocation3 + $0x50] sm:$0xff] }
 0x53f   :  { %2090 = vmatprep.mubr.bf16.mxu0 %v2055_v54  ;;  %2130 = vmatprep.mubr.bf16.mxu1 %v2057_v58  ;;  %v2021_v31 = vld [vmem:[#allocation3] sm:$0xff]  ;;  %v2022_v0 = vld [vmem:[#allocation3 + $0x8] sm:$0xff]  ;;  %v2047_v3 = vld [vmem:[#allocation3 + $0xd0] sm:$0xff] }
 0x540   :  { %3879 = vmatprep.subr.bf16.mxu1 %v2045_v60  ;;  %v2037_v30 = vld [vmem:[#allocation3 + $0x80] sm:$0xff]  ;;  %3858 = vmatpush3.bf16.msra.mxu0 %v2021_v31  ;;  %v2038_v2 = vld [vmem:[#allocation3 + $0x88] sm:$0xff]  ;;  %v2023_v55 = vld [vmem:[#allocation3 + $0x10] sm:$0xff] }
 0x541   :  { %3880 = vmatpush3.bf16.msra.mxu1 %v2037_v30  ;;  %3859 = vmatprep.subr.bf16.mxu0 %v2030_v62  ;;  %v2039_v4 = vld [vmem:[#allocation3 + $0x90] sm:$0xff]  ;;  %v2032_v9 = vld [vmem:[#allocation3 + $0x58] sm:$0xff]  ;;  %v2033_v17 = vld [vmem:[#allocation3 + $0x60] sm:$0xff] }
 0x542   :  { %3881 = vmatprep.subr.bf16.mxu1 %v2046_v5  ;;  %v2048_v7 = vld [vmem:[#allocation3 + $0xd8] sm:$0xff]  ;;  %v2049_v18 = vld [vmem:[#allocation3 + $0xe0] sm:$0xff]  ;;  %v2034_v19 = vld [vmem:[#allocation3 + $0x68] sm:$0xff] }
 0x543   :  { %v2024_v10 = vld [vmem:[#allocation3 + $0x18] sm:$0xff]  ;;  %v2025_v42 = vld [vmem:[#allocation3 + $0x20] sm:$0xff]  ;;  %v2050_v20 = vld [vmem:[#allocation3 + $0xe8] sm:$0xff] }
 0x544   :  { %3860 = vmatpush3.bf16.msra.mxu0 %v2022_v0  ;;  %v2040_v13 = vld [vmem:[#allocation3 + $0x98] sm:$0xff]  ;;  %v2041_v44 = vld [vmem:[#allocation3 + $0xa0] sm:$0xff]  ;;  %v2026_v12 = vld [vmem:[#allocation3 + $0x28] sm:$0xff] }
 0x545   :  { %3882 = vmatpush3.bf16.msra.mxu1 %v2038_v2  ;;  %3861 = vmatprep.subr.bf16.mxu0 %v2031_v1  ;;  %v2042_v14 = vld [vmem:[#allocation3 + $0xa8] sm:$0xff]  ;;  %v2035_v61 = vld [vmem:[#allocation3 + $0x70] sm:$0xff]  ;;  %v2036_v23 = vld [vmem:[#allocation3 + $0x78] sm:$0xff] }
 0x546   :  { %3883 = vmatprep.subr.bf16.mxu1 %v2047_v3  ;;  %v2051_v63 = vld [vmem:[#allocation3 + $0xf0] sm:$0xff]  ;;  %v2052_v24 = vld [vmem:[#allocation3 + $0xf8] sm:$0xff]  ;;  %v2053_v33 = vld [vmem:[#allocation10 + $0x21] ss:$0 sm:$0xff] }
 0x547   :  { %v2027_v21 = vld [vmem:[#allocation3 + $0x30] sm:$0xff]  ;;  %v2028_v25 = vld [vmem:[#allocation3 + $0x38] sm:$0xff] }
 0x548   :  { %3862 = vmatpush3.bf16.msra.mxu0 %v2023_v55  ;;  %v2043_v22 = vld [vmem:[#allocation3 + $0xb0] sm:$0xff]  ;;  %v2044_v26 = vld [vmem:[#allocation3 + $0xb8] sm:$0xff] }
 0x549   :  { %3884 = vmatpush3.bf16.msra.mxu1 %v2039_v4  ;;  %3863 = vmatprep.subr.bf16.mxu0 %v2032_v9 }
 0x54a   :  { %3885 = vmatprep.subr.bf16.mxu1 %v2048_v7 }
 0x54c   :  { %3864 = vmatpush3.bf16.msra.mxu0 %v2024_v10 }
 0x54d   :  { %3886 = vmatpush3.bf16.msra.mxu1 %v2040_v13  ;;  %3865 = vmatprep.subr.bf16.mxu0 %v2033_v17 }
 0x54e   :  { %3887 = vmatprep.subr.bf16.mxu1 %v2049_v18 }
 0x550   :  { %3866 = vmatpush3.bf16.msra.mxu0 %v2025_v42 }
 0x551   :  { %3888 = vmatpush3.bf16.msra.mxu1 %v2041_v44  ;;  %3867 = vmatprep.subr.bf16.mxu0 %v2034_v19 }
 0x552   :  { %3889 = vmatprep.subr.bf16.mxu1 %v2050_v20 }
 0x554   :  { %3868 = vmatpush3.bf16.msra.mxu0 %v2026_v12 }
 0x555   :  { %3890 = vmatpush3.bf16.msra.mxu1 %v2042_v14  ;;  %3869 = vmatprep.subr.bf16.mxu0 %v2035_v61 }
 0x556   :  { %3891 = vmatprep.subr.bf16.mxu1 %v2051_v63 }
 0x558   :  { %3870 = vmatpush3.bf16.msra.mxu0 %v2027_v21 }
 0x559   :  { %3892 = vmatpush3.bf16.msra.mxu1 %v2043_v22  ;;  %3871 = vmatprep.subr.bf16.mxu0 %v2036_v23 }
 0x55a   :  { %3893 = vmatprep.subr.bf16.mxu1 %v2052_v24 }
 0x55c   :  { %3872 = vmatpush3.bf16.msra.mxu0 %v2028_v25 }
 0x55d   :  { %3894 = vmatpush3.bf16.msra.mxu1 %v2044_v26 }
 0x55f   :  { %2091 = vmatmul.mubr.bf16.vlgmr.msra.gmra.mrb[8].mxu0 %v2054_v27 }
 0x560   :  { %2131 = vmatmul.mubr.bf16.vlgmr.msra.gmra.mrb[16].mxu1 %v2056_v29 }
 0x632   :  { %v3873_v32 = vpop.f32.mrb[8].mxu0 }
 0x633   :  { %v3895_v11 = vpop.f32.mrb[16].mxu1  ;;  %v3874_v34 = vpop.f32.mrb[9].mxu0 }
 0x634   :  { %v3896_v35 = vpop.f32.mrb[17].mxu1  ;;  %v3875_v36 = vadd.f32 %v3874_v34, %v3873_v32  ;;  %v3876_v15 = vpop.f32.mrb[10].mxu0 }
 0x635   :  { %v3897_v16 = vadd.f32 %v3896_v35, %v3895_v11  ;;  %v3898_v37 = vpop.f32.mrb[18].mxu1  ;;  %v3877_v40 = vpop.f32.mrb[11].mxu0 }
 0x636   :  { %v3899_v38 = vpop.f32.mrb[19].mxu1  ;;  %v2093_v41 = vadd.f32 %v3875_v36, %v2053_v33 }
 0x638   :  { %v4646_v39 = vadd.f32 %v3897_v16, %v2093_v41 }
 0x639   :  { %4237 = dma.done.wait [#allocation6 + $0x3], 4096 }
 0x63a   :  { %4238 = vsyncadd [#allocation6 + $0x3], 4294963200  ;;  %v4277_v43 = vmov 0   ;;  %v2143_v45 = vld [vmem:[#allocation4 + $0x8] sm:$0xff]  ;;  %v2145_v46 = vld [vmem:[#allocation4 + $0x18] sm:$0xff]  ;;  %v2176_v20 = vpack.c.bf16 %v4646_v39, %v4646_v39 }
 0x63b   :  { %2230 = vmatprep.mubr.bf16.mxu0 %v4277_v43  ;;  %2271 = vmatprep.mubr.bf16.mxu1 %v4277_v43  ;;  %v2142_v47 = vld [vmem:[#allocation4] sm:$0xff]  ;;  %v2144_v48 = vld [vmem:[#allocation4 + $0x10] sm:$0xff]  ;;  %v2147_v50 = vld [vmem:[#allocation4 + $0x28] sm:$0xff] }
 0x63c   :  { %2198 = vmatprep.subr.bf16.mxu0 %v2143_v45  ;;  %2239 = vmatprep.subr.bf16.mxu1 %v2145_v46  ;;  %v2149_v51 = vld [vmem:[#allocation4 + $0x38] sm:$0xff]  ;;  %v2146_v52 = vld [vmem:[#allocation4 + $0x20] sm:$0xff]  ;;  %v2148_v53 = vld [vmem:[#allocation4 + $0x30] sm:$0xff] }
 0x63d   :  { %2199 = vmatpush1.bf16.msra.mxu0 %v2142_v47  ;;  %2240 = vmatpush1.bf16.msra.mxu1 %v2144_v48  ;;  %v2151_v28 = vld [vmem:[#allocation4 + $0x48] sm:$0xff]  ;;  %v2153_v54 = vld [vmem:[#allocation4 + $0x58] sm:$0xff]  ;;  %v2150_v58 = vld [vmem:[#allocation4 + $0x40] sm:$0xff] }
 0x63e   :  { %2200 = vmatprep.subr.bf16.mxu0 %v2147_v50  ;;  %2241 = vmatprep.subr.bf16.mxu1 %v2149_v51  ;;  %v2152_v59 = vld [vmem:[#allocation4 + $0x50] sm:$0xff]  ;;  %v2155_v60 = vld [vmem:[#allocation4 + $0x68] sm:$0xff]  ;;  %v2157_v31 = vld [vmem:[#allocation4 + $0x78] sm:$0xff] }
 0x63f   :  { %v2154_v30 = vld [vmem:[#allocation4 + $0x60] sm:$0xff]  ;;  %v2156_v62 = vld [vmem:[#allocation4 + $0x70] sm:$0xff]  ;;  %v2159_v5 = vld [vmem:[#allocation4 + $0x88] sm:$0xff] }
 0x640   :  { %v2161_v0 = vld [vmem:[#allocation4 + $0x98] sm:$0xff]  ;;  %v2158_v2 = vld [vmem:[#allocation4 + $0x80] sm:$0xff]  ;;  %v2160_v1 = vld [vmem:[#allocation4 + $0x90] sm:$0xff] }
 0x641   :  { %2201 = vmatpush1.bf16.msra.mxu0 %v2146_v52  ;;  %2242 = vmatpush1.bf16.msra.mxu1 %v2148_v53  ;;  %v2163_v3 = vld [vmem:[#allocation4 + $0xa8] sm:$0xff]  ;;  %v2165_v55 = vld [vmem:[#allocation4 + $0xb8] sm:$0xff]  ;;  %v2162_v4 = vld [vmem:[#allocation4 + $0xa0] sm:$0xff] }
 0x642   :  { %2202 = vmatprep.subr.bf16.mxu0 %v2151_v28  ;;  %2243 = vmatprep.subr.bf16.mxu1 %v2153_v54  ;;  %v2164_v9 = vld [vmem:[#allocation4 + $0xb0] sm:$0xff]  ;;  %v2167_v7 = vld [vmem:[#allocation4 + $0xc8] sm:$0xff]  ;;  %v2169_v10 = vld [vmem:[#allocation4 + $0xd8] sm:$0xff] }
 0x643   :  { %v2166_v13 = vld [vmem:[#allocation4 + $0xc0] sm:$0xff]  ;;  %v2168_v17 = vld [vmem:[#allocation4 + $0xd0] sm:$0xff]  ;;  %v2171_v18 = vld [vmem:[#allocation4 + $0xe8] sm:$0xff] }
 0x644   :  { %v2173_v42 = vld [vmem:[#allocation4 + $0xf8] sm:$0xff]  ;;  %v2170_v44 = vld [vmem:[#allocation4 + $0xe0] sm:$0xff]  ;;  %v2172_v19 = vld [vmem:[#allocation4 + $0xf0] sm:$0xff] }
 0x645   :  { %2203 = vmatpush1.bf16.msra.mxu0 %v2150_v58  ;;  %2244 = vmatpush1.bf16.msra.mxu1 %v2152_v59  ;;  %v2175_v12 = vld [vmem:[#allocation10 + $0x22] ss:$8 sm:$0xf] }
 0x646   :  { %2204 = vmatprep.subr.bf16.mxu0 %v2155_v60  ;;  %2245 = vmatprep.subr.bf16.mxu1 %v2157_v31  ;;  %v2181_v14 = vrot.slane %v2175_v12, %v4452_v6  ;;  %v2189_v61 = vrot.slane %v2175_v12, %v4480_v56  ;;  %v2185_v63 = vrot.slane %v2175_v12, %v4455_v8 }
 0x647   :  { %v2193_v21 = vrot.slane %v2175_v12, %v4483_v57 }
 0x649   :  { %2205 = vmatpush1.bf16.msra.mxu0 %v2154_v30  ;;  %2246 = vmatpush1.bf16.msra.mxu1 %v2156_v62 }
 0x64a   :  { %2206 = vmatprep.subr.bf16.mxu0 %v2159_v5  ;;  %2247 = vmatprep.subr.bf16.mxu1 %v2161_v0 }
 0x64d   :  { %2207 = vmatpush1.bf16.msra.mxu0 %v2158_v2  ;;  %2248 = vmatpush1.bf16.msra.mxu1 %v2160_v1 }
 0x64e   :  { %2208 = vmatprep.subr.bf16.mxu0 %v2163_v3  ;;  %2249 = vmatprep.subr.bf16.mxu1 %v2165_v55 }
 0x651   :  { %2209 = vmatpush1.bf16.msra.mxu0 %v2162_v4  ;;  %2250 = vmatpush1.bf16.msra.mxu1 %v2164_v9 }
 0x652   :  { %2210 = vmatprep.subr.bf16.mxu0 %v2167_v7  ;;  %2251 = vmatprep.subr.bf16.mxu1 %v2169_v10 }
 0x655   :  { %2211 = vmatpush1.bf16.msra.mxu0 %v2166_v13  ;;  %2252 = vmatpush1.bf16.msra.mxu1 %v2168_v17 }
 0x656   :  { %2212 = vmatprep.subr.bf16.mxu0 %v2171_v18  ;;  %2253 = vmatprep.subr.bf16.mxu1 %v2173_v42 }
 0x659   :  { %2213 = vmatpush1.bf16.msra.mxu0 %v2170_v44  ;;  %2254 = vmatpush1.bf16.msra.mxu1 %v2172_v19 }
 0x65c   :  { %2231 = vmatmul.mubr.bf16.vlgmr.msra.gmra.mrb[12].mxu0 %v2176_v20  ;;  %2272 = vmatmul.mubr.bf16.vlgmr.msra.gmra.mrb[20].mxu1 %v2176_v20 }
 0x72f   :  { %v2232_v22 = vpop.f32.mrb[12].mxu0  ;;  %v2273_v23 = vpop.f32.mrb[20].mxu1 }
 0x730   :  { %v4654_v24 = vadd.f32 %v2232_v22, %v2181_v14  ;;  %v4656_v25 = vadd.f32 %v2273_v23, %v2189_v61  ;;  %v2234_v26 = vpop.f32.mrb[13].mxu0  ;;  %v2275_v27 = vpop.f32.mrb[21].mxu1 }
 0x731   :  { %v4658_v29 = vadd.f32 %v2234_v26, %v2185_v63  ;;  %v4660_v32 = vadd.f32 %v2275_v27, %v2193_v21  ;;  %v2236_v11 = vpop.f32.mrb[14].mxu0  ;;  %v2277_v33 = vpop.f32.mrb[22].mxu1 }
 0x732   :  { %v2284_v34 = vrot.slane %v4654_v24, 4  ;;  %v2308_v35 = vmul.f32 %v4654_v24, %v4654_v24  ;;  %v2296_v36 = vrot.slane %v4656_v25, 4  ;;  %v2310_v16 = vmul.f32 %v4656_v25, %v4656_v25  ;;  %v2237_v15 = vpop.f32.mrb[15].mxu0  ;;  %v2278_v37 = vpop.f32.mrb[23].mxu1 }
 0x733   :  { %v2290_v40 = vrot.slane %v4658_v29, 4  ;;  %v2309_v38 = vmul.f32 %v4658_v29, %v4658_v29  ;;  %v2302_v41 = vrot.slane %v4660_v32, 4  ;;  %v2311_v39 = vmul.f32 %v4660_v32, %v4660_v32 }
 0x734   :  { %v2285_v43 = vadd.f32 %v2284_v34, %v4654_v24  ;;  %v2312_v45 = vrot.slane %v2308_v35, 4  ;;  %v2297_v46 = vadd.f32 %v2296_v36, %v4656_v25  ;;  %v2324_v47 = vrot.slane %v2310_v16, 4 }
 0x735   :  { %v2291_v48 = vadd.f32 %v2290_v40, %v4658_v29  ;;  %v2318_v50 = vrot.slane %v2309_v38, 4  ;;  %v2303_v51 = vadd.f32 %v2302_v41, %v4660_v32  ;;  %v2330_v52 = vrot.slane %v2311_v39, 4 }
 0x736   :  { %v2286_v53 = vrot.slane %v2285_v43, 2  ;;  %v2313_v28 = vadd.f32 %v2312_v45, %v2308_v35  ;;  %v2298_v54 = vrot.slane %v2297_v46, 2  ;;  %v2325_v58 = vadd.f32 %v2324_v47, %v2310_v16 }
 0x737   :  { %v2292_v59 = vrot.slane %v2291_v48, 2  ;;  %v2319_v60 = vadd.f32 %v2318_v50, %v2309_v38  ;;  %v2304_v31 = vrot.slane %v2303_v51, 2  ;;  %v2331_v30 = vadd.f32 %v2330_v52, %v2311_v39 }
 0x738   :  { %v2287_v62 = vadd.f32 %v2286_v53, %v2285_v43  ;;  %v2314_v5 = vrot.slane %v2313_v28, 2  ;;  %v2299_v0 = vadd.f32 %v2298_v54, %v2297_v46  ;;  %v2326_v2 = vrot.slane %v2325_v58, 2 }
 0x739   :  { %v2293_v1 = vadd.f32 %v2292_v59, %v2291_v48  ;;  %v2320_v3 = vrot.slane %v2319_v60, 2  ;;  %v2305_v55 = vadd.f32 %v2304_v31, %v2303_v51  ;;  %v2332_v4 = vrot.slane %v2331_v30, 2 }
 0x73a   :  { %v2288_v9 = vrot.slane %v2287_v62, 1  ;;  %v2315_v7 = vadd.f32 %v2314_v5, %v2313_v28  ;;  %v2300_v10 = vrot.slane %v2299_v0, 1  ;;  %v2327_v13 = vadd.f32 %v2326_v2, %v2325_v58 }
 0x73b   :  { %v2294_v17 = vrot.slane %v2293_v1, 1  ;;  %v2321_v18 = vadd.f32 %v2320_v3, %v2319_v60  ;;  %v2306_v42 = vrot.slane %v2305_v55, 1  ;;  %v2333_v44 = vadd.f32 %v2332_v4, %v2331_v30 }
 0x73c   :  { %v2289_v19 = vadd.f32 %v2288_v9, %v2287_v62  ;;  %v2316_v20 = vrot.slane %v2315_v7, 1  ;;  %v2301_v12 = vadd.f32 %v2300_v10, %v2299_v0  ;;  %v2328_v14 = vrot.slane %v2327_v13, 1  ;;  %v2281_v0 = vld [vmem:[#allocation10 + $0x23] ss:$8 sm:$0xf] }
 0x73d   :  { %v2295_v61 = vadd.f32 %v2294_v17, %v2293_v1  ;;  %v2322_v63 = vrot.slane %v2321_v18, 1  ;;  %v2307_v21 = vadd.f32 %v2306_v42, %v2305_v55  ;;  %v2334_v22 = vrot.slane %v2333_v44, 1 }
 0x73e   :  { %v2317_v23 = vadd.f32 %v2316_v20, %v2315_v7  ;;  %v2336_v26 = vmul.f32 0.125, %v2289_v19  ;;  %v2329_v27 = vadd.f32 %v2328_v14, %v2327_v13  ;;  %v2338_v11 = vmul.f32 0.125, %v2301_v12 }
 0x73f   :  { %v2323_v33 = vadd.f32 %v2322_v63, %v2321_v18  ;;  %v2337_v34 = vmul.f32 0.125, %v2295_v61  ;;  %v2335_v35 = vadd.f32 %v2334_v22, %v2333_v44  ;;  %v2339_v36 = vmul.f32 0.125, %v2307_v21  ;;  %v2283_v21 = vld [vmem:[#allocation10 + $0x24] ss:$8 sm:$0xf] }
 0x740   :  { %v2340_v16 = vmul.f32 0.125, %v2317_v23  ;;  %v2344_v15 = vmul.f32 %v2336_v26, %v2336_v26  ;;  %v2342_v37 = vmul.f32 0.125, %v2329_v27  ;;  %v2346_v40 = vmul.f32 %v2338_v11, %v2338_v11 }
 0x741   :  { %v2341_v38 = vmul.f32 0.125, %v2323_v33  ;;  %v2345_v41 = vmul.f32 %v2337_v34, %v2337_v34  ;;  %v2343_v39 = vmul.f32 0.125, %v2335_v35  ;;  %v2347_v43 = vmul.f32 %v2339_v36, %v2339_v36 }
 0x742   :  { %v2348_v45 = vsub.f32 %v2340_v16, %v2344_v15  ;;  %v2350_v46 = vsub.f32 %v2342_v37, %v2346_v40 }
 0x743   :  { %v2349_v47 = vsub.f32 %v2341_v38, %v2345_v41  ;;  %v2351_v48 = vsub.f32 %v2343_v39, %v2347_v43 }
 0x744   :  { %v2352_v50 = vadd.f32 1e-05, %v2348_v45  ;;  %v2354_v51 = vadd.f32 1e-05, %v2350_v46 }
 0x745   :  { %v2353_v52 = vadd.f32 1e-05, %v2349_v47  ;;  %v2355_v53 = vadd.f32 1e-05, %v2351_v48 }
 0x746   :  { %4107 = vrsqrt.f32 %v2352_v50 }
 0x747   :  { %4109 = vrsqrt.f32 %v2354_v51 }
 0x748   :  { %4111 = vrsqrt.f32 %v2353_v52 }
 0x749   :  { %4113 = vrsqrt.f32 %v2355_v53 }
 0x750   :  { %v4108_v28 = vpop.eup %4107 }
 0x751   :  { %v4110_v54 = vpop.eup %4109 }
 0x752   :  { %v4112_v58 = vpop.eup %4111 }
 0x753   :  { %v4114_v59 = vpop.eup %4113  ;;  %v2364_v60 = vcombine.low %v4108_v28, %v4112_v58 }
 0x754   :  { %v2365_v31 = vcombine.low %v4110_v54, %v4114_v59 }
 0x755   :  { %v2372_v30 = vrot.slane %v2364_v60, %v4500_v49 }
 0x756   :  { %v2379_v62 = vrot.slane %v2365_v31, %v4500_v49 }
 0x758   :  { %v2380_v5 = vcombine.low %v2372_v30, %v2379_v62 }
 0x75a   :  { %v2387_v2 = vrot.slane %v2380_v5, %v4500_v49 }
 0x75c   :  { %v2389_v1 = vmul.f32 %v2387_v2, %v2281_v0 }
 0x75e   :  { %v2394_v3 = vrot.slane %v2389_v1, %v4452_v6  ;;  %v2398_v55 = vrot.slane %v2389_v1, %v4455_v8  ;;  %v2402_v4 = vrot.slane %v2389_v1, %v4480_v56  ;;  %v2406_v9 = vrot.slane %v2389_v1, %v4483_v57 }
 0x760   :  { %v2411_v7 = vmul.f32 %v2394_v3, %v2336_v26  ;;  %v2412_v10 = vmul.f32 %v2398_v55, %v2337_v34  ;;  %v2413_v13 = vmul.f32 %v2402_v4, %v2338_v11  ;;  %v2414_v17 = vmul.f32 %v2406_v9, %v2339_v36 }
 0x761   :  { %v2445_v18 = vmul.f32 %v2394_v3, %v4654_v24  ;;  %v2446_v42 = vmul.f32 %v2398_v55, %v4658_v29  ;;  %v2447_v44 = vmul.f32 %v2402_v4, %v4656_v25  ;;  %v2448_v19 = vmul.f32 %v2406_v9, %v4660_v32 }
 0x762   :  { %v2419_v20 = vcombine.low %v2411_v7, %v2412_v10  ;;  %v2420_v12 = vcombine.low %v2413_v13, %v2414_v17 }
 0x764   :  { %v2427_v14 = vrot.slane %v2419_v20, %v4500_v49  ;;  %v2434_v61 = vrot.slane %v2420_v12, %v4500_v49 }
 0x766   :  { %v2435_v63 = vcombine.low %v2427_v14, %v2434_v61 }
 0x768   :  { %v2442_v22 = vrot.slane %v2435_v63, %v4500_v49 }
 0x76a   :  { %v2444_v23 = vsub.f32 %v2283_v21, %v2442_v22 }
 0x76c   :  { %v2453_v26 = vrot.slane %v2444_v23, %v4452_v6  ;;  %v2457_v24 = vrot.slane %v2444_v23, %v4455_v8  ;;  %v2461_v29 = vrot.slane %v2444_v23, %v4480_v56  ;;  %v2465_v25 = vrot.slane %v2444_v23, %v4483_v57 }
 0x76e   :  { %v2470_v32 = vadd.f32 %v2453_v26, %v2445_v18  ;;  %v2471_v27 = vadd.f32 %v2457_v24, %v2446_v42  ;;  %v2472_v11 = vadd.f32 %v2461_v29, %v2447_v44  ;;  %v2473_v33 = vadd.f32 %v2465_v25, %v2448_v19 }
 0x770   :  { %v2474_v34 = vmul.f32 0.01, %v2470_v32  ;;  %v2475_v35 = vmul.f32 0.01, %v2471_v27  ;;  %v2476_v36 = vmul.f32 0.01, %v2472_v11 }
 0x771   :  { %v2477_v16 = vmul.f32 0.01, %v2473_v33 }
 0x772   :  { %v4696_v15 = vmax.f32 %v2470_v32, %v2474_v34  ;;  %v2479_v37 = vmax.f32 %v2471_v27, %v2475_v35  ;;  %v4698_v40 = vmax.f32 %v2472_v11, %v2476_v36 }
 0x773   :  { %v4700_v38 = vmax.f32 %v2473_v33, %v2477_v16 }
 0x774   :  { %4239 = dma.done.wait [#allocation6 + $0x4], 16384 }
 0x775   :  { %4240 = vsyncadd [#allocation6 + $0x4], 4294950912  ;;  %v2615_v41 = vpack.c.bf16 %v2479_v37, %v2479_v37  ;;  %v2485_v39 = vld [vmem:[#allocation2 + $0x808] sm:$0xff]  ;;  %v2487_v43 = vld [vmem:[#allocation2 + $0x818] sm:$0xff] }
 0x776   :  { %v2484_v45 = vld [vmem:[#allocation2 + $0x800] sm:$0xff]  ;;  %2639 = vmatprep.subr.bf16.mxu0 %v2485_v39  ;;  %2721 = vmatprep.subr.bf16.mxu1 %v2487_v43  ;;  %v2486_v46 = vld [vmem:[#allocation2 + $0x810] sm:$0xff]  ;;  %v2489_v47 = vld [vmem:[#allocation2 + $0x828] sm:$0xff] }
 0x777   :  { %2671 = vmatprep.mubr.bf16.mxu0 %v2615_v41  ;;  %2753 = vmatprep.mubr.bf16.mxu1 %v2615_v41  ;;  %v2491_v48 = vld [vmem:[#allocation2 + $0x838] sm:$0xff]  ;;  %v2488_v50 = vld [vmem:[#allocation2 + $0x820] sm:$0xff]  ;;  %v2490_v51 = vld [vmem:[#allocation2 + $0x830] sm:$0xff] }
 0x778   :  { %2640 = vmatpush1.bf16.msra.mxu0 %v2484_v45  ;;  %2722 = vmatpush1.bf16.msra.mxu1 %v2486_v46  ;;  %v2493_v52 = vld [vmem:[#allocation2 + $0x848] sm:$0xff]  ;;  %v2495_v53 = vld [vmem:[#allocation2 + $0x858] sm:$0xff]  ;;  %v2492_v28 = vld [vmem:[#allocation2 + $0x840] sm:$0xff] }
 0x779   :  { %2641 = vmatprep.subr.bf16.mxu0 %v2489_v47  ;;  %2723 = vmatprep.subr.bf16.mxu1 %v2491_v48  ;;  %v2494_v54 = vld [vmem:[#allocation2 + $0x850] sm:$0xff]  ;;  %v2497_v58 = vld [vmem:[#allocation2 + $0x868] sm:$0xff]  ;;  %v2499_v59 = vld [vmem:[#allocation2 + $0x878] sm:$0xff] }
 0x77a   :  { %v2496_v60 = vld [vmem:[#allocation2 + $0x860] sm:$0xff]  ;;  %v2498_v31 = vld [vmem:[#allocation2 + $0x870] sm:$0xff]  ;;  %v2501_v30 = vld [vmem:[#allocation2 + $0x888] sm:$0xff] }
 0x77b   :  { %v2503_v62 = vld [vmem:[#allocation2 + $0x898] sm:$0xff]  ;;  %v2500_v5 = vld [vmem:[#allocation2 + $0x880] sm:$0xff]  ;;  %v2502_v0 = vld [vmem:[#allocation2 + $0x890] sm:$0xff] }
 0x77c   :  { %2642 = vmatpush1.bf16.msra.mxu0 %v2488_v50  ;;  %2724 = vmatpush1.bf16.msra.mxu1 %v2490_v51  ;;  %v2505_v2 = vld [vmem:[#allocation2 + $0x8a8] sm:$0xff]  ;;  %v2507_v1 = vld [vmem:[#allocation2 + $0x8b8] sm:$0xff]  ;;  %v2504_v3 = vld [vmem:[#allocation2 + $0x8a0] sm:$0xff] }
 0x77d   :  { %2643 = vmatprep.subr.bf16.mxu0 %v2493_v52  ;;  %2725 = vmatprep.subr.bf16.mxu1 %v2495_v53  ;;  %v2506_v55 = vld [vmem:[#allocation2 + $0x8b0] sm:$0xff]  ;;  %v2509_v4 = vld [vmem:[#allocation2 + $0x8c8] sm:$0xff]  ;;  %v2511_v9 = vld [vmem:[#allocation2 + $0x8d8] sm:$0xff] }
 0x77e   :  { %v2508_v7 = vld [vmem:[#allocation2 + $0x8c0] sm:$0xff]  ;;  %v2510_v10 = vld [vmem:[#allocation2 + $0x8d0] sm:$0xff]  ;;  %v2513_v13 = vld [vmem:[#allocation2 + $0x8e8] sm:$0xff] }
 0x77f   :  { %v2515_v17 = vld [vmem:[#allocation2 + $0x8f8] sm:$0xff]  ;;  %v2512_v18 = vld [vmem:[#allocation2 + $0x8e0] sm:$0xff]  ;;  %v2514_v42 = vld [vmem:[#allocation2 + $0x8f0] sm:$0xff] }
 0x780   :  { %2644 = vmatpush1.bf16.msra.mxu0 %v2492_v28  ;;  %2726 = vmatpush1.bf16.msra.mxu1 %v2494_v54  ;;  %v2517_v44 = vld [vmem:[#allocation2 + $0x908] sm:$0xff]  ;;  %v2519_v19 = vld [vmem:[#allocation2 + $0x918] sm:$0xff]  ;;  %v2516_v20 = vld [vmem:[#allocation2 + $0x900] sm:$0xff]  ;;  %v2614_v28 = vpack.c.bf16 %v4696_v15, %v4696_v15 }
 0x781   :  { %2645 = vmatprep.subr.bf16.mxu0 %v2497_v58  ;;  %2727 = vmatprep.subr.bf16.mxu1 %v2499_v59  ;;  %v2518_v12 = vld [vmem:[#allocation2 + $0x910] sm:$0xff]  ;;  %v2521_v14 = vld [vmem:[#allocation2 + $0x928] sm:$0xff]  ;;  %v2523_v61 = vld [vmem:[#allocation2 + $0x938] sm:$0xff] }
 0x782   :  { %v2520_v63 = vld [vmem:[#allocation2 + $0x920] sm:$0xff]  ;;  %v2522_v21 = vld [vmem:[#allocation2 + $0x930] sm:$0xff]  ;;  %v2525_v22 = vld [vmem:[#allocation2 + $0x948] sm:$0xff] }
 0x783   :  { %v2527_v23 = vld [vmem:[#allocation2 + $0x958] sm:$0xff]  ;;  %v2524_v26 = vld [vmem:[#allocation2 + $0x940] sm:$0xff]  ;;  %v2526_v24 = vld [vmem:[#allocation2 + $0x950] sm:$0xff] }
 0x784   :  { %2646 = vmatpush1.bf16.msra.mxu0 %v2496_v60  ;;  %2728 = vmatpush1.bf16.msra.mxu1 %v2498_v31  ;;  %v2529_v29 = vld [vmem:[#allocation2 + $0x968] sm:$0xff]  ;;  %v2531_v25 = vld [vmem:[#allocation2 + $0x978] sm:$0xff]  ;;  %v2528_v32 = vld [vmem:[#allocation2 + $0x960] sm:$0xff]  ;;  %v2617_v31 = vpack.c.bf16 %v4700_v38, %v4700_v38 }
 0x785   :  { %2647 = vmatprep.subr.bf16.mxu0 %v2501_v30  ;;  %2729 = vmatprep.subr.bf16.mxu1 %v2503_v62  ;;  %v2530_v27 = vld [vmem:[#allocation2 + $0x970] sm:$0xff]  ;;  %v2533_v11 = vld [vmem:[#allocation2 + $0x988] sm:$0xff]  ;;  %v2535_v33 = vld [vmem:[#allocation2 + $0x998] sm:$0xff] }
 0x786   :  { %v2532_v34 = vld [vmem:[#allocation2 + $0x980] sm:$0xff]  ;;  %v2534_v35 = vld [vmem:[#allocation2 + $0x990] sm:$0xff]  ;;  %v2537_v36 = vld [vmem:[#allocation2 + $0x9a8] sm:$0xff] }
 0x787   :  { %v2539_v16 = vld [vmem:[#allocation2 + $0x9b8] sm:$0xff]  ;;  %v2536_v37 = vld [vmem:[#allocation2 + $0x9a0] sm:$0xff]  ;;  %v2538_v41 = vld [vmem:[#allocation2 + $0x9b0] sm:$0xff] }
 0x788   :  { %2648 = vmatpush1.bf16.msra.mxu0 %v2500_v5  ;;  %2730 = vmatpush1.bf16.msra.mxu1 %v2502_v0  ;;  %v2541_v39 = vld [vmem:[#allocation2 + $0x9c8] sm:$0xff]  ;;  %v2543_v43 = vld [vmem:[#allocation2 + $0x9d8] sm:$0xff]  ;;  %v2540_v45 = vld [vmem:[#allocation2 + $0x9c0] sm:$0xff] }
 0x789   :  { %2649 = vmatprep.subr.bf16.mxu0 %v2505_v2  ;;  %2731 = vmatprep.subr.bf16.mxu1 %v2507_v1  ;;  %v2542_v46 = vld [vmem:[#allocation2 + $0x9d0] sm:$0xff]  ;;  %v2545_v47 = vld [vmem:[#allocation2 + $0x9e8] sm:$0xff]  ;;  %v2547_v48 = vld [vmem:[#allocation2 + $0x9f8] sm:$0xff] }
 0x78a   :  { %v2544_v50 = vld [vmem:[#allocation2 + $0x9e0] sm:$0xff]  ;;  %v2546_v51 = vld [vmem:[#allocation2 + $0x9f0] sm:$0xff]  ;;  %v2549_v52 = vld [vmem:[#allocation2 + $0xa08] sm:$0xff] }
 0x78b   :  { %v2551_v53 = vld [vmem:[#allocation2 + $0xa18] sm:$0xff]  ;;  %v2548_v54 = vld [vmem:[#allocation2 + $0xa00] sm:$0xff]  ;;  %v2550_v58 = vld [vmem:[#allocation2 + $0xa10] sm:$0xff] }
 0x78c   :  { %2650 = vmatpush1.bf16.msra.mxu0 %v2504_v3  ;;  %2732 = vmatpush1.bf16.msra.mxu1 %v2506_v55  ;;  %v2553_v59 = vld [vmem:[#allocation2 + $0xa28] sm:$0xff]  ;;  %v2555_v60 = vld [vmem:[#allocation2 + $0xa38] sm:$0xff]  ;;  %v2552_v30 = vld [vmem:[#allocation2 + $0xa20] sm:$0xff] }
 0x78d   :  { %2651 = vmatprep.subr.bf16.mxu0 %v2509_v4  ;;  %2733 = vmatprep.subr.bf16.mxu1 %v2511_v9  ;;  %v2554_v62 = vld [vmem:[#allocation2 + $0xa30] sm:$0xff]  ;;  %v2557_v15 = vld [vmem:[#allocation2 + $0xa48] sm:$0xff]  ;;  %v2559_v5 = vld [vmem:[#allocation2 + $0xa58] sm:$0xff] }
 0x78e   :  { %v2556_v0 = vld [vmem:[#allocation2 + $0xa40] sm:$0xff]  ;;  %v2558_v2 = vld [vmem:[#allocation2 + $0xa50] sm:$0xff]  ;;  %v2561_v1 = vld [vmem:[#allocation2 + $0xa68] sm:$0xff] }
 0x78f   :  { %v2563_v38 = vld [vmem:[#allocation2 + $0xa78] sm:$0xff]  ;;  %v2560_v3 = vld [vmem:[#allocation2 + $0xa60] sm:$0xff]  ;;  %v2562_v55 = vld [vmem:[#allocation2 + $0xa70] sm:$0xff] }
 0x790   :  { %2652 = vmatpush1.bf16.msra.mxu0 %v2508_v7  ;;  %2734 = vmatpush1.bf16.msra.mxu1 %v2510_v10  ;;  %v2565_v4 = vld [vmem:[#allocation2 + $0xa88] sm:$0xff]  ;;  %v2567_v9 = vld [vmem:[#allocation2 + $0xa98] sm:$0xff]  ;;  %v2564_v7 = vld [vmem:[#allocation2 + $0xa80] sm:$0xff] }
 0x791   :  { %2653 = vmatprep.subr.bf16.mxu0 %v2513_v13  ;;  %2735 = vmatprep.subr.bf16.mxu1 %v2515_v17  ;;  %v2566_v10 = vld [vmem:[#allocation2 + $0xa90] sm:$0xff]  ;;  %v2569_v13 = vld [vmem:[#allocation2 + $0xaa8] sm:$0xff]  ;;  %v2571_v17 = vld [vmem:[#allocation2 + $0xab8] sm:$0xff] }
 0x794   :  { %2654 = vmatpush1.bf16.msra.mxu0 %v2512_v18  ;;  %2736 = vmatpush1.bf16.msra.mxu1 %v2514_v42  ;;  %v2568_v18 = vld [vmem:[#allocation2 + $0xaa0] sm:$0xff]  ;;  %v2570_v42 = vld [vmem:[#allocation2 + $0xab0] sm:$0xff] }
 0x795   :  { %2655 = vmatprep.subr.bf16.mxu0 %v2517_v44  ;;  %2737 = vmatprep.subr.bf16.mxu1 %v2519_v19  ;;  %v2573_v44 = vld [vmem:[#allocation2 + $0xac8] sm:$0xff]  ;;  %v2575_v19 = vld [vmem:[#allocation2 + $0xad8] sm:$0xff] }
 0x798   :  { %2656 = vmatpush1.bf16.msra.mxu0 %v2516_v20  ;;  %2738 = vmatpush1.bf16.msra.mxu1 %v2518_v12  ;;  %v2572_v20 = vld [vmem:[#allocation2 + $0xac0] sm:$0xff]  ;;  %v2574_v12 = vld [vmem:[#allocation2 + $0xad0] sm:$0xff] }
 0x799   :  { %2657 = vmatprep.subr.bf16.mxu0 %v2521_v14  ;;  %2739 = vmatprep.subr.bf16.mxu1 %v2523_v61  ;;  %v2577_v14 = vld [vmem:[#allocation2 + $0xae8] sm:$0xff]  ;;  %v2579_v61 = vld [vmem:[#allocation2 + $0xaf8] sm:$0xff] }
 0x79c   :  { %2658 = vmatpush1.bf16.msra.mxu0 %v2520_v63  ;;  %2740 = vmatpush1.bf16.msra.mxu1 %v2522_v21  ;;  %v2576_v63 = vld [vmem:[#allocation2 + $0xae0] sm:$0xff]  ;;  %v2578_v21 = vld [vmem:[#allocation2 + $0xaf0] sm:$0xff] }
 0x79d   :  { %2659 = vmatprep.subr.bf16.mxu0 %v2525_v22  ;;  %2741 = vmatprep.subr.bf16.mxu1 %v2527_v23  ;;  %v2581_v22 = vld [vmem:[#allocation2 + $0xb08] sm:$0xff]  ;;  %v2583_v23 = vld [vmem:[#allocation2 + $0xb18] sm:$0xff] }
 0x7a0   :  { %2660 = vmatpush1.bf16.msra.mxu0 %v2524_v26  ;;  %2742 = vmatpush1.bf16.msra.mxu1 %v2526_v24  ;;  %v2580_v26 = vld [vmem:[#allocation2 + $0xb00] sm:$0xff]  ;;  %v2582_v24 = vld [vmem:[#allocation2 + $0xb10] sm:$0xff] }
 0x7a1   :  { %2661 = vmatprep.subr.bf16.mxu0 %v2529_v29  ;;  %2743 = vmatprep.subr.bf16.mxu1 %v2531_v25  ;;  %v2585_v29 = vld [vmem:[#allocation2 + $0xb28] sm:$0xff]  ;;  %v2587_v25 = vld [vmem:[#allocation2 + $0xb38] sm:$0xff] }
 0x7a4   :  { %2662 = vmatpush1.bf16.msra.mxu0 %v2528_v32  ;;  %2744 = vmatpush1.bf16.msra.mxu1 %v2530_v27  ;;  %v2584_v32 = vld [vmem:[#allocation2 + $0xb20] sm:$0xff]  ;;  %v2586_v27 = vld [vmem:[#allocation2 + $0xb30] sm:$0xff] }
 0x7a5   :  { %2663 = vmatprep.subr.bf16.mxu0 %v2533_v11  ;;  %2745 = vmatprep.subr.bf16.mxu1 %v2535_v33  ;;  %v2589_v11 = vld [vmem:[#allocation2 + $0xb48] sm:$0xff]  ;;  %v2591_v33 = vld [vmem:[#allocation2 + $0xb58] sm:$0xff] }
 0x7a8   :  { %2664 = vmatpush1.bf16.msra.mxu0 %v2532_v34  ;;  %2746 = vmatpush1.bf16.msra.mxu1 %v2534_v35  ;;  %v2588_v34 = vld [vmem:[#allocation2 + $0xb40] sm:$0xff]  ;;  %v2590_v35 = vld [vmem:[#allocation2 + $0xb50] sm:$0xff] }
 0x7a9   :  { %2665 = vmatprep.subr.bf16.mxu0 %v2537_v36  ;;  %2747 = vmatprep.subr.bf16.mxu1 %v2539_v16  ;;  %v2593_v36 = vld [vmem:[#allocation2 + $0xb68] sm:$0xff]  ;;  %v2595_v16 = vld [vmem:[#allocation2 + $0xb78] sm:$0xff] }
 0x7ac   :  { %2666 = vmatpush1.bf16.msra.mxu0 %v2536_v37  ;;  %2748 = vmatpush1.bf16.msra.mxu1 %v2538_v41  ;;  %v2592_v37 = vld [vmem:[#allocation2 + $0xb60] sm:$0xff]  ;;  %v2594_v41 = vld [vmem:[#allocation2 + $0xb70] sm:$0xff] }
 0x7ad   :  { %2667 = vmatprep.subr.bf16.mxu0 %v2541_v39  ;;  %2749 = vmatprep.subr.bf16.mxu1 %v2543_v43  ;;  %v2597_v39 = vld [vmem:[#allocation2 + $0xb88] sm:$0xff]  ;;  %v2599_v43 = vld [vmem:[#allocation2 + $0xb98] sm:$0xff] }
 0x7b0   :  { %2668 = vmatpush1.bf16.msra.mxu0 %v2540_v45  ;;  %2750 = vmatpush1.bf16.msra.mxu1 %v2542_v46  ;;  %v2596_v45 = vld [vmem:[#allocation2 + $0xb80] sm:$0xff]  ;;  %v2598_v46 = vld [vmem:[#allocation2 + $0xb90] sm:$0xff] }
 0x7b1   :  { %2669 = vmatprep.subr.bf16.mxu0 %v2545_v47  ;;  %2751 = vmatprep.subr.bf16.mxu1 %v2547_v48  ;;  %v2601_v47 = vld [vmem:[#allocation2 + $0xba8] sm:$0xff]  ;;  %v2603_v48 = vld [vmem:[#allocation2 + $0xbb8] sm:$0xff] }
 0x7b4   :  { %2670 = vmatpush1.bf16.msra.mxu0 %v2544_v50  ;;  %2752 = vmatpush1.bf16.msra.mxu1 %v2546_v51  ;;  %v2600_v50 = vld [vmem:[#allocation2 + $0xba0] sm:$0xff]  ;;  %v2602_v51 = vld [vmem:[#allocation2 + $0xbb0] sm:$0xff] }
 0x7b5   :  { %2680 = vmatprep.subr.bf16.mxu0 %v2549_v52  ;;  %2762 = vmatprep.subr.bf16.mxu1 %v2551_v53  ;;  %v2605_v52 = vld [vmem:[#allocation2 + $0xbc8] sm:$0xff]  ;;  %v2607_v53 = vld [vmem:[#allocation2 + $0xbd8] sm:$0xff] }
 0x7b7   :  { %2672 = vmatmul.mubr.bf16.vlgmr.msra.gmra.mrb[16].mxu0 %v2614_v28  ;;  %2754 = vmatmul.mubr.bf16.vlgmr.msra.gmra.mrb[24].mxu1 %v2614_v28  ;;  %v2604_v28 = vld [vmem:[#allocation2 + $0xbc0] sm:$0xff] }
 0x7b8   :  { %2681 = vmatpush1.bf16.msra.mxu0 %v2548_v54  ;;  %2763 = vmatpush1.bf16.msra.mxu1 %v2550_v58  ;;  %v2606_v54 = vld [vmem:[#allocation2 + $0xbd0] sm:$0xff]  ;;  %v2609_v58 = vld [vmem:[#allocation2 + $0xbe8] sm:$0xff] }
 0x7b9   :  { %2682 = vmatprep.subr.bf16.mxu0 %v2553_v59  ;;  %2764 = vmatprep.subr.bf16.mxu1 %v2555_v60  ;;  %v2611_v59 = vld [vmem:[#allocation2 + $0xbf8] sm:$0xff]  ;;  %v2608_v60 = vld [vmem:[#allocation2 + $0xbe0] sm:$0xff] }
 0x7ba   :  { %2712 = vmatprep.mubr.bf16.mxu0 %v2617_v31  ;;  %2794 = vmatprep.mubr.bf16.mxu1 %v2617_v31  ;;  %v2610_v31 = vld [vmem:[#allocation2 + $0xbf0] sm:$0xff] }
 0x7bc   :  { %2683 = vmatpush1.bf16.msra.mxu0 %v2552_v30  ;;  %2765 = vmatpush1.bf16.msra.mxu1 %v2554_v62  ;;  %v2616_v30 = vpack.c.bf16 %v4698_v40, %v4698_v40  ;;  %v2613_v62 = vld [vmem:[#allocation10 + $0x25] ss:$8 sm:$0xf] }
 0x7bd   :  { %2684 = vmatprep.subr.bf16.mxu0 %v2557_v15  ;;  %2766 = vmatprep.subr.bf16.mxu1 %v2559_v5  ;;  %v2622_v15 = vrot.slane %v2613_v62, %v4452_v6  ;;  %v2630_v5 = vrot.slane %v2613_v62, %v4480_v56 }
 0x7c0   :  { %2685 = vmatpush1.bf16.msra.mxu0 %v2556_v0  ;;  %2767 = vmatpush1.bf16.msra.mxu1 %v2558_v2  ;;  %v2626_v0 = vrot.slane %v2613_v62, %v4455_v8  ;;  %v2634_v2 = vrot.slane %v2613_v62, %v4483_v57 }
 0x7c1   :  { %2686 = vmatprep.subr.bf16.mxu0 %v2561_v1  ;;  %2768 = vmatprep.subr.bf16.mxu1 %v2563_v38 }
 0x7c4   :  { %2687 = vmatpush1.bf16.msra.mxu0 %v2560_v3  ;;  %2769 = vmatpush1.bf16.msra.mxu1 %v2562_v55 }
 0x7c5   :  { %2688 = vmatprep.subr.bf16.mxu0 %v2565_v4  ;;  %2770 = vmatprep.subr.bf16.mxu1 %v2567_v9 }
 0x7c8   :  { %2689 = vmatpush1.bf16.msra.mxu0 %v2564_v7  ;;  %2771 = vmatpush1.bf16.msra.mxu1 %v2566_v10 }
 0x7c9   :  { %2690 = vmatprep.subr.bf16.mxu0 %v2569_v13  ;;  %2772 = vmatprep.subr.bf16.mxu1 %v2571_v17 }
 0x7cc   :  { %2691 = vmatpush1.bf16.msra.mxu0 %v2568_v18  ;;  %2773 = vmatpush1.bf16.msra.mxu1 %v2570_v42 }
 0x7cd   :  { %2692 = vmatprep.subr.bf16.mxu0 %v2573_v44  ;;  %2774 = vmatprep.subr.bf16.mxu1 %v2575_v19 }
 0x7d0   :  { %2693 = vmatpush1.bf16.msra.mxu0 %v2572_v20  ;;  %2775 = vmatpush1.bf16.msra.mxu1 %v2574_v12 }
 0x7d1   :  { %2694 = vmatprep.subr.bf16.mxu0 %v2577_v14  ;;  %2776 = vmatprep.subr.bf16.mxu1 %v2579_v61 }
 0x7d4   :  { %2695 = vmatpush1.bf16.msra.mxu0 %v2576_v63  ;;  %2777 = vmatpush1.bf16.msra.mxu1 %v2578_v21 }
 0x7d5   :  { %2696 = vmatprep.subr.bf16.mxu0 %v2581_v22  ;;  %2778 = vmatprep.subr.bf16.mxu1 %v2583_v23 }
 0x7d8   :  { %2697 = vmatpush1.bf16.msra.mxu0 %v2580_v26  ;;  %2779 = vmatpush1.bf16.msra.mxu1 %v2582_v24 }
 0x7d9   :  { %2698 = vmatprep.subr.bf16.mxu0 %v2585_v29  ;;  %2780 = vmatprep.subr.bf16.mxu1 %v2587_v25 }
 0x7dc   :  { %2699 = vmatpush1.bf16.msra.mxu0 %v2584_v32  ;;  %2781 = vmatpush1.bf16.msra.mxu1 %v2586_v27 }
 0x7dd   :  { %2700 = vmatprep.subr.bf16.mxu0 %v2589_v11  ;;  %2782 = vmatprep.subr.bf16.mxu1 %v2591_v33 }
 0x7e0   :  { %2701 = vmatpush1.bf16.msra.mxu0 %v2588_v34  ;;  %2783 = vmatpush1.bf16.msra.mxu1 %v2590_v35 }
 0x7e1   :  { %2702 = vmatprep.subr.bf16.mxu0 %v2593_v36  ;;  %2784 = vmatprep.subr.bf16.mxu1 %v2595_v16 }
 0x7e4   :  { %2703 = vmatpush1.bf16.msra.mxu0 %v2592_v37  ;;  %2785 = vmatpush1.bf16.msra.mxu1 %v2594_v41 }
 0x7e5   :  { %2704 = vmatprep.subr.bf16.mxu0 %v2597_v39  ;;  %2786 = vmatprep.subr.bf16.mxu1 %v2599_v43 }
 0x7e8   :  { %2705 = vmatpush1.bf16.msra.mxu0 %v2596_v45  ;;  %2787 = vmatpush1.bf16.msra.mxu1 %v2598_v46 }
 0x7e9   :  { %2706 = vmatprep.subr.bf16.mxu0 %v2601_v47  ;;  %2788 = vmatprep.subr.bf16.mxu1 %v2603_v48 }
 0x7ec   :  { %2707 = vmatpush1.bf16.msra.mxu0 %v2600_v50  ;;  %2789 = vmatpush1.bf16.msra.mxu1 %v2602_v51 }
 0x7ed   :  { %2708 = vmatprep.subr.bf16.mxu0 %v2605_v52  ;;  %2790 = vmatprep.subr.bf16.mxu1 %v2607_v53 }
 0x7f0   :  { %2709 = vmatpush1.bf16.msra.mxu0 %v2604_v28  ;;  %2791 = vmatpush1.bf16.msra.mxu1 %v2606_v54 }
 0x7f1   :  { %2710 = vmatprep.subr.bf16.mxu0 %v2609_v58  ;;  %2792 = vmatprep.subr.bf16.mxu1 %v2611_v59 }
 0x7f4   :  { %2711 = vmatpush1.bf16.msra.mxu0 %v2608_v60  ;;  %2793 = vmatpush1.bf16.msra.mxu1 %v2610_v31 }
 0x7f7   :  { %2713 = vmatmul.mubr.bf16.vlgmr.msra.gmra.mrb[16].mxu0 %v2616_v30  ;;  %2795 = vmatmul.mubr.bf16.vlgmr.msra.gmra.mrb[24].mxu1 %v2616_v30 }
 0x8ca   :  { %v2714_v1 = vpop.f32.mrb[16].mxu0  ;;  %v2796_v38 = vpop.f32.mrb[24].mxu1 }
 0x8cb   :  { %v4712_v3 = vadd.f32 %v2714_v1, %v2622_v15  ;;  %v4714_v55 = vadd.f32 %v2796_v38, %v2630_v5  ;;  %v2716_v40 = vpop.f32.mrb[17].mxu0  ;;  %v2798_v4 = vpop.f32.mrb[25].mxu1 }
 0x8cc   :  { %v4716_v9 = vadd.f32 %v2716_v40, %v2626_v0  ;;  %v4718_v7 = vadd.f32 %v2798_v4, %v2634_v2  ;;  %v2718_v10 = vpop.f32.mrb[18].mxu0  ;;  %v2800_v13 = vpop.f32.mrb[26].mxu1 }
 0x8cd   :  { %v2807_v17 = vrot.slane %v4712_v3, 4  ;;  %v2831_v18 = vmul.f32 %v4712_v3, %v4712_v3  ;;  %v2819_v42 = vrot.slane %v4714_v55, 4  ;;  %v2833_v44 = vmul.f32 %v4714_v55, %v4714_v55  ;;  %v2719_v19 = vpop.f32.mrb[19].mxu0  ;;  %v2801_v20 = vpop.f32.mrb[27].mxu1 }
 0x8ce   :  { %v2813_v12 = vrot.slane %v4716_v9, 4  ;;  %v2832_v14 = vmul.f32 %v4716_v9, %v4716_v9  ;;  %v2825_v61 = vrot.slane %v4718_v7, 4  ;;  %v2834_v63 = vmul.f32 %v4718_v7, %v4718_v7 }
 0x8cf   :  { %v2808_v21 = vadd.f32 %v4712_v3, %v2807_v17  ;;  %v2835_v22 = vrot.slane %v2831_v18, 4  ;;  %v2820_v23 = vadd.f32 %v4714_v55, %v2819_v42  ;;  %v2847_v26 = vrot.slane %v2833_v44, 4 }
 0x8d0   :  { %v2814_v24 = vadd.f32 %v4716_v9, %v2813_v12  ;;  %v2841_v29 = vrot.slane %v2832_v14, 4  ;;  %v2826_v25 = vadd.f32 %v4718_v7, %v2825_v61  ;;  %v2853_v32 = vrot.slane %v2834_v63, 4 }
 0x8d1   :  { %v2809_v27 = vrot.slane %v2808_v21, 2  ;;  %v2836_v11 = vadd.f32 %v2835_v22, %v2831_v18  ;;  %v2821_v33 = vrot.slane %v2820_v23, 2  ;;  %v2848_v34 = vadd.f32 %v2847_v26, %v2833_v44 }
 0x8d2   :  { %v2815_v35 = vrot.slane %v2814_v24, 2  ;;  %v2842_v36 = vadd.f32 %v2841_v29, %v2832_v14  ;;  %v2827_v16 = vrot.slane %v2826_v25, 2  ;;  %v2854_v37 = vadd.f32 %v2853_v32, %v2834_v63 }
 0x8d3   :  { %v2810_v41 = vadd.f32 %v2809_v27, %v2808_v21  ;;  %v2837_v39 = vrot.slane %v2836_v11, 2  ;;  %v2822_v43 = vadd.f32 %v2821_v33, %v2820_v23  ;;  %v2849_v45 = vrot.slane %v2848_v34, 2 }
 0x8d4   :  { %v2816_v46 = vadd.f32 %v2815_v35, %v2814_v24  ;;  %v2843_v47 = vrot.slane %v2842_v36, 2  ;;  %v2828_v48 = vadd.f32 %v2827_v16, %v2826_v25  ;;  %v2855_v50 = vrot.slane %v2854_v37, 2 }
 0x8d5   :  { %v2811_v51 = vrot.slane %v2810_v41, 1  ;;  %v2838_v52 = vadd.f32 %v2837_v39, %v2836_v11  ;;  %v2823_v53 = vrot.slane %v2822_v43, 1  ;;  %v2850_v28 = vadd.f32 %v2849_v45, %v2848_v34 }
 0x8d6   :  { %v2817_v54 = vrot.slane %v2816_v46, 1  ;;  %v2844_v58 = vadd.f32 %v2843_v47, %v2842_v36  ;;  %v2829_v59 = vrot.slane %v2828_v48, 1  ;;  %v2856_v60 = vadd.f32 %v2855_v50, %v2854_v37 }
 0x8d7   :  { %v2812_v31 = vadd.f32 %v2811_v51, %v2810_v41  ;;  %v2839_v30 = vrot.slane %v2838_v52, 1  ;;  %v2824_v62 = vadd.f32 %v2823_v53, %v2822_v43  ;;  %v2851_v15 = vrot.slane %v2850_v28, 1  ;;  %v2804_v43 = vld [vmem:[#allocation10 + $0x26] ss:$8 sm:$0xf] }
 0x8d8   :  { %v2818_v5 = vadd.f32 %v2817_v54, %v2816_v46  ;;  %v2845_v0 = vrot.slane %v2844_v58, 1  ;;  %v2830_v2 = vadd.f32 %v2829_v59, %v2828_v48  ;;  %v2857_v1 = vrot.slane %v2856_v60, 1 }
 0x8d9   :  { %v2840_v38 = vadd.f32 %v2839_v30, %v2838_v52  ;;  %v2859_v40 = vmul.f32 0.125, %v2812_v31  ;;  %v2852_v4 = vadd.f32 %v2851_v15, %v2850_v28  ;;  %v2861_v10 = vmul.f32 0.125, %v2824_v62 }
 0x8da   :  { %v2846_v13 = vadd.f32 %v2845_v0, %v2844_v58  ;;  %v2860_v17 = vmul.f32 0.125, %v2818_v5  ;;  %v2858_v18 = vadd.f32 %v2857_v1, %v2856_v60  ;;  %v2862_v42 = vmul.f32 0.125, %v2830_v2  ;;  %v2806_v2 = vld [vmem:[#allocation10 + $0x27] ss:$8 sm:$0xf] }
 0x8db   :  { %v2863_v44 = vmul.f32 0.125, %v2840_v38  ;;  %v2867_v19 = vmul.f32 %v2859_v40, %v2859_v40  ;;  %v2865_v20 = vmul.f32 0.125, %v2852_v4  ;;  %v2869_v12 = vmul.f32 %v2861_v10, %v2861_v10 }
 0x8dc   :  { %v2864_v14 = vmul.f32 0.125, %v2846_v13  ;;  %v2868_v61 = vmul.f32 %v2860_v17, %v2860_v17  ;;  %v2866_v63 = vmul.f32 0.125, %v2858_v18  ;;  %v2870_v21 = vmul.f32 %v2862_v42, %v2862_v42 }
 0x8dd   :  { %v2871_v22 = vsub.f32 %v2863_v44, %v2867_v19  ;;  %v2873_v23 = vsub.f32 %v2865_v20, %v2869_v12 }
 0x8de   :  { %v2872_v26 = vsub.f32 %v2864_v14, %v2868_v61  ;;  %v2874_v24 = vsub.f32 %v2866_v63, %v2870_v21 }
 0x8df   :  { %v2875_v29 = vadd.f32 1e-05, %v2871_v22  ;;  %v2877_v25 = vadd.f32 1e-05, %v2873_v23 }
 0x8e0   :  { %v2876_v32 = vadd.f32 1e-05, %v2872_v26  ;;  %v2878_v27 = vadd.f32 1e-05, %v2874_v24 }
 0x8e1   :  { %4115 = vrsqrt.f32 %v2875_v29 }
 0x8e2   :  { %4117 = vrsqrt.f32 %v2877_v25 }
 0x8e3   :  { %4119 = vrsqrt.f32 %v2876_v32 }
 0x8e4   :  { %4121 = vrsqrt.f32 %v2878_v27 }
 0x8eb   :  { %v4116_v11 = vpop.eup %4115 }
 0x8ec   :  { %v4118_v33 = vpop.eup %4117 }
 0x8ed   :  { %v4120_v34 = vpop.eup %4119 }
 0x8ee   :  { %v4122_v35 = vpop.eup %4121  ;;  %v2887_v36 = vcombine.low %v4116_v11, %v4120_v34 }
 0x8ef   :  { %v2888_v16 = vcombine.low %v4118_v33, %v4122_v35 }
 0x8f0   :  { %v2895_v37 = vrot.slane %v2887_v36, %v4500_v49 }
 0x8f1   :  { %v2902_v41 = vrot.slane %v2888_v16, %v4500_v49 }
 0x8f3   :  { %v2903_v39 = vcombine.low %v2895_v37, %v2902_v41 }
 0x8f5   :  { %v2910_v45 = vrot.slane %v2903_v39, %v4500_v49 }
 0x8f7   :  { %v2912_v46 = vmul.f32 %v2910_v45, %v2804_v43 }
 0x8f9   :  { %v2917_v47 = vrot.slane %v2912_v46, %v4452_v6  ;;  %v2921_v48 = vrot.slane %v2912_v46, %v4455_v8  ;;  %v2925_v50 = vrot.slane %v2912_v46, %v4480_v56  ;;  %v2929_v51 = vrot.slane %v2912_v46, %v4483_v57 }
 0x8fb   :  { %v2934_v52 = vmul.f32 %v2917_v47, %v2859_v40  ;;  %v2935_v53 = vmul.f32 %v2921_v48, %v2860_v17  ;;  %v2936_v28 = vmul.f32 %v2925_v50, %v2861_v10  ;;  %v2937_v54 = vmul.f32 %v2929_v51, %v2862_v42 }
 0x8fc   :  { %v2968_v58 = vmul.f32 %v4712_v3, %v2917_v47  ;;  %v2969_v59 = vmul.f32 %v4716_v9, %v2921_v48  ;;  %v2970_v60 = vmul.f32 %v4714_v55, %v2925_v50  ;;  %v2971_v31 = vmul.f32 %v4718_v7, %v2929_v51 }
 0x8fd   :  { %v2942_v30 = vcombine.low %v2934_v52, %v2935_v53  ;;  %v2943_v62 = vcombine.low %v2936_v28, %v2937_v54 }
 0x8ff   :  { %v2950_v15 = vrot.slane %v2942_v30, %v4500_v49  ;;  %v2957_v5 = vrot.slane %v2943_v62, %v4500_v49 }
 0x901   :  { %v2958_v0 = vcombine.low %v2950_v15, %v2957_v5 }
 0x903   :  { %v2965_v1 = vrot.slane %v2958_v0, %v4500_v49 }
 0x905   :  { %v2967_v38 = vsub.f32 %v2806_v2, %v2965_v1 }
 0x907   :  { %v2976_v40 = vrot.slane %v2967_v38, %v4452_v6  ;;  %v2980_v3 = vrot.slane %v2967_v38, %v4455_v8  ;;  %v2984_v9 = vrot.slane %v2967_v38, %v4480_v56  ;;  %v2988_v55 = vrot.slane %v2967_v38, %v4483_v57 }
 0x909   :  { %v2993_v7 = vadd.f32 %v2976_v40, %v2968_v58  ;;  %v2994_v4 = vadd.f32 %v2980_v3, %v2969_v59  ;;  %v2995_v10 = vadd.f32 %v2984_v9, %v2970_v60  ;;  %v2996_v13 = vadd.f32 %v2988_v55, %v2971_v31 }
 0x90b   :  { %v2997_v17 = vmul.f32 0.01, %v2993_v7  ;;  %v2998_v18 = vmul.f32 0.01, %v2994_v4  ;;  %v2999_v42 = vmul.f32 0.01, %v2995_v10 }
 0x90c   :  { %v3000_v44 = vmul.f32 0.01, %v2996_v13 }
 0x90d   :  { %v4754_v19 = vmax.f32 %v2993_v7, %v2997_v17  ;;  %v3002_v20 = vmax.f32 %v2994_v4, %v2998_v18  ;;  %v4756_v12 = vmax.f32 %v2995_v10, %v2999_v42 }
 0x90e   :  { %v4758_v14 = vmax.f32 %v2996_v13, %v3000_v44 }
 0x90f   :  { %4241 = dma.done.wait [#allocation6 + $0x5], 16384 }
 0x910   :  { %4242 = vsyncadd [#allocation6 + $0x5], 4294950912  ;;  %v3138_v61 = vpack.c.bf16 %v3002_v20, %v3002_v20  ;;  %v3008_v63 = vld [vmem:[#allocation2 + $0xc08] sm:$0xff]  ;;  %v3010_v21 = vld [vmem:[#allocation2 + $0xc18] sm:$0xff] }
 0x911   :  { %v3007_v22 = vld [vmem:[#allocation2 + $0xc00] sm:$0xff]  ;;  %3162 = vmatprep.subr.bf16.mxu0 %v3008_v63  ;;  %3244 = vmatprep.subr.bf16.mxu1 %v3010_v21  ;;  %v3009_v23 = vld [vmem:[#allocation2 + $0xc10] sm:$0xff]  ;;  %v3012_v26 = vld [vmem:[#allocation2 + $0xc28] sm:$0xff] }
 0x912   :  { %3194 = vmatprep.mubr.bf16.mxu0 %v3138_v61  ;;  %3276 = vmatprep.mubr.bf16.mxu1 %v3138_v61  ;;  %v3014_v24 = vld [vmem:[#allocation2 + $0xc38] sm:$0xff]  ;;  %v3011_v29 = vld [vmem:[#allocation2 + $0xc20] sm:$0xff]  ;;  %v3013_v25 = vld [vmem:[#allocation2 + $0xc30] sm:$0xff] }
 0x913   :  { %3163 = vmatpush1.bf16.msra.mxu0 %v3007_v22  ;;  %3245 = vmatpush1.bf16.msra.mxu1 %v3009_v23  ;;  %v3016_v32 = vld [vmem:[#allocation2 + $0xc48] sm:$0xff]  ;;  %v3018_v27 = vld [vmem:[#allocation2 + $0xc58] sm:$0xff]  ;;  %v3015_v11 = vld [vmem:[#allocation2 + $0xc40] sm:$0xff] }
 0x914   :  { %3164 = vmatprep.subr.bf16.mxu0 %v3012_v26  ;;  %3246 = vmatprep.subr.bf16.mxu1 %v3014_v24  ;;  %v3017_v33 = vld [vmem:[#allocation2 + $0xc50] sm:$0xff]  ;;  %v3020_v34 = vld [vmem:[#allocation2 + $0xc68] sm:$0xff]  ;;  %v3022_v35 = vld [vmem:[#allocation2 + $0xc78] sm:$0xff] }
 0x915   :  { %v3019_v36 = vld [vmem:[#allocation2 + $0xc60] sm:$0xff]  ;;  %v3021_v16 = vld [vmem:[#allocation2 + $0xc70] sm:$0xff]  ;;  %v3024_v37 = vld [vmem:[#allocation2 + $0xc88] sm:$0xff] }
 0x916   :  { %v3026_v41 = vld [vmem:[#allocation2 + $0xc98] sm:$0xff]  ;;  %v3023_v39 = vld [vmem:[#allocation2 + $0xc80] sm:$0xff]  ;;  %v3025_v43 = vld [vmem:[#allocation2 + $0xc90] sm:$0xff] }
 0x917   :  { %3165 = vmatpush1.bf16.msra.mxu0 %v3011_v29  ;;  %3247 = vmatpush1.bf16.msra.mxu1 %v3013_v25  ;;  %v3028_v45 = vld [vmem:[#allocation2 + $0xca8] sm:$0xff]  ;;  %v3030_v46 = vld [vmem:[#allocation2 + $0xcb8] sm:$0xff]  ;;  %v3027_v47 = vld [vmem:[#allocation2 + $0xca0] sm:$0xff] }
 0x918   :  { %3166 = vmatprep.subr.bf16.mxu0 %v3016_v32  ;;  %3248 = vmatprep.subr.bf16.mxu1 %v3018_v27  ;;  %v3029_v48 = vld [vmem:[#allocation2 + $0xcb0] sm:$0xff]  ;;  %v3032_v50 = vld [vmem:[#allocation2 + $0xcc8] sm:$0xff]  ;;  %v3034_v51 = vld [vmem:[#allocation2 + $0xcd8] sm:$0xff] }
 0x919   :  { %v3031_v52 = vld [vmem:[#allocation2 + $0xcc0] sm:$0xff]  ;;  %v3033_v53 = vld [vmem:[#allocation2 + $0xcd0] sm:$0xff]  ;;  %v3036_v28 = vld [vmem:[#allocation2 + $0xce8] sm:$0xff] }
 0x91a   :  { %v3038_v54 = vld [vmem:[#allocation2 + $0xcf8] sm:$0xff]  ;;  %v3035_v58 = vld [vmem:[#allocation2 + $0xce0] sm:$0xff]  ;;  %v3037_v59 = vld [vmem:[#allocation2 + $0xcf0] sm:$0xff] }
 0x91b   :  { %3167 = vmatpush1.bf16.msra.mxu0 %v3015_v11  ;;  %3249 = vmatpush1.bf16.msra.mxu1 %v3017_v33  ;;  %v3040_v60 = vld [vmem:[#allocation2 + $0xd08] sm:$0xff]  ;;  %v3042_v31 = vld [vmem:[#allocation2 + $0xd18] sm:$0xff]  ;;  %v3039_v30 = vld [vmem:[#allocation2 + $0xd00] sm:$0xff]  ;;  %v3137_v11 = vpack.c.bf16 %v4754_v19, %v4754_v19 }
 0x91c   :  { %3168 = vmatprep.subr.bf16.mxu0 %v3020_v34  ;;  %3250 = vmatprep.subr.bf16.mxu1 %v3022_v35  ;;  %v3041_v62 = vld [vmem:[#allocation2 + $0xd10] sm:$0xff]  ;;  %v3044_v15 = vld [vmem:[#allocation2 + $0xd28] sm:$0xff]  ;;  %v3046_v5 = vld [vmem:[#allocation2 + $0xd38] sm:$0xff] }
 0x91d   :  { %v3043_v0 = vld [vmem:[#allocation2 + $0xd20] sm:$0xff]  ;;  %v3045_v2 = vld [vmem:[#allocation2 + $0xd30] sm:$0xff]  ;;  %v3048_v1 = vld [vmem:[#allocation2 + $0xd48] sm:$0xff] }
 0x91e   :  { %v3050_v38 = vld [vmem:[#allocation2 + $0xd58] sm:$0xff]  ;;  %v3047_v40 = vld [vmem:[#allocation2 + $0xd40] sm:$0xff]  ;;  %v3049_v3 = vld [vmem:[#allocation2 + $0xd50] sm:$0xff] }
 0x91f   :  { %3169 = vmatpush1.bf16.msra.mxu0 %v3019_v36  ;;  %3251 = vmatpush1.bf16.msra.mxu1 %v3021_v16  ;;  %v3052_v9 = vld [vmem:[#allocation2 + $0xd68] sm:$0xff]  ;;  %v3054_v55 = vld [vmem:[#allocation2 + $0xd78] sm:$0xff]  ;;  %v3051_v7 = vld [vmem:[#allocation2 + $0xd60] sm:$0xff]  ;;  %v3140_v16 = vpack.c.bf16 %v4758_v14, %v4758_v14 }
 0x920   :  { %3170 = vmatprep.subr.bf16.mxu0 %v3024_v37  ;;  %3252 = vmatprep.subr.bf16.mxu1 %v3026_v41  ;;  %v3053_v4 = vld [vmem:[#allocation2 + $0xd70] sm:$0xff]  ;;  %v3056_v10 = vld [vmem:[#allocation2 + $0xd88] sm:$0xff]  ;;  %v3058_v13 = vld [vmem:[#allocation2 + $0xd98] sm:$0xff] }
 0x921   :  { %v3055_v17 = vld [vmem:[#allocation2 + $0xd80] sm:$0xff]  ;;  %v3057_v18 = vld [vmem:[#allocation2 + $0xd90] sm:$0xff]  ;;  %v3060_v42 = vld [vmem:[#allocation2 + $0xda8] sm:$0xff] }
 0x922   :  { %v3062_v44 = vld [vmem:[#allocation2 + $0xdb8] sm:$0xff]  ;;  %v3059_v20 = vld [vmem:[#allocation2 + $0xda0] sm:$0xff]  ;;  %v3061_v61 = vld [vmem:[#allocation2 + $0xdb0] sm:$0xff] }
 0x923   :  { %3171 = vmatpush1.bf16.msra.mxu0 %v3023_v39  ;;  %3253 = vmatpush1.bf16.msra.mxu1 %v3025_v43  ;;  %v3064_v63 = vld [vmem:[#allocation2 + $0xdc8] sm:$0xff]  ;;  %v3066_v21 = vld [vmem:[#allocation2 + $0xdd8] sm:$0xff]  ;;  %v3063_v22 = vld [vmem:[#allocation2 + $0xdc0] sm:$0xff] }
 0x924   :  { %3172 = vmatprep.subr.bf16.mxu0 %v3028_v45  ;;  %3254 = vmatprep.subr.bf16.mxu1 %v3030_v46  ;;  %v3065_v23 = vld [vmem:[#allocation2 + $0xdd0] sm:$0xff]  ;;  %v3068_v26 = vld [vmem:[#allocation2 + $0xde8] sm:$0xff]  ;;  %v3070_v24 = vld [vmem:[#allocation2 + $0xdf8] sm:$0xff] }
 0x925   :  { %v3067_v29 = vld [vmem:[#allocation2 + $0xde0] sm:$0xff]  ;;  %v3069_v25 = vld [vmem:[#allocation2 + $0xdf0] sm:$0xff]  ;;  %v3072_v32 = vld [vmem:[#allocation2 + $0xe08] sm:$0xff] }
 0x926   :  { %v3074_v27 = vld [vmem:[#allocation2 + $0xe18] sm:$0xff]  ;;  %v3071_v33 = vld [vmem:[#allocation2 + $0xe00] sm:$0xff]  ;;  %v3073_v34 = vld [vmem:[#allocation2 + $0xe10] sm:$0xff] }
 0x927   :  { %3173 = vmatpush1.bf16.msra.mxu0 %v3027_v47  ;;  %3255 = vmatpush1.bf16.msra.mxu1 %v3029_v48  ;;  %v3076_v35 = vld [vmem:[#allocation2 + $0xe28] sm:$0xff]  ;;  %v3078_v36 = vld [vmem:[#allocation2 + $0xe38] sm:$0xff]  ;;  %v3075_v37 = vld [vmem:[#allocation2 + $0xe20] sm:$0xff] }
 0x928   :  { %3174 = vmatprep.subr.bf16.mxu0 %v3032_v50  ;;  %3256 = vmatprep.subr.bf16.mxu1 %v3034_v51  ;;  %v3077_v41 = vld [vmem:[#allocation2 + $0xe30] sm:$0xff]  ;;  %v3080_v19 = vld [vmem:[#allocation2 + $0xe48] sm:$0xff]  ;;  %v3082_v39 = vld [vmem:[#allocation2 + $0xe58] sm:$0xff] }
 0x929   :  { %v3079_v43 = vld [vmem:[#allocation2 + $0xe40] sm:$0xff]  ;;  %v3081_v45 = vld [vmem:[#allocation2 + $0xe50] sm:$0xff]  ;;  %v3084_v46 = vld [vmem:[#allocation2 + $0xe68] sm:$0xff] }
 0x92a   :  { %v3086_v14 = vld [vmem:[#allocation2 + $0xe78] sm:$0xff]  ;;  %v3083_v47 = vld [vmem:[#allocation2 + $0xe60] sm:$0xff]  ;;  %v3085_v48 = vld [vmem:[#allocation2 + $0xe70] sm:$0xff] }
 0x92b   :  { %3175 = vmatpush1.bf16.msra.mxu0 %v3031_v52  ;;  %3257 = vmatpush1.bf16.msra.mxu1 %v3033_v53  ;;  %v3088_v50 = vld [vmem:[#allocation2 + $0xe88] sm:$0xff]  ;;  %v3090_v51 = vld [vmem:[#allocation2 + $0xe98] sm:$0xff]  ;;  %v3087_v52 = vld [vmem:[#allocation2 + $0xe80] sm:$0xff] }
 0x92c   :  { %3176 = vmatprep.subr.bf16.mxu0 %v3036_v28  ;;  %3258 = vmatprep.subr.bf16.mxu1 %v3038_v54  ;;  %v3089_v53 = vld [vmem:[#allocation2 + $0xe90] sm:$0xff]  ;;  %v3092_v28 = vld [vmem:[#allocation2 + $0xea8] sm:$0xff]  ;;  %v3094_v54 = vld [vmem:[#allocation2 + $0xeb8] sm:$0xff] }
 0x92f   :  { %3177 = vmatpush1.bf16.msra.mxu0 %v3035_v58  ;;  %3259 = vmatpush1.bf16.msra.mxu1 %v3037_v59  ;;  %v3091_v58 = vld [vmem:[#allocation2 + $0xea0] sm:$0xff]  ;;  %v3093_v59 = vld [vmem:[#allocation2 + $0xeb0] sm:$0xff] }
 0x930   :  { %3178 = vmatprep.subr.bf16.mxu0 %v3040_v60  ;;  %3260 = vmatprep.subr.bf16.mxu1 %v3042_v31  ;;  %v3096_v60 = vld [vmem:[#allocation2 + $0xec8] sm:$0xff]  ;;  %v3098_v31 = vld [vmem:[#allocation2 + $0xed8] sm:$0xff] }
 0x933   :  { %3179 = vmatpush1.bf16.msra.mxu0 %v3039_v30  ;;  %3261 = vmatpush1.bf16.msra.mxu1 %v3041_v62  ;;  %v3095_v30 = vld [vmem:[#allocation2 + $0xec0] sm:$0xff]  ;;  %v3097_v62 = vld [vmem:[#allocation2 + $0xed0] sm:$0xff] }
 0x934   :  { %3180 = vmatprep.subr.bf16.mxu0 %v3044_v15  ;;  %3262 = vmatprep.subr.bf16.mxu1 %v3046_v5  ;;  %v3100_v15 = vld [vmem:[#allocation2 + $0xee8] sm:$0xff]  ;;  %v3102_v5 = vld [vmem:[#allocation2 + $0xef8] sm:$0xff] }
 0x937   :  { %3181 = vmatpush1.bf16.msra.mxu0 %v3043_v0  ;;  %3263 = vmatpush1.bf16.msra.mxu1 %v3045_v2  ;;  %v3099_v0 = vld [vmem:[#allocation2 + $0xee0] sm:$0xff]  ;;  %v3101_v2 = vld [vmem:[#allocation2 + $0xef0] sm:$0xff] }
 0x938   :  { %3182 = vmatprep.subr.bf16.mxu0 %v3048_v1  ;;  %3264 = vmatprep.subr.bf16.mxu1 %v3050_v38  ;;  %v3104_v1 = vld [vmem:[#allocation2 + $0xf08] sm:$0xff]  ;;  %v3106_v38 = vld [vmem:[#allocation2 + $0xf18] sm:$0xff] }
 0x93b   :  { %3183 = vmatpush1.bf16.msra.mxu0 %v3047_v40  ;;  %3265 = vmatpush1.bf16.msra.mxu1 %v3049_v3  ;;  %v3103_v40 = vld [vmem:[#allocation2 + $0xf00] sm:$0xff]  ;;  %v3105_v3 = vld [vmem:[#allocation2 + $0xf10] sm:$0xff] }
 0x93c   :  { %3184 = vmatprep.subr.bf16.mxu0 %v3052_v9  ;;  %3266 = vmatprep.subr.bf16.mxu1 %v3054_v55  ;;  %v3108_v9 = vld [vmem:[#allocation2 + $0xf28] sm:$0xff]  ;;  %v3110_v55 = vld [vmem:[#allocation2 + $0xf38] sm:$0xff] }
 0x93f   :  { %3185 = vmatpush1.bf16.msra.mxu0 %v3051_v7  ;;  %3267 = vmatpush1.bf16.msra.mxu1 %v3053_v4  ;;  %v3107_v7 = vld [vmem:[#allocation2 + $0xf20] sm:$0xff]  ;;  %v3109_v4 = vld [vmem:[#allocation2 + $0xf30] sm:$0xff] }
 0x940   :  { %3186 = vmatprep.subr.bf16.mxu0 %v3056_v10  ;;  %3268 = vmatprep.subr.bf16.mxu1 %v3058_v13  ;;  %v3112_v10 = vld [vmem:[#allocation2 + $0xf48] sm:$0xff]  ;;  %v3114_v13 = vld [vmem:[#allocation2 + $0xf58] sm:$0xff] }
 0x943   :  { %3187 = vmatpush1.bf16.msra.mxu0 %v3055_v17  ;;  %3269 = vmatpush1.bf16.msra.mxu1 %v3057_v18  ;;  %v3111_v17 = vld [vmem:[#allocation2 + $0xf40] sm:$0xff]  ;;  %v3113_v18 = vld [vmem:[#allocation2 + $0xf50] sm:$0xff] }
 0x944   :  { %3188 = vmatprep.subr.bf16.mxu0 %v3060_v42  ;;  %3270 = vmatprep.subr.bf16.mxu1 %v3062_v44  ;;  %v3116_v42 = vld [vmem:[#allocation2 + $0xf68] sm:$0xff]  ;;  %v3118_v44 = vld [vmem:[#allocation2 + $0xf78] sm:$0xff] }
 0x947   :  { %3189 = vmatpush1.bf16.msra.mxu0 %v3059_v20  ;;  %3271 = vmatpush1.bf16.msra.mxu1 %v3061_v61  ;;  %v3115_v20 = vld [vmem:[#allocation2 + $0xf60] sm:$0xff]  ;;  %v3117_v61 = vld [vmem:[#allocation2 + $0xf70] sm:$0xff] }
 0x948   :  { %3190 = vmatprep.subr.bf16.mxu0 %v3064_v63  ;;  %3272 = vmatprep.subr.bf16.mxu1 %v3066_v21  ;;  %v3120_v63 = vld [vmem:[#allocation2 + $0xf88] sm:$0xff]  ;;  %v3122_v21 = vld [vmem:[#allocation2 + $0xf98] sm:$0xff] }
 0x94b   :  { %3191 = vmatpush1.bf16.msra.mxu0 %v3063_v22  ;;  %3273 = vmatpush1.bf16.msra.mxu1 %v3065_v23  ;;  %v3119_v22 = vld [vmem:[#allocation2 + $0xf80] sm:$0xff]  ;;  %v3121_v23 = vld [vmem:[#allocation2 + $0xf90] sm:$0xff] }
 0x94c   :  { %3192 = vmatprep.subr.bf16.mxu0 %v3068_v26  ;;  %3274 = vmatprep.subr.bf16.mxu1 %v3070_v24  ;;  %v3124_v26 = vld [vmem:[#allocation2 + $0xfa8] sm:$0xff]  ;;  %v3126_v24 = vld [vmem:[#allocation2 + $0xfb8] sm:$0xff] }
 0x94f   :  { %3193 = vmatpush1.bf16.msra.mxu0 %v3067_v29  ;;  %3275 = vmatpush1.bf16.msra.mxu1 %v3069_v25  ;;  %v3123_v29 = vld [vmem:[#allocation2 + $0xfa0] sm:$0xff]  ;;  %v3125_v25 = vld [vmem:[#allocation2 + $0xfb0] sm:$0xff] }
 0x950   :  { %3203 = vmatprep.subr.bf16.mxu0 %v3072_v32  ;;  %3285 = vmatprep.subr.bf16.mxu1 %v3074_v27  ;;  %v3128_v32 = vld [vmem:[#allocation2 + $0xfc8] sm:$0xff]  ;;  %v3130_v27 = vld [vmem:[#allocation2 + $0xfd8] sm:$0xff] }
 0x952   :  { %3195 = vmatmul.mubr.bf16.vlgmr.msra.gmra.mrb[20].mxu0 %v3137_v11  ;;  %3277 = vmatmul.mubr.bf16.vlgmr.msra.gmra.mrb[28].mxu1 %v3137_v11  ;;  %v3127_v11 = vld [vmem:[#allocation2 + $0xfc0] sm:$0xff] }
 0x953   :  { %3204 = vmatpush1.bf16.msra.mxu0 %v3071_v33  ;;  %3286 = vmatpush1.bf16.msra.mxu1 %v3073_v34  ;;  %v3129_v33 = vld [vmem:[#allocation2 + $0xfd0] sm:$0xff]  ;;  %v3132_v34 = vld [vmem:[#allocation2 + $0xfe8] sm:$0xff] }
 0x954   :  { %3205 = vmatprep.subr.bf16.mxu0 %v3076_v35  ;;  %3287 = vmatprep.subr.bf16.mxu1 %v3078_v36  ;;  %v3134_v35 = vld [vmem:[#allocation2 + $0xff8] sm:$0xff]  ;;  %v3131_v36 = vld [vmem:[#allocation2 + $0xfe0] sm:$0xff] }
 0x955   :  { %3235 = vmatprep.mubr.bf16.mxu0 %v3140_v16  ;;  %3317 = vmatprep.mubr.bf16.mxu1 %v3140_v16  ;;  %v3133_v16 = vld [vmem:[#allocation2 + $0xff0] sm:$0xff] }
 0x957   :  { %3206 = vmatpush1.bf16.msra.mxu0 %v3075_v37  ;;  %3288 = vmatpush1.bf16.msra.mxu1 %v3077_v41  ;;  %v3139_v37 = vpack.c.bf16 %v4756_v12, %v4756_v12  ;;  %v3136_v41 = vld [vmem:[#allocation10 + $0x40] ss:$8 sm:$0xf] }
 0x958   :  { %3207 = vmatprep.subr.bf16.mxu0 %v3080_v19  ;;  %3289 = vmatprep.subr.bf16.mxu1 %v3082_v39  ;;  %v3145_v19 = vrot.slane %v3136_v41, %v4452_v6  ;;  %v3153_v39 = vrot.slane %v3136_v41, %v4480_v56 }
 0x95b   :  { %3208 = vmatpush1.bf16.msra.mxu0 %v3079_v43  ;;  %3290 = vmatpush1.bf16.msra.mxu1 %v3081_v45  ;;  %v3149_v43 = vrot.slane %v3136_v41, %v4455_v8  ;;  %v3157_v45 = vrot.slane %v3136_v41, %v4483_v57 }
 0x95c   :  { %3209 = vmatprep.subr.bf16.mxu0 %v3084_v46  ;;  %3291 = vmatprep.subr.bf16.mxu1 %v3086_v14 }
 0x95f   :  { %3210 = vmatpush1.bf16.msra.mxu0 %v3083_v47  ;;  %3292 = vmatpush1.bf16.msra.mxu1 %v3085_v48 }
 0x960   :  { %3211 = vmatprep.subr.bf16.mxu0 %v3088_v50  ;;  %3293 = vmatprep.subr.bf16.mxu1 %v3090_v51 }
 0x963   :  { %3212 = vmatpush1.bf16.msra.mxu0 %v3087_v52  ;;  %3294 = vmatpush1.bf16.msra.mxu1 %v3089_v53 }
 0x964   :  { %3213 = vmatprep.subr.bf16.mxu0 %v3092_v28  ;;  %3295 = vmatprep.subr.bf16.mxu1 %v3094_v54 }
 0x967   :  { %3214 = vmatpush1.bf16.msra.mxu0 %v3091_v58  ;;  %3296 = vmatpush1.bf16.msra.mxu1 %v3093_v59 }
 0x968   :  { %3215 = vmatprep.subr.bf16.mxu0 %v3096_v60  ;;  %3297 = vmatprep.subr.bf16.mxu1 %v3098_v31 }
 0x96b   :  { %3216 = vmatpush1.bf16.msra.mxu0 %v3095_v30  ;;  %3298 = vmatpush1.bf16.msra.mxu1 %v3097_v62 }
 0x96c   :  { %3217 = vmatprep.subr.bf16.mxu0 %v3100_v15  ;;  %3299 = vmatprep.subr.bf16.mxu1 %v3102_v5 }
 0x96f   :  { %3218 = vmatpush1.bf16.msra.mxu0 %v3099_v0  ;;  %3300 = vmatpush1.bf16.msra.mxu1 %v3101_v2 }
 0x970   :  { %3219 = vmatprep.subr.bf16.mxu0 %v3104_v1  ;;  %3301 = vmatprep.subr.bf16.mxu1 %v3106_v38 }
 0x973   :  { %3220 = vmatpush1.bf16.msra.mxu0 %v3103_v40  ;;  %3302 = vmatpush1.bf16.msra.mxu1 %v3105_v3 }
 0x974   :  { %3221 = vmatprep.subr.bf16.mxu0 %v3108_v9  ;;  %3303 = vmatprep.subr.bf16.mxu1 %v3110_v55 }
 0x977   :  { %3222 = vmatpush1.bf16.msra.mxu0 %v3107_v7  ;;  %3304 = vmatpush1.bf16.msra.mxu1 %v3109_v4 }
 0x978   :  { %3223 = vmatprep.subr.bf16.mxu0 %v3112_v10  ;;  %3305 = vmatprep.subr.bf16.mxu1 %v3114_v13 }
 0x97b   :  { %3224 = vmatpush1.bf16.msra.mxu0 %v3111_v17  ;;  %3306 = vmatpush1.bf16.msra.mxu1 %v3113_v18 }
 0x97c   :  { %3225 = vmatprep.subr.bf16.mxu0 %v3116_v42  ;;  %3307 = vmatprep.subr.bf16.mxu1 %v3118_v44 }
 0x97f   :  { %3226 = vmatpush1.bf16.msra.mxu0 %v3115_v20  ;;  %3308 = vmatpush1.bf16.msra.mxu1 %v3117_v61 }
 0x980   :  { %3227 = vmatprep.subr.bf16.mxu0 %v3120_v63  ;;  %3309 = vmatprep.subr.bf16.mxu1 %v3122_v21 }
 0x983   :  { %3228 = vmatpush1.bf16.msra.mxu0 %v3119_v22  ;;  %3310 = vmatpush1.bf16.msra.mxu1 %v3121_v23 }
 0x984   :  { %3229 = vmatprep.subr.bf16.mxu0 %v3124_v26  ;;  %3311 = vmatprep.subr.bf16.mxu1 %v3126_v24 }
 0x987   :  { %3230 = vmatpush1.bf16.msra.mxu0 %v3123_v29  ;;  %3312 = vmatpush1.bf16.msra.mxu1 %v3125_v25 }
 0x988   :  { %3231 = vmatprep.subr.bf16.mxu0 %v3128_v32  ;;  %3313 = vmatprep.subr.bf16.mxu1 %v3130_v27 }
 0x98b   :  { %3232 = vmatpush1.bf16.msra.mxu0 %v3127_v11  ;;  %3314 = vmatpush1.bf16.msra.mxu1 %v3129_v33 }
 0x98c   :  { %3233 = vmatprep.subr.bf16.mxu0 %v3132_v34  ;;  %3315 = vmatprep.subr.bf16.mxu1 %v3134_v35 }
 0x98f   :  { %3234 = vmatpush1.bf16.msra.mxu0 %v3131_v36  ;;  %3316 = vmatpush1.bf16.msra.mxu1 %v3133_v16 }
 0x992   :  { %3236 = vmatmul.mubr.bf16.vlgmr.msra.gmra.mrb[20].mxu0 %v3139_v37  ;;  %3318 = vmatmul.mubr.bf16.vlgmr.msra.gmra.mrb[28].mxu1 %v3139_v37 }
 0xa65   :  { %v3237_v46 = vpop.f32.mrb[20].mxu0  ;;  %v3319_v14 = vpop.f32.mrb[28].mxu1 }
 0xa66   :  { %v4770_v47 = vadd.f32 %v3237_v46, %v3145_v19  ;;  %v4772_v48 = vadd.f32 %v3319_v14, %v3153_v39  ;;  %v3239_v12 = vpop.f32.mrb[21].mxu0  ;;  %v3321_v50 = vpop.f32.mrb[29].mxu1 }
 0xa67   :  { %v4774_v51 = vadd.f32 %v3239_v12, %v3149_v43  ;;  %v4776_v52 = vadd.f32 %v3321_v50, %v3157_v45  ;;  %v3241_v53 = vpop.f32.mrb[22].mxu0  ;;  %v3323_v28 = vpop.f32.mrb[30].mxu1 }
 0xa68   :  { %v3330_v54 = vrot.slane %v4770_v47, 4  ;;  %v3354_v58 = vmul.f32 %v4770_v47, %v4770_v47  ;;  %v3342_v59 = vrot.slane %v4772_v48, 4  ;;  %v3356_v60 = vmul.f32 %v4772_v48, %v4772_v48  ;;  %v3242_v31 = vpop.f32.mrb[23].mxu0  ;;  %v3324_v30 = vpop.f32.mrb[31].mxu1 }
 0xa69   :  { %v3336_v62 = vrot.slane %v4774_v51, 4  ;;  %v3355_v15 = vmul.f32 %v4774_v51, %v4774_v51  ;;  %v3348_v5 = vrot.slane %v4776_v52, 4  ;;  %v3357_v0 = vmul.f32 %v4776_v52, %v4776_v52 }
 0xa6a   :  { %v3331_v2 = vadd.f32 %v4770_v47, %v3330_v54  ;;  %v3358_v1 = vrot.slane %v3354_v58, 4  ;;  %v3343_v38 = vadd.f32 %v4772_v48, %v3342_v59  ;;  %v3370_v40 = vrot.slane %v3356_v60, 4 }
 0xa6b   :  { %v3337_v3 = vadd.f32 %v4774_v51, %v3336_v62  ;;  %v3364_v9 = vrot.slane %v3355_v15, 4  ;;  %v3349_v55 = vadd.f32 %v4776_v52, %v3348_v5  ;;  %v3376_v7 = vrot.slane %v3357_v0, 4 }
 0xa6c   :  { %v3332_v4 = vrot.slane %v3331_v2, 2  ;;  %v3359_v10 = vadd.f32 %v3358_v1, %v3354_v58  ;;  %v3344_v13 = vrot.slane %v3343_v38, 2  ;;  %v3371_v17 = vadd.f32 %v3370_v40, %v3356_v60 }
 0xa6d   :  { %v3338_v18 = vrot.slane %v3337_v3, 2  ;;  %v3365_v42 = vadd.f32 %v3364_v9, %v3355_v15  ;;  %v3350_v44 = vrot.slane %v3349_v55, 2  ;;  %v3377_v20 = vadd.f32 %v3376_v7, %v3357_v0 }
 0xa6e   :  { %v3333_v61 = vadd.f32 %v3332_v4, %v3331_v2  ;;  %v3360_v63 = vrot.slane %v3359_v10, 2  ;;  %v3345_v21 = vadd.f32 %v3344_v13, %v3343_v38  ;;  %v3372_v22 = vrot.slane %v3371_v17, 2 }
 0xa6f   :  { %v3339_v23 = vadd.f32 %v3338_v18, %v3337_v3  ;;  %v3366_v26 = vrot.slane %v3365_v42, 2  ;;  %v3351_v24 = vadd.f32 %v3350_v44, %v3349_v55  ;;  %v3378_v29 = vrot.slane %v3377_v20, 2 }
 0xa70   :  { %v3334_v25 = vrot.slane %v3333_v61, 1  ;;  %v3361_v32 = vadd.f32 %v3360_v63, %v3359_v10  ;;  %v3346_v27 = vrot.slane %v3345_v21, 1  ;;  %v3373_v11 = vadd.f32 %v3372_v22, %v3371_v17 }
 0xa71   :  { %v3340_v33 = vrot.slane %v3339_v23, 1  ;;  %v3367_v34 = vadd.f32 %v3366_v26, %v3365_v42  ;;  %v3352_v35 = vrot.slane %v3351_v24, 1  ;;  %v3379_v36 = vadd.f32 %v3378_v29, %v3377_v20 }
 0xa72   :  { %v3335_v16 = vadd.f32 %v3334_v25, %v3333_v61  ;;  %v3362_v37 = vrot.slane %v3361_v32, 1  ;;  %v3347_v41 = vadd.f32 %v3346_v27, %v3345_v21  ;;  %v3374_v19 = vrot.slane %v3373_v11, 1  ;;  %v3327_v21 = vld [vmem:[#allocation10 + $0x41] ss:$8 sm:$0xf] }
 0xa73   :  { %v3341_v39 = vadd.f32 %v3340_v33, %v3339_v23  ;;  %v3368_v43 = vrot.slane %v3367_v34, 1  ;;  %v3353_v45 = vadd.f32 %v3352_v35, %v3351_v24  ;;  %v3380_v46 = vrot.slane %v3379_v36, 1 }
 0xa74   :  { %v3363_v14 = vadd.f32 %v3362_v37, %v3361_v32  ;;  %v3382_v12 = vmul.f32 0.125, %v3335_v16  ;;  %v3375_v50 = vadd.f32 %v3374_v19, %v3373_v11  ;;  %v3384_v53 = vmul.f32 0.125, %v3347_v41 }
 0xa75   :  { %v3369_v28 = vadd.f32 %v3368_v43, %v3367_v34  ;;  %v3383_v54 = vmul.f32 0.125, %v3341_v39  ;;  %v3381_v58 = vadd.f32 %v3380_v46, %v3379_v36  ;;  %v3385_v59 = vmul.f32 0.125, %v3353_v45  ;;  %v3329_v45 = vld [vmem:[#allocation10 + $0x42] ss:$8 sm:$0xf] }
 0xa76   :  { %v3386_v60 = vmul.f32 0.125, %v3363_v14  ;;  %v3390_v31 = vmul.f32 %v3382_v12, %v3382_v12  ;;  %v3388_v30 = vmul.f32 0.125, %v3375_v50  ;;  %v3392_v62 = vmul.f32 %v3384_v53, %v3384_v53 }
 0xa77   :  { %v3387_v15 = vmul.f32 0.125, %v3369_v28  ;;  %v3391_v5 = vmul.f32 %v3383_v54, %v3383_v54  ;;  %v3389_v0 = vmul.f32 0.125, %v3381_v58  ;;  %v3393_v2 = vmul.f32 %v3385_v59, %v3385_v59 }
 0xa78   :  { %v3394_v1 = vsub.f32 %v3386_v60, %v3390_v31  ;;  %v3396_v38 = vsub.f32 %v3388_v30, %v3392_v62 }
 0xa79   :  { %v3395_v40 = vsub.f32 %v3387_v15, %v3391_v5  ;;  %v3397_v3 = vsub.f32 %v3389_v0, %v3393_v2 }
 0xa7a   :  { %v3398_v9 = vadd.f32 1e-05, %v3394_v1  ;;  %v3400_v55 = vadd.f32 1e-05, %v3396_v38 }
 0xa7b   :  { %v3399_v7 = vadd.f32 1e-05, %v3395_v40  ;;  %v3401_v4 = vadd.f32 1e-05, %v3397_v3 }
 0xa7c   :  { %4123 = vrsqrt.f32 %v3398_v9 }
 0xa7d   :  { %4125 = vrsqrt.f32 %v3400_v55 }
 0xa7e   :  { %4127 = vrsqrt.f32 %v3399_v7 }
 0xa7f   :  { %4129 = vrsqrt.f32 %v3401_v4 }
 0xa86   :  { %v4124_v10 = vpop.eup %4123 }
 0xa87   :  { %v4126_v13 = vpop.eup %4125 }
 0xa88   :  { %v4128_v17 = vpop.eup %4127 }
 0xa89   :  { %v4130_v18 = vpop.eup %4129  ;;  %v3410_v42 = vcombine.low %v4124_v10, %v4128_v17 }
 0xa8a   :  { %v3411_v44 = vcombine.low %v4126_v13, %v4130_v18 }
 0xa8b   :  { %v3418_v20 = vrot.slane %v3410_v42, %v4500_v49 }
 0xa8c   :  { %v3425_v61 = vrot.slane %v3411_v44, %v4500_v49 }
 0xa8e   :  { %v3426_v63 = vcombine.low %v3418_v20, %v3425_v61 }
 0xa90   :  { %v3433_v22 = vrot.slane %v3426_v63, %v4500_v49 }
 0xa92   :  { %v3435_v23 = vmul.f32 %v3433_v22, %v3327_v21 }
 0xa94   :  { %v3440_v26 = vrot.slane %v3435_v23, %v4452_v6  ;;  %v3444_v24 = vrot.slane %v3435_v23, %v4455_v8  ;;  %v3448_v29 = vrot.slane %v3435_v23, %v4480_v56  ;;  %v3452_v25 = vrot.slane %v3435_v23, %v4483_v57 }
 0xa96   :  { %v3457_v32 = vmul.f32 %v3440_v26, %v3382_v12  ;;  %v3458_v27 = vmul.f32 %v3444_v24, %v3383_v54  ;;  %v3459_v11 = vmul.f32 %v3448_v29, %v3384_v53  ;;  %v3460_v33 = vmul.f32 %v3452_v25, %v3385_v59 }
 0xa97   :  { %v3491_v34 = vmul.f32 %v4770_v47, %v3440_v26  ;;  %v3492_v35 = vmul.f32 %v4774_v51, %v3444_v24  ;;  %v3493_v36 = vmul.f32 %v4772_v48, %v3448_v29  ;;  %v3494_v16 = vmul.f32 %v4776_v52, %v3452_v25 }
 0xa98   :  { %v3465_v37 = vcombine.low %v3457_v32, %v3458_v27  ;;  %v3466_v41 = vcombine.low %v3459_v11, %v3460_v33 }
 0xa9a   :  { %v3473_v19 = vrot.slane %v3465_v37, %v4500_v49  ;;  %v3480_v39 = vrot.slane %v3466_v41, %v4500_v49 }
 0xa9c   :  { %v3481_v43 = vcombine.low %v3473_v19, %v3480_v39 }
 0xa9e   :  { %v3488_v46 = vrot.slane %v3481_v43, %v4500_v49 }
 0xaa0   :  { %v3490_v14 = vsub.f32 %v3329_v45, %v3488_v46 }
 0xaa2   :  { %v3499_v12 = vrot.slane %v3490_v14, %v4452_v6  ;;  %v3503_v47 = vrot.slane %v3490_v14, %v4455_v8  ;;  %v3507_v51 = vrot.slane %v3490_v14, %v4480_v56  ;;  %v3511_v48 = vrot.slane %v3490_v14, %v4483_v57 }
 0xaa4   :  { %v3516_v52 = vadd.f32 %v3499_v12, %v3491_v34  ;;  %v3517_v50 = vadd.f32 %v3503_v47, %v3492_v35  ;;  %v3518_v53 = vadd.f32 %v3507_v51, %v3493_v36  ;;  %v3519_v28 = vadd.f32 %v3511_v48, %v3494_v16 }
 0xaa6   :  { %v3520_v54 = vmul.f32 0.01, %v3516_v52  ;;  %v3521_v58 = vmul.f32 0.01, %v3517_v50  ;;  %v3522_v59 = vmul.f32 0.01, %v3518_v53 }
 0xaa7   :  { %v3523_v60 = vmul.f32 0.01, %v3519_v28 }
 0xaa8   :  { %v4812_v31 = vmax.f32 %v3516_v52, %v3520_v54  ;;  %v3525_v49 = vmax.f32 %v3517_v50, %v3521_v58  ;;  %v4814_v30 = vmax.f32 %v3518_v53, %v3522_v59 }
 0xaa9   :  { %v4816_v62 = vmax.f32 %v3519_v28, %v3523_v60 }
 0xaaa   :  { %4243 = dma.done.wait [#allocation6 + $0x6], 8192 }
 0xaab   :  { %4244 = vsyncadd [#allocation6 + $0x6], 4294959104  ;;  %v3598_v56 = vpack.c.bf16 %v3525_v49, %v3525_v49  ;;  %v3532_v57 = vld [vmem:[#allocation5 + $0x8] sm:$0xff]  ;;  %v3531_v15 = vld [vmem:[#allocation5] sm:$0xff]  ;;  %v3597_v34 = vpack.c.bf16 %v4812_v31, %v4812_v31  ;;  %v3600_v35 = vpack.c.bf16 %v4816_v62, %v4816_v62  ;;  %s4278_s0 = smov [#allocation12]  }
 0xaac   :  { %v3534_v5 = vld [vmem:[#allocation5 + $0x18] sm:$0xff]  ;;  %3612 = vmatprep.subr.bf16.mxu0 %v3532_v57  ;;  %v3533_v0 = vld [vmem:[#allocation5 + $0x10] sm:$0xff]  ;;  %v3536_v2 = vld [vmem:[#allocation5 + $0x28] sm:$0xff]  ;;  %s3714_s10 = sshll.u32 %s4278_s0, 4  ;;  %s3715_s10 = int_to_ptr.vmem [resolvable:$true] %s3714_s10 }
 0xaad   :  { %3644 = vmatprep.mubr.bf16.mxu0 %v3598_v56  ;;  %3613 = vmatpush1.bf16.msra.mxu0 %v3531_v15  ;;  %v3535_v1 = vld [vmem:[#allocation5 + $0x20] sm:$0xff]  ;;  %v3538_v38 = vld [vmem:[#allocation5 + $0x38] sm:$0xff]  ;;  %v3537_v40 = vld [vmem:[#allocation5 + $0x30] sm:$0xff]  ;;  %s4205_s13 = scalar_lea.vmem %s3715_s10, 256  ;;  %p4210_p11 = scmp.lt.s32.totalorder %s3715_s10, %s3715_s10 }
 0xaae   :  { %3614 = vmatprep.subr.bf16.mxu0 %v3534_v5  ;;  %v3540_v3 = vld [vmem:[#allocation5 + $0x48] sm:$0xff]  ;;  %v3539_v9 = vld [vmem:[#allocation5 + $0x40] sm:$0xff]  ;;  %v3542_v55 = vld [vmem:[#allocation5 + $0x58] sm:$0xff]  ;;  %p4206_p10 = scmp.ne.s32.totalorder %s3715_s10, %s4205_s13  ;;  %p4211_p12 = scmp.lt.s32.totalorder %s4205_s13, %s4205_s13 }
 0xaaf   :  { %v3541_v7 = vld [vmem:[#allocation5 + $0x50] sm:$0xff]  ;;  %v3544_v4 = vld [vmem:[#allocation5 + $0x68] sm:$0xff]  ;;  %v3543_v10 = vld [vmem:[#allocation5 + $0x60] sm:$0xff] }
 0xab0   :  { %v3546_v13 = vld [vmem:[#allocation5 + $0x78] sm:$0xff]  ;;  %v3545_v17 = vld [vmem:[#allocation5 + $0x70] sm:$0xff]  ;;  %v3548_v18 = vld [vmem:[#allocation5 + $0x88] sm:$0xff]  ;;  %p4212_p13 = por %p4211_p12, %p4210_p11 }
 0xab1   :  { %3615 = vmatpush1.bf16.msra.mxu0 %v3533_v0  ;;  %v3547_v42 = vld [vmem:[#allocation5 + $0x80] sm:$0xff]  ;;  %v3550_v44 = vld [vmem:[#allocation5 + $0x98] sm:$0xff]  ;;  %v3549_v20 = vld [vmem:[#allocation5 + $0x90] sm:$0xff] }
 0xab2   :  { %3616 = vmatprep.subr.bf16.mxu0 %v3536_v2  ;;  %v3552_v61 = vld [vmem:[#allocation5 + $0xa8] sm:$0xff]  ;;  %v3551_v63 = vld [vmem:[#allocation5 + $0xa0] sm:$0xff]  ;;  %v3554_v21 = vld [vmem:[#allocation5 + $0xb8] sm:$0xff]  ;;  %p4213_p0 = pnand %p4212_p13, %p4206_p10 }
 0xab3   :  { %v3553_v22 = vld [vmem:[#allocation5 + $0xb0] sm:$0xff]  ;;  %v3556_v23 = vld [vmem:[#allocation5 + $0xc8] sm:$0xff]  ;;  %v3555_v26 = vld [vmem:[#allocation5 + $0xc0] sm:$0xff] }
 0xab4   :  { %v3558_v24 = vld [vmem:[#allocation5 + $0xd8] sm:$0xff]  ;;  %v3557_v29 = vld [vmem:[#allocation5 + $0xd0] sm:$0xff]  ;;  %v3560_v25 = vld [vmem:[#allocation5 + $0xe8] sm:$0xff] }
 0xab5   :  { %3617 = vmatpush1.bf16.msra.mxu0 %v3535_v1  ;;  %v3559_v32 = vld [vmem:[#allocation5 + $0xe0] sm:$0xff]  ;;  %v3562_v27 = vld [vmem:[#allocation5 + $0xf8] sm:$0xff]  ;;  %v3561_v11 = vld [vmem:[#allocation5 + $0xf0] sm:$0xff]  ;;  %v3599_v1 = vpack.c.bf16 %v4814_v30, %v4814_v30 }
 0xab6   :  { %3618 = vmatprep.subr.bf16.mxu0 %v3538_v38  ;;  %v3564_v33 = vld [vmem:[#allocation5 + $0x108] sm:$0xff]  ;;  %v3563_v36 = vld [vmem:[#allocation5 + $0x100] sm:$0xff]  ;;  %v3566_v16 = vld [vmem:[#allocation5 + $0x118] sm:$0xff] }
 0xab7   :  { %v3565_v37 = vld [vmem:[#allocation5 + $0x110] sm:$0xff]  ;;  %v3568_v41 = vld [vmem:[#allocation5 + $0x128] sm:$0xff]  ;;  %v3567_v19 = vld [vmem:[#allocation5 + $0x120] sm:$0xff] }
 0xab8   :  { %v3570_v39 = vld [vmem:[#allocation5 + $0x138] sm:$0xff]  ;;  %v3569_v43 = vld [vmem:[#allocation5 + $0x130] sm:$0xff]  ;;  %v3572_v45 = vld [vmem:[#allocation5 + $0x148] sm:$0xff] }
 0xab9   :  { %3619 = vmatpush1.bf16.msra.mxu0 %v3537_v40  ;;  %v3571_v46 = vld [vmem:[#allocation5 + $0x140] sm:$0xff]  ;;  %v3574_v14 = vld [vmem:[#allocation5 + $0x158] sm:$0xff]  ;;  %v3573_v12 = vld [vmem:[#allocation5 + $0x150] sm:$0xff] }
 0xaba   :  { %3620 = vmatprep.subr.bf16.mxu0 %v3540_v3  ;;  %v3576_v47 = vld [vmem:[#allocation5 + $0x168] sm:$0xff]  ;;  %v3575_v51 = vld [vmem:[#allocation5 + $0x160] sm:$0xff]  ;;  %v3578_v48 = vld [vmem:[#allocation5 + $0x178] sm:$0xff] }
 0xabb   :  { %v3577_v52 = vld [vmem:[#allocation5 + $0x170] sm:$0xff]  ;;  %v3580_v50 = vld [vmem:[#allocation5 + $0x188] sm:$0xff]  ;;  %v3579_v53 = vld [vmem:[#allocation5 + $0x180] sm:$0xff] }
 0xabc   :  { %v3582_v28 = vld [vmem:[#allocation5 + $0x198] sm:$0xff]  ;;  %v3581_v54 = vld [vmem:[#allocation5 + $0x190] sm:$0xff]  ;;  %v3584_v58 = vld [vmem:[#allocation5 + $0x1a8] sm:$0xff] }
 0xabd   :  { %3621 = vmatpush1.bf16.msra.mxu0 %v3539_v9  ;;  %v3583_v59 = vld [vmem:[#allocation5 + $0x1a0] sm:$0xff]  ;;  %v3586_v60 = vld [vmem:[#allocation5 + $0x1b8] sm:$0xff]  ;;  %v3585_v31 = vld [vmem:[#allocation5 + $0x1b0] sm:$0xff] }
 0xabe   :  { %3622 = vmatprep.subr.bf16.mxu0 %v3542_v55  ;;  %v3588_v49 = vld [vmem:[#allocation5 + $0x1c8] sm:$0xff]  ;;  %v3587_v62 = vld [vmem:[#allocation5 + $0x1c0] sm:$0xff]  ;;  %v3590_v56 = vld [vmem:[#allocation5 + $0x1d8] sm:$0xff] }
 0xabf   :  { %v3589_v57 = vld [vmem:[#allocation5 + $0x1d0] sm:$0xff]  ;;  %v3592_v15 = vld [vmem:[#allocation5 + $0x1e8] sm:$0xff]  ;;  %v3591_v5 = vld [vmem:[#allocation5 + $0x1e0] sm:$0xff] }
 0xac0   :  { %v3594_v0 = vld [vmem:[#allocation5 + $0x1f8] sm:$0xff]  ;;  %v3593_v2 = vld [vmem:[#allocation5 + $0x1f0] sm:$0xff]  ;;  %v3596_v38 = vld [vmem:[#allocation10 + $0x43] ss:$8 sm:$0x3] }
 0xac1   :  { %3623 = vmatpush1.bf16.msra.mxu0 %v3541_v7  ;;  %v3605_v40 = vrot.slane %v3596_v38, %v4452_v6  ;;  %v3609_v3 = vrot.slane %v3596_v38, %v4455_v8 }
 0xac2   :  { %3624 = vmatprep.subr.bf16.mxu0 %v3544_v4 }
 0xac5   :  { %3625 = vmatpush1.bf16.msra.mxu0 %v3543_v10 }
 0xac6   :  { %3626 = vmatprep.subr.bf16.mxu0 %v3546_v13 }
 0xac9   :  { %3627 = vmatpush1.bf16.msra.mxu0 %v3545_v17 }
 0xaca   :  { %3628 = vmatprep.subr.bf16.mxu0 %v3548_v18 }
 0xacd   :  { %3629 = vmatpush1.bf16.msra.mxu0 %v3547_v42 }
 0xace   :  { %3630 = vmatprep.subr.bf16.mxu0 %v3550_v44 }
 0xad1   :  { %3631 = vmatpush1.bf16.msra.mxu0 %v3549_v20 }
 0xad2   :  { %3632 = vmatprep.subr.bf16.mxu0 %v3552_v61 }
 0xad5   :  { %3633 = vmatpush1.bf16.msra.mxu0 %v3551_v63 }
 0xad6   :  { %3634 = vmatprep.subr.bf16.mxu0 %v3554_v21 }
 0xad9   :  { %3635 = vmatpush1.bf16.msra.mxu0 %v3553_v22 }
 0xada   :  { %3636 = vmatprep.subr.bf16.mxu0 %v3556_v23 }
 0xadd   :  { %3637 = vmatpush1.bf16.msra.mxu0 %v3555_v26 }
 0xade   :  { %3638 = vmatprep.subr.bf16.mxu0 %v3558_v24 }
 0xae1   :  { %3639 = vmatpush1.bf16.msra.mxu0 %v3557_v29 }
 0xae2   :  { %3640 = vmatprep.subr.bf16.mxu0 %v3560_v25 }
 0xae5   :  { %3641 = vmatpush1.bf16.msra.mxu0 %v3559_v32 }
 0xae6   :  { %3642 = vmatprep.subr.bf16.mxu0 %v3562_v27 }
 0xae9   :  { %3643 = vmatpush1.bf16.msra.mxu0 %v3561_v11 }
 0xaea   :  { %3653 = vmatprep.subr.bf16.mxu0 %v3564_v33 }
 0xaec   :  { %3645 = vmatmul.mubr.bf16.vlgmr.msra.gmra.mrb[24].mxu0 %v3597_v34 }
 0xaed   :  { %3654 = vmatpush1.bf16.msra.mxu0 %v3563_v36  ;;  %3685 = vmatprep.mubr.bf16.mxu0 %v3600_v35 }
 0xaee   :  { %3655 = vmatprep.subr.bf16.mxu0 %v3566_v16 }
 0xaf1   :  { %3656 = vmatpush1.bf16.msra.mxu0 %v3565_v37 }
 0xaf2   :  { %3657 = vmatprep.subr.bf16.mxu0 %v3568_v41 }
 0xaf5   :  { %3658 = vmatpush1.bf16.msra.mxu0 %v3567_v19 }
 0xaf6   :  { %3659 = vmatprep.subr.bf16.mxu0 %v3570_v39 }
 0xaf9   :  { %3660 = vmatpush1.bf16.msra.mxu0 %v3569_v43 }
 0xafa   :  { %3661 = vmatprep.subr.bf16.mxu0 %v3572_v45 }
 0xafd   :  { %3662 = vmatpush1.bf16.msra.mxu0 %v3571_v46 }
 0xafe   :  { %3663 = vmatprep.subr.bf16.mxu0 %v3574_v14 }
 0xb01   :  { %3664 = vmatpush1.bf16.msra.mxu0 %v3573_v12 }
 0xb02   :  { %3665 = vmatprep.subr.bf16.mxu0 %v3576_v47 }
 0xb05   :  { %3666 = vmatpush1.bf16.msra.mxu0 %v3575_v51 }
 0xb06   :  { %3667 = vmatprep.subr.bf16.mxu0 %v3578_v48 }
 0xb09   :  { %3668 = vmatpush1.bf16.msra.mxu0 %v3577_v52 }
 0xb0a   :  { %3669 = vmatprep.subr.bf16.mxu0 %v3580_v50 }
 0xb0d   :  { %3670 = vmatpush1.bf16.msra.mxu0 %v3579_v53 }
 0xb0e   :  { %3671 = vmatprep.subr.bf16.mxu0 %v3582_v28 }
 0xb11   :  { %3672 = vmatpush1.bf16.msra.mxu0 %v3581_v54 }
 0xb12   :  { %3673 = vmatprep.subr.bf16.mxu0 %v3584_v58 }
 0xb15   :  { %3674 = vmatpush1.bf16.msra.mxu0 %v3583_v59 }
 0xb16   :  { %3675 = vmatprep.subr.bf16.mxu0 %v3586_v60 }
 0xb19   :  { %3676 = vmatpush1.bf16.msra.mxu0 %v3585_v31 }
 0xb1a   :  { %3677 = vmatprep.subr.bf16.mxu0 %v3588_v49 }
 0xb1d   :  { %3678 = vmatpush1.bf16.msra.mxu0 %v3587_v62 }
 0xb1e   :  { %3679 = vmatprep.subr.bf16.mxu0 %v3590_v56 }
 0xb21   :  { %3680 = vmatpush1.bf16.msra.mxu0 %v3589_v57 }
 0xb22   :  { %3681 = vmatprep.subr.bf16.mxu0 %v3592_v15 }
 0xb25   :  { %3682 = vmatpush1.bf16.msra.mxu0 %v3591_v5 }
 0xb26   :  { %3683 = vmatprep.subr.bf16.mxu0 %v3594_v0 }
 0xb29   :  { %3684 = vmatpush1.bf16.msra.mxu0 %v3593_v2 }
 0xb2c   :  { %3686 = vmatmul.mubr.bf16.vlgmr.msra.gmra.mrb[24].mxu0 %v3599_v1 }
 0xbff   :  { %v3687_v9 = vpop.f32.mrb[24].mxu0 }
 0xc00   :  { %v3917_v55 = vadd.f32 %v3687_v9, %v3605_v40  ;;  %v3689_v7 = vpop.f32.mrb[25].mxu0 }
 0xc01   :  { %v3918_v4 = vadd.f32 %v3689_v7, %v3609_v3  ;;  %v3691_v10 = vpop.f32.mrb[26].mxu0 }
 0xc02   :  { %v3848_v13 = vmul.f32 -1.442695, %v3917_v55  ;;  %v3692_v17 = vpop.f32.mrb[27].mxu0 }
 0xc03   :  { %v3849_v18 = vmul.f32 -1.442695, %v3918_v4 }
 0xc04   :  { %4131 = vpow2.f32 %v3848_v13 }
 0xc05   :  { %4133 = vpow2.f32 %v3849_v18 }
 0xc0e   :  { %v4132_v42 = vpop.eup %4131 }
 0xc0f   :  { %v4134_v44 = vpop.eup %4133  ;;  %v3700_v30 = vadd.f32 1.0, %v4132_v42 }
 0xc10   :  { %v3701_v20 = vadd.f32 1.0, %v4134_v44 }
 0xc11   :  { %4135 = vrcp.f32 %v3700_v30 }
 0xc12   :  { %4137 = vrcp.f32 %v3701_v20 }
 0xc1b   :  { %v4136_v6 = vpop.eup %4135 }
 0xc1c   :  { %v4138_v8 = vpop.eup %4137  ;;  %3706 = vst [vmem:[#allocation12] sm:$0xff] %v4136_v6 }
 0xc1d   :  { %3707 = vst [vmem:[#allocation12 + $0x8] sm:$0xff] %v4138_v8 }
 0xc1e   :  { %4216 = shalt.err (!%p4213_p0)
}
 0xc1f   :  { %s4217_s24 = scalar_lea.hbm %s4845_s7, 256 }
 0xc20   :  { %p4218_p1 = scmp.ne.s32.totalorder %s4845_s7, %s4217_s24  ;;  %p4221_p2 = scmp.lt.u32.totalorder %s4217_s24, %s4845_s7 }
 0xc22   :  { %p4223_p3 = pnand %p4221_p2, %p4218_p1 }
 0xc24   :  { %4226 = shalt.err (!%p4223_p3)
}
 0xc25   :  { %3717 = dma.vmem_to_hbm [thread:$0]  %s3715_s10, 256, %s4845_s7, [#allocation9]  }
 0xc26   :  { %4245 = dma.done.wait [#allocation9], 256  }
 0xc27   :  { %4246 = vsyncadd [#allocation9], 4294967040 }
 0xc28   :  { %3721 = vsyncpa [#allocation8], 1 }
 0xc29   :  { %3722 = vsyncpa [#allocation11], 1 }
 0xc2a   :  { %3723 = vsyncpa [#allocation9], 1 }
 0xc2b   :  { %3724 = vsyncmov [#allocation6] }
 0xc2e   :  { %s3725_s26 = vpop.sfrf %3724 }
 0xc2f   :  { %p3850_p4 = scmp.ne.s32.totalorder %s3725_s26, 0 }
 0xc31   :  { %3729 = shalt.err (%p3850_p4)  }
 0xc32   :  { %3731 = vsyncmov [#allocation6 + $0x1] }
 0xc35   :  { %s3732_s28 = vpop.sfrf %3731 }
 0xc36   :  { %p3851_p5 = scmp.ne.s32.totalorder %s3732_s28, 0 }
 0xc38   :  { %3736 = shalt.err (%p3851_p5)  }
 0xc39   :  { %3738 = vsyncmov [#allocation6 + $0x2] }
 0xc3c   :  { %s3739_s12 = vpop.sfrf %3738 }
 0xc3d   :  { %p3852_p6 = scmp.ne.s32.totalorder %s3739_s12, 0 }
 0xc3f   :  { %3743 = shalt.err (%p3852_p6)  }
 0xc40   :  { %3745 = vsyncmov [#allocation6 + $0x3] }
 0xc43   :  { %s3746_s14 = vpop.sfrf %3745 }
 0xc44   :  { %p3853_p7 = scmp.ne.s32.totalorder %s3746_s14, 0 }
 0xc46   :  { %3750 = shalt.err (%p3853_p7)  }
 0xc47   :  { %3752 = vsyncmov [#allocation6 + $0x4] }
 0xc4a   :  { %s3753_s7 = vpop.sfrf %3752 }
 0xc4b   :  { %p3854_p8 = scmp.ne.s32.totalorder %s3753_s7, 0 }
 0xc4d   :  { %3757 = shalt.err (%p3854_p8)  }
 0xc4e   :  { %3759 = vsyncmov [#allocation6 + $0x5] }
 0xc51   :  { %s3760_s15 = vpop.sfrf %3759 }
 0xc52   :  { %p3855_p9 = scmp.ne.s32.totalorder %s3760_s15, 0 }
 0xc54   :  { %3764 = shalt.err (%p3855_p9)  }
 0xc55   :  { %3766 = vsyncmov [#allocation6 + $0x6] }
 0xc58   :  { %s3767_s16 = vpop.sfrf %3766 }
 0xc59   :  { %p3856_p10 = scmp.ne.s32.totalorder %s3767_s16, 0 }
 0xc5b   :  { %3771 = shalt.err (%p3856_p10)  }

</bundles_post_ra>
